<compile_context>
chip_gen: v7x
topology: tpu7x:2x2x1
jax: 0.10.0
libtpu: 0.0.40
codegen_flags: <defaults>
</compile_context>

<pallas_src>
import functools

import jax
import jax.numpy as jnp
from jax import lax
from jax.experimental import pallas as pl
from jax.experimental.pallas import tpu as pltpu

# ---- model hyper-parameters (match the PyTorch __init__ defaults) ----
E = 60            # sensor_embed_dim
NHEADS = 3
HD = E // NHEADS  # head dim = 20
H = 64            # LSTM hidden size
NCLS = 4          # num_classes
N_SENSORS = 4
DIN = N_SENSORS * E   # lstm_input_dim = 240


def _pick_row_tile(B):
    # row tile for the fused embed/attention kernel (rows = seq*bs tokens)
    for t in (1024, 512, 256, 128, 64, 32, 16, 8):
        if B % t == 0:
            return t
    return B        # whole extent (block dim == array dim is always legal)


def _pick_batch_tile(bs, seq_len):
    # largest sublane-legal batch tile whose [tbb, seq, 4H] f32 block stays under
    # ~12 MiB (2x buffered < default 32 MiB scoped VMEM, v7x-safe).
    budget_rows = (12 * 1024 * 1024) // (4 * H * 4)
    for t in (256, 128, 64, 32, 16, 8):
        if bs % t == 0 and t * seq_len <= budget_rows:
            return t
    return bs
    # TODO(synk): for very long sequences add an inner "arbitrary" time-chunk grid
    # axis in kernel B instead of falling back to tbb=bs.


# ---------------------------------------------------------------------------
# Kernel A: (embed+QKV fused weight) -> multi-head attention over sensors
#           -> single folded (out_proj @ W_ih0) projection
#           output = LSTM layer-0 input pre-activation [tb, 4H] (bias included,
#           gate columns already reordered to i,f,o,g)
# ---------------------------------------------------------------------------
def _embed_attn_proj_kernel(tb, x_ref, weqkv_ref, beqkv_ref, wcomb_ref,
                            bfused_ref, o_ref):
    # fused embed+QKV: [tb*n, 5] @ [5, 3E]  (scale already folded into Q columns)
    qkv = (jnp.dot(x_ref[...], weqkv_ref[...], preferred_element_type=jnp.float32)
           + beqkv_ref[...])                                          # [tb*n, 3E]
    q = qkv[:, 0:E].reshape(tb, N_SENSORS, E)
    k = qkv[:, E:2 * E].reshape(tb, N_SENSORS, E)
    v = qkv[:, 2 * E:3 * E].reshape(tb, N_SENSORS, E)

    head_outs = []
    for h in range(NHEADS):
        lo = h * HD
        qh = q[:, :, lo:lo + HD]                                      # [tb, n, HD]
        kh = k[:, :, lo:lo + HD]
        vh = v[:, :, lo:lo + HD]
        s = jnp.einsum('bid,bjd->bij', qh, kh,
                       preferred_element_type=jnp.float32)            # [tb, n, n]
        s = s - jnp.max(s, axis=-1, keepdims=True)
        p = jnp.exp(s)
        p = p * pl.reciprocal(jnp.sum(p, axis=-1, keepdims=True), approx=True)
        head_outs.append(jnp.einsum('bij,bjd->bid', p, vh,
                                    preferred_element_type=jnp.float32))
    attn = jnp.concatenate(head_outs, axis=-1)                        # [tb, n, E]

    # single deep projection: [tb, 240] @ [240, 4H]  (out_proj & W_ih0 folded)
    attn_flat = attn.reshape(tb, DIN)
    o_ref[...] = (jnp.dot(attn_flat, wcomb_ref[...],
                          preferred_element_type=jnp.float32)
                  + bfused_ref[...])


# ---------------------------------------------------------------------------
# Kernel B: 2-layer LSTM, software-pipelined by one timestep so the whole step
#           is ONE [tbb, 2H] @ [2H, 8H] matmul, + mean-pool + fc epilogue.
#           Gate column order (after reorder in init_params): i, f, o, g.
#           hcat scratch holds [h0^{t-1} | h1^{t-2}] at the top of iteration t.
# ---------------------------------------------------------------------------
def _lstm_pool_fc_kernel(seq_len, pre_ref, wblk_ref, b1_ref, wfc_ref, bfc_ref,
                         o_ref, hcat, c0, c1, hsum):
    hcat[...] = jnp.zeros_like(hcat)
    c0[...] = jnp.zeros_like(c0)
    c1[...] = jnp.zeros_like(c1)
    hsum[...] = jnp.zeros_like(hsum)

    def gates_ifog(pre):
        sig = jax.nn.sigmoid(pre[:, 0:3 * H])       # i, f, o in one 192-lane span
        g = jnp.tanh(pre[:, 3 * H:4 * H])
        return sig[:, 0:H], sig[:, H:2 * H], sig[:, 2 * H:3 * H], g

    def step(t, carry):
        # one fused recurrent matmul: [h0^{t-1} | h1^{t-2}] @ [[whh0|wih1],[0|whh1]]
        rec = jnp.dot(hcat[...], wblk_ref[...],
                      preferred_element_type=jnp.float32)             # [tbb, 8H]

        # ---- layer 0 at time t (skipped on the drain iteration t == seq_len) ----
        @pl.when(t < seq_len)
        def _():
            x0 = pre_ref[t]                                           # [tbb, 4H]
            pre0 = x0 + rec[:, 0:4 * H]
            i0, f0, o0, g0 = gates_ifog(pre0)
            c0_new = f0 * c0[...] + i0 * g0
            c0[...] = c0_new
            hcat[:, 0:H] = o0 * jnp.tanh(c0_new)                      # h0^t

        # ---- layer 1 at time t-1 (skipped on the prime iteration t == 0) ----
        @pl.when(t >= 1)
        def _():
            pre1 = rec[:, 4 * H:8 * H] + b1_ref[...]
            i1, f1, o1, g1 = gates_ifog(pre1)
            c1_new = f1 * c1[...] + i1 * g1
            c1[...] = c1_new
            h1_new = o1 * jnp.tanh(c1_new)                            # h1^{t-1}
            hcat[:, H:2 * H] = h1_new
            hsum[...] = hsum[...] + h1_new
        return carry

    lax.fori_loop(0, seq_len + 1, step, 0, unroll=2)

    # mean-pool over time + fc (fused epilogue)
    pooled = hsum[...] * jnp.float32(1.0 / seq_len)                   # [tbb, H]
    o_ref[...] = (jnp.dot(pooled, wfc_ref[...],
                          preferred_element_type=jnp.float32)
                  + bfc_ref[...])                                     # [tbb, NCLS]


# ---------------------------------------------------------------------------
# Parameter init (deterministic, synthetic, PyTorch weight layout) + glue folds
# ---------------------------------------------------------------------------
def init_params(key):
    ks = jax.random.split(key, 16)
    rnd = lambda k, shape: jax.random.normal(k, shape, jnp.float32) * 0.1

    # sensor_embed: Linear(5, E)
    we = rnd(ks[0], (E, 5)); be = rnd(ks[1], (E,))
    # MultiheadAttention(E, 3 heads): in_proj [3E, E] (q|k|v), out_proj [E, E]
    in_proj_w = rnd(ks[2], (3 * E, E)); in_proj_b = rnd(ks[3], (3 * E,))
    wo = rnd(ks[4], (E, E)); bo = rnd(ks[5], (E,))
    # LSTM layer 0
    wih0 = rnd(ks[6], (4 * H, DIN)); whh0 = rnd(ks[7], (4 * H, H))
    bih0 = rnd(ks[8], (4 * H,));     bhh0 = rnd(ks[9], (4 * H,))
    # LSTM layer 1
    wih1 = rnd(ks[10], (4 * H, H));  whh1 = rnd(ks[11], (4 * H, H))
    bih1 = rnd(ks[12], (4 * H,));    bhh1 = rnd(ks[13], (4 * H,))
    # fc: Linear(H, NCLS)
    wfc = rnd(ks[14], (NCLS, H));    bfc = rnd(ks[15], (NCLS,))

    # Fold 1: sensor_embed into the fused QKV projection  ([5, 3E], [3E])
    wqkv_t = in_proj_w.T                          # [E, 3E]
    weqkv = we.T @ wqkv_t                         # [5, 3E]
    beqkv = be @ wqkv_t + in_proj_b               # [3E]

    # Fold 2: 1/sqrt(HD) attention scale into the Q columns
    scale = 1.0 / (HD ** 0.5)
    weqkv = weqkv.at[:, 0:E].multiply(scale)
    beqkv = beqkv.at[0:E].multiply(scale)

    # Fold 3: attention out_proj into the LSTM layer-0 input projection
    wih0_t = wih0.T                               # [DIN, 4H]
    wo_t = wo.T                                   # [E, E]
    wcomb = jnp.concatenate(
        [wo_t @ wih0_t[s * E:(s + 1) * E] for s in range(N_SENSORS)], axis=0)  # [DIN, 4H]
    b_fused = (bih0 + bhh0
               + sum(bo @ wih0_t[s * E:(s + 1) * E] for s in range(N_SENSORS)))  # [4H]

    # Fold 4: gate reorder (i,f,g,o) -> (i,f,o,g) on all 4H-wide column blocks
    def gate_reorder(w):
        return jnp.concatenate(
            [w[..., :2 * H], w[..., 3 * H:4 * H], w[..., 2 * H:3 * H]], axis=-1)

    wcomb = gate_reorder(wcomb)
    b_fused = gate_reorder(b_fused)
    whh0_r = gate_reorder(whh0.T)                 # [H, 4H]
    wih1_r = gate_reorder(wih1.T)                 # [H, 4H]
    whh1_r = gate_reorder(whh1.T)                 # [H, 4H]
    b1 = gate_reorder(bih1 + bhh1)                # [4H]

    # Fold 5: block recurrent weight for one [2H]x[8H] matmul per timestep
    #   lhs = [h0^{t-1} | h1^{t-2}],  wblk = [[whh0 | wih1], [0 | whh1]]
    wblk = jnp.concatenate([
        jnp.concatenate([whh0_r, wih1_r], axis=1),
        jnp.concatenate([jnp.zeros((H, 4 * H), jnp.float32), whh1_r], axis=1),
    ], axis=0)                                    # [2H, 8H] = [128, 512]

    return dict(
        weqkv=weqkv, beqkv=beqkv.reshape(1, 3 * E),
        wcomb=wcomb, b_fused=b_fused.reshape(1, 4 * H),
        wblk=wblk, b1=b1.reshape(1, 4 * H),
        wfc_t=wfc.T, bfc=bfc.reshape(1, NCLS),
    )


# ---------------------------------------------------------------------------
# Full forward
# ---------------------------------------------------------------------------
def bilstm_forward(x, p):
    bs, seq_len, n, d_prime = x.shape
    assert n == N_SENSORS and d_prime == 5
    B = bs * seq_len
    tb = _pick_row_tile(B)

    # Time-major token order: kernel A's output then reshapes (free) to
    # [seq, bs, 4H] so kernel B's per-step read is a contiguous [tbb, 4H] slab.
    x_tm = jnp.transpose(x, (1, 0, 2, 3)).astype(jnp.float32)   # [seq, bs, n, 5]
    x2 = x_tm.reshape(B * n, d_prime)

    # ---- Kernel A: fused embed/QKV + attention + folded layer-0 projection ----
    pre = pl.pallas_call(
        functools.partial(_embed_attn_proj_kernel, tb),
        out_shape=jax.ShapeDtypeStruct((B, 4 * H), jnp.float32),
        grid=(B // tb,),
        in_specs=[
            pl.BlockSpec((tb * n, d_prime), lambda i: (i, 0)),
            pl.BlockSpec((d_prime, 3 * E), lambda i: (0, 0)),
            pl.BlockSpec((1, 3 * E), lambda i: (0, 0)),
            pl.BlockSpec((DIN, 4 * H), lambda i: (0, 0)),
            pl.BlockSpec((1, 4 * H), lambda i: (0, 0)),
        ],
        out_specs=pl.BlockSpec((tb, 4 * H), lambda i: (i, 0)),
        compiler_params=pltpu.CompilerParams(
            dimension_semantics=("parallel",)),
    )(x2, p['weqkv'], p['beqkv'], p['wcomb'], p['b_fused'])

    # Free, metadata-only reshape to time-major [seq, bs, 4H].
    pre3 = pre.reshape(seq_len, bs, 4 * H)

    # ---- Kernel B: pipelined 2-layer LSTM + mean-pool + fc ----
    tbb = _pick_batch_tile(bs, seq_len)
    logits = pl.pallas_call(
        functools.partial(_lstm_pool_fc_kernel, seq_len),
        out_shape=jax.ShapeDtypeStruct((bs, NCLS), jnp.float32),
        grid=(bs // tbb,),
        in_specs=[
            pl.BlockSpec((seq_len, tbb, 4 * H), lambda b: (0, b, 0)),
            pl.BlockSpec((2 * H, 8 * H), lambda b: (0, 0)),
            pl.BlockSpec((1, 4 * H), lambda b: (0, 0)),
            pl.BlockSpec((H, NCLS), lambda b: (0, 0)),
            pl.BlockSpec((1, NCLS), lambda b: (0, 0)),
        ],
        out_specs=pl.BlockSpec((tbb, NCLS), lambda b: (b, 0)),
        scratch_shapes=[
            pltpu.VMEM((tbb, 2 * H), jnp.float32),   # hcat = [h0 | h1]
            pltpu.VMEM((tbb, H), jnp.float32),       # c0
            pltpu.VMEM((tbb, H), jnp.float32),       # c1
            pltpu.VMEM((tbb, H), jnp.float32),       # hsum
        ],
        compiler_params=pltpu.CompilerParams(
            dimension_semantics=("parallel",)),
    )(pre3, p['wblk'], p['b1'], p['wfc_t'], p['bfc'])

    return logits


if __name__ == "__main__":
    key = jax.random.PRNGKey(0)
    k_x, k_p = jax.random.split(key)

    bs, seq_len, n, d_prime = 2, 8, 4, 5
    x = jax.random.normal(k_x, (bs, seq_len, n, d_prime), jnp.float32)

    params = init_params(k_p)

    logits = bilstm_forward(x, params)
    logits = jax.block_until_ready(logits)

    assert logits.shape == (bs, NCLS)
    assert bool(jnp.all(jnp.isfinite(logits)))
    print("KERNEL_OK")
</pallas_src>

<mosaic_0001>
module attributes {stable_mosaic.version = 11 : i64} {
  func.func @_embed_attn_proj_kernel(%arg0: i32, %arg1: memref<64x5xf32, #tpu.memory_space<vmem>>, %arg2: memref<5x180xf32, #tpu.memory_space<vmem>>, %arg3: memref<1x180xf32, #tpu.memory_space<vmem>>, %arg4: memref<240x256xf32, #tpu.memory_space<vmem>>, %arg5: memref<1x256xf32, #tpu.memory_space<vmem>>, %arg6: memref<16x256xf32, #tpu.memory_space<vmem>>) attributes {dimension_semantics = [#tpu.dimension_semantics<parallel>], iteration_bounds = array<i64: 1>, scalar_prefetch = 0 : i64, scratch_operands = 0 : i64, tpu.core_type = #tpu.core_type<tc>, window_params = [{transform_indices = @transform_0, window_bounds = array<i64: 64, 5>}, {pipeline_mode = #tpu.pipeline_mode<synchronous>, transform_indices = @transform_1, window_bounds = array<i64: 5, 180>}, {pipeline_mode = #tpu.pipeline_mode<synchronous>, transform_indices = @transform_2, window_bounds = array<i64: 1, 180>}, {pipeline_mode = #tpu.pipeline_mode<synchronous>, transform_indices = @transform_3, window_bounds = array<i64: 240, 256>}, {pipeline_mode = #tpu.pipeline_mode<synchronous>, transform_indices = @transform_4, window_bounds = array<i64: 1, 256>}, {transform_indices = @transform_5, window_bounds = array<i64: 16, 256>}]} {
    %c0 = arith.constant 0 : index
    %c0_0 = arith.constant 0 : index
    %0 = vector.load %arg1[%c0, %c0_0] : memref<64x5xf32, #tpu.memory_space<vmem>>, vector<64x5xf32>
    %c0_1 = arith.constant 0 : index
    %c0_2 = arith.constant 0 : index
    %1 = vector.load %arg2[%c0_1, %c0_2] : memref<5x180xf32, #tpu.memory_space<vmem>>, vector<5x180xf32>
    %cst = arith.constant dense<0.000000e+00> : vector<64x180xf32>
    %2 = tpu.matmul %0, %1, %cst {dimension_numbers = #tpu.dot_dimension_numbers<[1], [0], [0], [1], [0, 0, 1, 1], [], []>} : vector<64x5xf32>, vector<5x180xf32>, vector<64x180xf32> -> vector<64x180xf32>
    %c0_3 = arith.constant 0 : index
    %c0_4 = arith.constant 0 : index
    %3 = vector.load %arg3[%c0_3, %c0_4] : memref<1x180xf32, #tpu.memory_space<vmem>>, vector<1x180xf32>
    %4 = vector.broadcast %3 : vector<1x180xf32> to vector<64x180xf32>
    %5 = arith.addf %2, %4 : vector<64x180xf32>
    %6 = vector.extract_strided_slice %5 {offsets = [0, 0], sizes = [64, 60], strides = [1, 1]} : vector<64x180xf32> to vector<64x60xf32>
    %7 = vector.shape_cast %6 : vector<64x60xf32> to vector<16x4x60xf32>
    %8 = vector.extract_strided_slice %5 {offsets = [0, 60], sizes = [64, 60], strides = [1, 1]} : vector<64x180xf32> to vector<64x60xf32>
    %9 = vector.shape_cast %8 : vector<64x60xf32> to vector<16x4x60xf32>
    %10 = vector.extract_strided_slice %5 {offsets = [0, 120], sizes = [64, 60], strides = [1, 1]} : vector<64x180xf32> to vector<64x60xf32>
    %11 = vector.shape_cast %10 : vector<64x60xf32> to vector<16x4x60xf32>
    %12 = vector.extract_strided_slice %7 {offsets = [0, 0, 0], sizes = [16, 4, 20], strides = [1, 1, 1]} : vector<16x4x60xf32> to vector<16x4x20xf32>
    %13 = vector.extract_strided_slice %9 {offsets = [0, 0, 0], sizes = [16, 4, 20], strides = [1, 1, 1]} : vector<16x4x60xf32> to vector<16x4x20xf32>
    %14 = vector.extract_strided_slice %11 {offsets = [0, 0, 0], sizes = [16, 4, 20], strides = [1, 1, 1]} : vector<16x4x60xf32> to vector<16x4x20xf32>
    "tpu.trace_start"() <{level = 10 : i32, message = "bid,bjd->bij"}> : () -> ()
    %cst_5 = arith.constant dense<0.000000e+00> : vector<16x4x4xf32>
    %15 = tpu.matmul %12, %13, %cst_5 {dimension_numbers = #tpu.dot_dimension_numbers<[2], [2], [1], [1], [0, 0, 0, 1, 1, 1], [0], [0]>} : vector<16x4x20xf32>, vector<16x4x20xf32>, vector<16x4x4xf32> -> vector<16x4x4xf32>
    "tpu.trace_stop"() : () -> ()
    %cst_6 = arith.constant dense<0xFF800000> : vector<16x4xf32>
    %16 = vector.multi_reduction <maximumf>, %15, %cst_6 [2] : vector<16x4x4xf32> to vector<16x4xf32>
    %17 = vector.shape_cast %16 : vector<16x4xf32> to vector<16x4x1xf32>
    %18 = vector.broadcast %17 : vector<16x4x1xf32> to vector<16x4x4xf32>
    %19 = arith.subf %15, %18 : vector<16x4x4xf32>
    %20 = math.exp %19 : vector<16x4x4xf32>
    %cst_7 = arith.constant dense<0.000000e+00> : vector<16x4xf32>
    %21 = vector.multi_reduction <add>, %20, %cst_7 [2] : vector<16x4x4xf32> to vector<16x4xf32>
    %22 = vector.shape_cast %21 : vector<16x4xf32> to vector<16x4x1xf32>
    %23 = tpu.reciprocal %22 {approx = true} : vector<16x4x1xf32> -> vector<16x4x1xf32>
    %24 = vector.broadcast %23 : vector<16x4x1xf32> to vector<16x4x4xf32>
    %25 = arith.mulf %20, %24 : vector<16x4x4xf32>
    "tpu.trace_start"() <{level = 10 : i32, message = "bij,bjd->bid"}> : () -> ()
    %cst_8 = arith.constant dense<0.000000e+00> : vector<16x4x20xf32>
    %26 = tpu.matmul %25, %14, %cst_8 {dimension_numbers = #tpu.dot_dimension_numbers<[2], [1], [1], [2], [0, 0, 0, 1, 1, 2], [0], [0]>} : vector<16x4x4xf32>, vector<16x4x20xf32>, vector<16x4x20xf32> -> vector<16x4x20xf32>
    "tpu.trace_stop"() : () -> ()
    %27 = vector.extract_strided_slice %7 {offsets = [0, 0, 20], sizes = [16, 4, 20], strides = [1, 1, 1]} : vector<16x4x60xf32> to vector<16x4x20xf32>
    %28 = vector.extract_strided_slice %9 {offsets = [0, 0, 20], sizes = [16, 4, 20], strides = [1, 1, 1]} : vector<16x4x60xf32> to vector<16x4x20xf32>
    %29 = vector.extract_strided_slice %11 {offsets = [0, 0, 20], sizes = [16, 4, 20], strides = [1, 1, 1]} : vector<16x4x60xf32> to vector<16x4x20xf32>
    "tpu.trace_start"() <{level = 10 : i32, message = "bid,bjd->bij"}> : () -> ()
    %cst_9 = arith.constant dense<0.000000e+00> : vector<16x4x4xf32>
    %30 = tpu.matmul %27, %28, %cst_9 {dimension_numbers = #tpu.dot_dimension_numbers<[2], [2], [1], [1], [0, 0, 0, 1, 1, 1], [0], [0]>} : vector<16x4x20xf32>, vector<16x4x20xf32>, vector<16x4x4xf32> -> vector<16x4x4xf32>
    "tpu.trace_stop"() : () -> ()
    %cst_10 = arith.constant dense<0xFF800000> : vector<16x4xf32>
    %31 = vector.multi_reduction <maximumf>, %30, %cst_10 [2] : vector<16x4x4xf32> to vector<16x4xf32>
    %32 = vector.shape_cast %31 : vector<16x4xf32> to vector<16x4x1xf32>
    %33 = vector.broadcast %32 : vector<16x4x1xf32> to vector<16x4x4xf32>
    %34 = arith.subf %30, %33 : vector<16x4x4xf32>
    %35 = math.exp %34 : vector<16x4x4xf32>
    %cst_11 = arith.constant dense<0.000000e+00> : vector<16x4xf32>
    %36 = vector.multi_reduction <add>, %35, %cst_11 [2] : vector<16x4x4xf32> to vector<16x4xf32>
    %37 = vector.shape_cast %36 : vector<16x4xf32> to vector<16x4x1xf32>
    %38 = tpu.reciprocal %37 {approx = true} : vector<16x4x1xf32> -> vector<16x4x1xf32>
    %39 = vector.broadcast %38 : vector<16x4x1xf32> to vector<16x4x4xf32>
    %40 = arith.mulf %35, %39 : vector<16x4x4xf32>
    "tpu.trace_start"() <{level = 10 : i32, message = "bij,bjd->bid"}> : () -> ()
    %cst_12 = arith.constant dense<0.000000e+00> : vector<16x4x20xf32>
    %41 = tpu.matmul %40, %29, %cst_12 {dimension_numbers = #tpu.dot_dimension_numbers<[2], [1], [1], [2], [0, 0, 0, 1, 1, 2], [0], [0]>} : vector<16x4x4xf32>, vector<16x4x20xf32>, vector<16x4x20xf32> -> vector<16x4x20xf32>
    "tpu.trace_stop"() : () -> ()
    %42 = vector.extract_strided_slice %7 {offsets = [0, 0, 40], sizes = [16, 4, 20], strides = [1, 1, 1]} : vector<16x4x60xf32> to vector<16x4x20xf32>
    %43 = vector.extract_strided_slice %9 {offsets = [0, 0, 40], sizes = [16, 4, 20], strides = [1, 1, 1]} : vector<16x4x60xf32> to vector<16x4x20xf32>
    %44 = vector.extract_strided_slice %11 {offsets = [0, 0, 40], sizes = [16, 4, 20], strides = [1, 1, 1]} : vector<16x4x60xf32> to vector<16x4x20xf32>
    "tpu.trace_start"() <{level = 10 : i32, message = "bid,bjd->bij"}> : () -> ()
    %cst_13 = arith.constant dense<0.000000e+00> : vector<16x4x4xf32>
    %45 = tpu.matmul %42, %43, %cst_13 {dimension_numbers = #tpu.dot_dimension_numbers<[2], [2], [1], [1], [0, 0, 0, 1, 1, 1], [0], [0]>} : vector<16x4x20xf32>, vector<16x4x20xf32>, vector<16x4x4xf32> -> vector<16x4x4xf32>
    "tpu.trace_stop"() : () -> ()
    %cst_14 = arith.constant dense<0xFF800000> : vector<16x4xf32>
    %46 = vector.multi_reduction <maximumf>, %45, %cst_14 [2] : vector<16x4x4xf32> to vector<16x4xf32>
    %47 = vector.shape_cast %46 : vector<16x4xf32> to vector<16x4x1xf32>
    %48 = vector.broadcast %47 : vector<16x4x1xf32> to vector<16x4x4xf32>
    %49 = arith.subf %45, %48 : vector<16x4x4xf32>
    %50 = math.exp %49 : vector<16x4x4xf32>
    %cst_15 = arith.constant dense<0.000000e+00> : vector<16x4xf32>
    %51 = vector.multi_reduction <add>, %50, %cst_15 [2] : vector<16x4x4xf32> to vector<16x4xf32>
    %52 = vector.shape_cast %51 : vector<16x4xf32> to vector<16x4x1xf32>
    %53 = tpu.reciprocal %52 {approx = true} : vector<16x4x1xf32> -> vector<16x4x1xf32>
    %54 = vector.broadcast %53 : vector<16x4x1xf32> to vector<16x4x4xf32>
    %55 = arith.mulf %50, %54 : vector<16x4x4xf32>
    "tpu.trace_start"() <{level = 10 : i32, message = "bij,bjd->bid"}> : () -> ()
    %cst_16 = arith.constant dense<0.000000e+00> : vector<16x4x20xf32>
    %56 = tpu.matmul %55, %44, %cst_16 {dimension_numbers = #tpu.dot_dimension_numbers<[2], [1], [1], [2], [0, 0, 0, 1, 1, 2], [0], [0]>} : vector<16x4x4xf32>, vector<16x4x20xf32>, vector<16x4x20xf32> -> vector<16x4x20xf32>
    "tpu.trace_stop"() : () -> ()
    %57 = tpu.concatenate %26, %41, %56 in 2 : vector<16x4x20xf32>, vector<16x4x20xf32>, vector<16x4x20xf32> -> vector<16x4x60xf32>
    %58 = vector.shape_cast %57 : vector<16x4x60xf32> to vector<16x240xf32>
    %c0_17 = arith.constant 0 : index
    %c0_18 = arith.constant 0 : index
    %59 = vector.load %arg4[%c0_17, %c0_18] : memref<240x256xf32, #tpu.memory_space<vmem>>, vector<240x256xf32>
    %cst_19 = arith.constant dense<0.000000e+00> : vector<16x256xf32>
    %60 = tpu.matmul %58, %59, %cst_19 {dimension_numbers = #tpu.dot_dimension_numbers<[1], [0], [0], [1], [0, 0, 1, 1], [], []>} : vector<16x240xf32>, vector<240x256xf32>, vector<16x256xf32> -> vector<16x256xf32>
    %c0_20 = arith.constant 0 : index
    %c0_21 = arith.constant 0 : index
    %61 = vector.load %arg5[%c0_20, %c0_21] : memref<1x256xf32, #tpu.memory_space<vmem>>, vector<1x256xf32>
    %62 = vector.broadcast %61 : vector<1x256xf32> to vector<16x256xf32>
    %63 = arith.addf %60, %62 : vector<16x256xf32>
    %c0_22 = arith.constant 0 : index
    %c0_23 = arith.constant 0 : index
    %64 = vector.load %arg6[%c0_22, %c0_23] : memref<16x256xf32, #tpu.memory_space<vmem>>, vector<16x256xf32>
    tpu.vector_store %arg6[%c0_22, %c0_23], %63 {strides = array<i32>} : memref<16x256xf32, #tpu.memory_space<vmem>>, vector<16x256xf32>,
    return
  }
  func.func @transform_0(%arg0: i32) -> (i32, i32) {
    %c0_i32 = arith.constant 0 : i32
    %c0_i32_0 = arith.constant 0 : i32
    return %arg0, %c0_i32 : i32, i32
  }
  func.func @transform_1(%arg0: i32) -> (i32, i32) {
    %c0_i32 = arith.constant 0 : i32
    %c0_i32_0 = arith.constant 0 : i32
    %c0_i32_1 = arith.constant 0 : i32
    return %c0_i32, %c0_i32_0 : i32, i32
  }
  func.func @transform_2(%arg0: i32) -> (i32, i32) {
    %c0_i32 = arith.constant 0 : i32
    %c0_i32_0 = arith.constant 0 : i32
    %c0_i32_1 = arith.constant 0 : i32
    return %c0_i32, %c0_i32_0 : i32, i32
  }
  func.func @transform_3(%arg0: i32) -> (i32, i32) {
    %c0_i32 = arith.constant 0 : i32
    %c0_i32_0 = arith.constant 0 : i32
    %c0_i32_1 = arith.constant 0 : i32
    return %c0_i32, %c0_i32_0 : i32, i32
  }
  func.func @transform_4(%arg0: i32) -> (i32, i32) {
    %c0_i32 = arith.constant 0 : i32
    %c0_i32_0 = arith.constant 0 : i32
    %c0_i32_1 = arith.constant 0 : i32
    return %c0_i32, %c0_i32_0 : i32, i32
  }
  func.func @transform_5(%arg0: i32) -> (i32, i32) {
    %c0_i32 = arith.constant 0 : i32
    %c0_i32_0 = arith.constant 0 : i32
    return %arg0, %c0_i32 : i32, i32
  }
}

</mosaic_0001>

<bundles_post_ra>
// kernel: tpu_custom_call.1
= control target key start
LH: loop header
LB: loop body
LE: loop exit
PB: predicated region body
PF: predicated region fallthrough
CT: control target
= control target key end

     0   :  { %10 = vsyncpa [#allocation3], 0  ;;  %s11958_s0 = inlined_call_operand.vmem [shape: f32[64,5], index: 0, kind: input, shape index: {}]   ;;  %s11959_s1 = inlined_call_operand.vmem [shape: f32[5,180], index: 1, kind: input, shape index: {}]   ;;  %s11960_s2 = inlined_call_operand.vmem [shape: f32[1,180], index: 2, kind: input, shape index: {}]   ;;  %s11961_s3 = inlined_call_operand.hbm [shape: f32[240,256], index: 3, kind: input, shape index: {}]   ;;  %s11962_s4 = inlined_call_operand.vmem [shape: f32[1,256], index: 4, kind: input, shape index: {}]   ;;  %s11963_s5 = inlined_call_operand.hbm [shape: f32[16,256], index: 5, kind: output, shape index: {}]  }
   0x1   :  { %11 = vsyncpa [#allocation4], 0  ;;  %s10004_s18 = smov [#allocation2]   ;;  %s9956_s22 = scalar_lea.hbm %s11961_s3, 7680 }
   0x2   :  { %s23_s19 = sshll.u32 %s10004_s18, 4  ;;  %p9957_p0 = scmp.ne.s32.totalorder %s11961_s3, %s9956_s22  ;;  %s24_s19 = int_to_ptr.vmem [resolvable:$true] %s23_s19 }
   0x3   :  { %p9960_p1 = scmp.lt.u32.totalorder %s9956_s22, %s11961_s3 }
   0x5   :  { %p9962_p2 = pnand %p9960_p1, %p9957_p0 }
   0x7   :  { %9965 = shalt.err (!%p9962_p2)
}
   0x8   :  { %s9966_s27 = scalar_lea.vmem %s24_s19, 7680  ;;  %p9971_p4 = scmp.lt.s32.totalorder %s24_s19, %s24_s19 }
   0x9   :  { %p9967_p3 = scmp.ne.s32.totalorder %s24_s19, %s9966_s27  ;;  %p9972_p5 = scmp.lt.s32.totalorder %s9966_s27, %s9966_s27 }
   0xb   :  { %p9973_p6 = por %p9972_p5, %p9971_p4 }
   0xd   :  { %p9974_p7 = pnand %p9973_p6, %p9967_p3 }
   0xf   :  { %9977 = shalt.err (!%p9974_p7)
}
  0x10   :  { %s10005_s28 = smov 256   ;;  %s10006_s29 = smov 16  }
  0x11   :  { %29 = dma.hbm_to_vmem [thread:$0]  %s11961_s3, 7680, %s24_s19, [#allocation3], %s10005_s28, %s10005_s28, %s10006_s29  }
  0x12   :  { %10000 = dma.done.wait [#allocation3], 7680  }
  0x13   :  { %10001 = vsyncadd [#allocation3], 4294959616  ;;  %v11966_v0 = vmov 0.0   ;;  %vm82_vm0 = vcmask 1044480   ;;  %v44_v1 = vld [vmem:[%s11959_s1 + $0x8] sm:$0x1f]  ;;  %v47_v11 = vlaneseq }
  0x14   :  { %153 = vmatprep.mubr.f32.mxu1 %v11966_v0  ;;  %9238 = vmatprep.subr.mxu0 %v11966_v0  ;;  %v43_v2 = vld [vmem:[%s11959_s1] sm:$0x1f]  ;;  %vm57_vm1 = vcmask 39936   ;;  %v36_v4 = vld [vmem:[%s11958_s0 + $0x8] sm:$0xff]  ;;  %v37_v5 = vld [vmem:[%s11958_s0 + $0x10] sm:$0xff]  ;;  %vm10008_vm2 = vmmov 0  }
  0x15   :  { %v35_v3 = vld [vmem:[%s11958_s0] sm:$0xff]  ;;  %8786 = vmatprep.subr.msk.mxu1 %vm82_vm0, %v44_v1  ;;  %v38_v6 = vld [vmem:[%s11958_s0 + $0x18] sm:$0xff]  ;;  %v40_v8 = vld [vmem:[%s11958_s0 + $0x28] sm:$0xff]  ;;  %v10118_v12 = vshrl.u32 %v47_v11, 7  ;;  %9240 = vmatprep.mubr.msk.f32.mxu0 %vm10008_vm2, %v11966_v0  ;;  %s10011_s27 = smov 48   ;;  %s10012_s30 = smov 108  }
  0x16   :  { %8787 = vmatpush1.msk.msra.mxu1 %vm82_vm0, %v43_v2  ;;  %v39_v7 = vld [vmem:[%s11958_s0 + $0x20] sm:$0xff]  ;;  %v41_v9 = vld [vmem:[%s11958_s0 + $0x30] sm:$0xff]  ;;  %v42_v10 = vld [vmem:[%s11958_s0 + $0x38] sm:$0xff]  ;;  %s10009_s0 = smov 68   ;;  %vm244_vm3 = vcmask 162816   ;;  %vm1641_vm4 = vcmask 64512  }
  0x17   :  { %8788 = vmatmul.mubr.msk.f32.vlgmr.msra.gmra.mrb[0].mxu1 %vm57_vm1, %v35_v3  ;;  %9198 = vmatprep.subr.mxu1 %v11966_v0  ;;  %11981 = vst [vmem:[#allocation8_spill] sm:$0xff] %v10118_v12  ;;  %v11965_v13 = vsub.s32 0, %v10118_v12  ;;  %v45_v14 = vld [vmem:[%s11960_s2] sm:$0x3]  ;;  %v11964_v37 = vsub.s32 1, %v10118_v12  ;;  %s10010_s2 = smov 8  }
  0x18   :  { %159 = vmatprep.mubr.f32.mxu1 %v11966_v0  ;;  %vm1647_vm5 = vcmask 1043456   ;;  %vm1459_vm6 = vcmask 27648   ;;  %s10013_s6 = smov 116   ;;  %s10014_s7 = smov 28   ;;  %vm1643_vm7 = vcmask 31744   ;;  %vm8423_vm8 = vcmask 326656  }
  0x19   :  { %v50_v15 = vrot.slane %v45_v14, %v11965_v13  ;;  %v54_v42 = vrot.slane %v45_v14, %v11964_v37  ;;  %s10015_s8 = smov 88   ;;  %s10016_s9 = smov 96   ;;  %vm8606_vm9 = vcmask 424960   ;;  %vm8681_vm10 = vcmask 916480  }
  0x1a   :  { %s10017_s10 = smov 20   ;;  %s10018_s11 = smov 40   ;;  %vm8600_vm11 = vcmask 490496   ;;  %vm8603_vm12 = vcmask 982016  }
  0x1b   :  { %8789 = vmatmul.mubr.msk.f32.gmra.mrb[2].mxu1 %vm57_vm1, %v36_v4  ;;  %s10021_s12 = smov 52   ;;  %s10022_s3 = smov 120  }
  0x1c   :  { %165 = vmatprep.mubr.f32.mxu1 %v11966_v0  ;;  %s10023_s13 = smov 60   ;;  %s10024_s15 = smov [#allocation5]  }
  0x1d   :  { %s8774_s16 = sshll.u32 %s10024_s15, 4  ;;  %s8775_s16 = int_to_ptr.vmem [resolvable:$true] %s8774_s16 }
  0x1e   :  { %p9983_p9 = scmp.lt.s32.totalorder %s8775_s16, %s8775_s16 }
  0x1f   :  { %8790 = vmatmul.mubr.msk.f32.gmra.mrb[4].mxu1 %vm57_vm1, %v37_v5 }
  0x20   :  { %171 = vmatprep.mubr.f32.mxu1 %v11966_v0 }
  0x23   :  { %8791 = vmatmul.mubr.msk.f32.gmra.mrb[6].mxu1 %vm57_vm1, %v38_v6 }
  0x24   :  { %177 = vmatprep.mubr.f32.mxu1 %v11966_v0 }
  0x27   :  { %8792 = vmatmul.mubr.msk.f32.gmra.mrb[8].mxu1 %vm57_vm1, %v39_v7 }
  0x28   :  { %183 = vmatprep.mubr.f32.mxu1 %v11966_v0 }
  0x2b   :  { %8793 = vmatmul.mubr.msk.f32.gmra.mrb[10].mxu1 %vm57_vm1, %v40_v8 }
  0x2c   :  { %189 = vmatprep.mubr.f32.mxu1 %v11966_v0 }
  0x2f   :  { %8794 = vmatmul.mubr.msk.f32.gmra.mrb[12].mxu1 %vm57_vm1, %v41_v9 }
  0x30   :  { %195 = vmatprep.mubr.f32.mxu1 %v11966_v0 }
  0x33   :  { %8795 = vmatmul.mubr.msk.f32.gmra.mrb[14].mxu1 %vm57_vm1, %v42_v10 }
  0x34   :  { %9200 = vmatprep.mubr.msk.f32.mxu1 %vm10008_vm2, %v11966_v0 }
  0xea   :  { %v155_v16 = vpop.f32.mrb[0].mxu1 }
  0xeb   :  { %v10130_v17 = vadd.f32 %v155_v16, %v50_v15  ;;  %v157_v18 = vpop.f32.mrb[1].mxu1 }
  0xec   :  { %v158_v47 = vadd.f32 %v157_v18, %v54_v42 }
  0xed   :  { %242 = vrot.lane.b32.xlu0 %v10130_v17, %s10009_s0  ;;  %v10138_v22 = vcombine.high %v10130_v17, %v10130_v17 }
  0xee   :  { %v161_v19 = vpop.f32.mrb[2].mxu1  ;;  %v8828_v53 = vcombine.low %v158_v47, %v158_v47  ;;  %v10217_v54 = vcombine.low %v10130_v17, %v158_v47  ;;  %v10227_v57 = vcombine.high %v10130_v17, %v158_v47  ;;  %v8831_v59 = vcombine.high %v158_v47, %v158_v47 }
  0xef   :  { %v10134_v20 = vadd.f32 %v161_v19, %v50_v15  ;;  %v163_v21 = vpop.f32.mrb[3].mxu1  ;;  %11982 = vst [vmem:[#allocation9_spill] sm:$0xff] %v10138_v22 }
  0xf0   :  { %v164_v52 = vadd.f32 %v163_v21, %v54_v42 }
  0xf1   :  { %395 = vrot.lane.b32.xlu1 %v10134_v20, %s10009_s0  ;;  %319 = vrot.lane.b32.xlu0 %v10138_v22, %s10009_s0  ;;  %v10146_v23 = vcombine.high %v10134_v20, %v10134_v20 }
  0xf2   :  { %v167_v24 = vpop.f32.mrb[4].mxu1  ;;  %v10220_v55 = vcombine.low %v10134_v20, %v164_v52  ;;  %v10230_v58 = vcombine.high %v10134_v20, %v164_v52  ;;  %v8834_v62 = vcombine.low %v164_v52, %v164_v52  ;;  %v8837_v1 = vcombine.high %v164_v52, %v164_v52 }
  0xf3   :  { %11983 = vst [vmem:[#allocation10_spill] sm:$0xff] %v10146_v23  ;;  %v10148_v25 = vadd.f32 %v167_v24, %v50_v15  ;;  %v169_v26 = vpop.f32.mrb[5].mxu1 }
  0xf4   :  { %v170_v56 = vadd.f32 %v169_v26, %v54_v42 }
  0xf5   :  { %471 = vrot.lane.b32.xlu1 %v10146_v23, %s10009_s0  ;;  %547 = vrot.lane.b32.xlu0 %v10148_v25, %s10009_s0  ;;  %v10156_v27 = vcombine.high %v10148_v25, %v10148_v25 }
  0xf6   :  { %v173_v28 = vpop.f32.mrb[6].mxu1  ;;  %v10237_v60 = vcombine.low %v10148_v25, %v170_v56  ;;  %v10243_v63 = vcombine.high %v10148_v25, %v170_v56  ;;  %v8840_v4 = vcombine.low %v170_v56, %v170_v56  ;;  %v8843_v6 = vcombine.high %v170_v56, %v170_v56 }
  0xf7   :  { %11984 = vst [vmem:[#allocation11_spill] sm:$0xff] %v10156_v27  ;;  %v10158_v29 = vadd.f32 %v173_v28, %v50_v15  ;;  %v175_v30 = vpop.f32.mrb[7].mxu1 }
  0xf8   :  { %v176_v61 = vadd.f32 %v175_v30, %v54_v42 }
  0xf9   :  { %623 = vrot.lane.b32.xlu1 %v10156_v27, %s10009_s0  ;;  %699 = vrot.lane.b32.xlu0 %v10158_v29, %s10009_s0  ;;  %v10166_v31 = vcombine.high %v10158_v29, %v10158_v29 }
  0xfa   :  { %v179_v32 = vpop.f32.mrb[8].mxu1  ;;  %v10249_v2 = vcombine.low %v10158_v29, %v176_v61  ;;  %v10255_v5 = vcombine.high %v10158_v29, %v176_v61  ;;  %v8846_v9 = vcombine.low %v176_v61, %v176_v61  ;;  %v8849_v11 = vcombine.high %v176_v61, %v176_v61 }
  0xfb   :  { %v10168_v33 = vadd.f32 %v179_v32, %v50_v15  ;;  %v181_v34 = vpop.f32.mrb[9].mxu1 }
  0xfc   :  { %v182_v3 = vadd.f32 %v181_v34, %v54_v42 }
  0xfd   :  { %775 = vrot.lane.b32.xlu1 %v10166_v31, %s10009_s0  ;;  %851 = vrot.lane.b32.xlu0 %v10168_v33, %s10009_s0  ;;  %v10176_v35 = vcombine.high %v10168_v33, %v10168_v33 }
  0xfe   :  { %v185_v36 = vpop.f32.mrb[10].mxu1  ;;  %v10261_v7 = vcombine.low %v10168_v33, %v182_v3  ;;  %v10267_v10 = vcombine.high %v10168_v33, %v182_v3  ;;  %v8852_v16 = vcombine.low %v182_v3, %v182_v3  ;;  %v8855_v19 = vcombine.high %v182_v3, %v182_v3 }
  0xff   :  { %v10179_v38 = vadd.f32 %v185_v36, %v50_v15  ;;  %v187_v39 = vpop.f32.mrb[11].mxu1 }
 0x100   :  { %v188_v8 = vadd.f32 %v187_v39, %v54_v42 }
 0x101   :  { %927 = vrot.lane.b32.xlu1 %v10176_v35, %s10009_s0  ;;  %1003 = vrot.lane.b32.xlu0 %v10179_v38, %s10009_s0  ;;  %v10187_v40 = vcombine.high %v10179_v38, %v10179_v38 }
 0x102   :  { %v191_v41 = vpop.f32.mrb[12].mxu1  ;;  %v10273_v14 = vcombine.low %v10179_v38, %v188_v8  ;;  %v10279_v18 = vcombine.high %v10179_v38, %v188_v8  ;;  %v8858_v24 = vcombine.low %v188_v8, %v188_v8  ;;  %v8861_v28 = vcombine.high %v188_v8, %v188_v8 }
 0x103   :  { %v10191_v43 = vadd.f32 %v191_v41, %v50_v15  ;;  %v193_v44 = vpop.f32.mrb[13].mxu1 }
 0x105   :  { %1079 = vrot.lane.b32.xlu1 %v10187_v40, %s10009_s0  ;;  %1155 = vrot.lane.b32.xlu0 %v10191_v43, %s10009_s0  ;;  %v10199_v45 = vcombine.high %v10191_v43, %v10191_v43 }
 0x106   :  { %v197_v46 = vpop.f32.mrb[14].mxu1 }
 0x107   :  { %v10201_v48 = vadd.f32 %v197_v46, %v50_v15  ;;  %v199_v49 = vpop.f32.mrb[15].mxu1  ;;  %v194_v15 = vadd.f32 %v193_v44, %v54_v42 }
 0x108   :  { %v10203_v50 = vadd.f32 %v199_v49, %v54_v42 }
 0x109   :  { %1231 = vrot.lane.b32.xlu1 %v10199_v45, %s10009_s0  ;;  %1307 = vrot.lane.b32.xlu0 %v10201_v48, %s10009_s0  ;;  %v10211_v51 = vcombine.high %v10201_v48, %v10201_v48  ;;  %v10285_v21 = vcombine.low %v10191_v43, %v194_v15  ;;  %v10291_v26 = vcombine.high %v10191_v43, %v194_v15 }
 0x10a   :  { %v8864_v30 = vcombine.low %v194_v15, %v194_v15  ;;  %v8867_v32 = vcombine.high %v194_v15, %v194_v15  ;;  %v10311_v34 = vcombine.low %v10201_v48, %v10203_v50  ;;  %v10319_v36 = vcombine.high %v10201_v48, %v10203_v50 }
 0x10b   :  { %11985 = vst [vmem:[#allocation12_spill] sm:$0xff] %v10285_v21  ;;  %11986 = vst [vmem:[#allocation13_spill] sm:$0xff] %v10291_v26  ;;  %v8870_v39 = vcombine.low %v10203_v50, %v10203_v50  ;;  %v8873_v42 = vcombine.high %v10203_v50, %v10203_v50 }
 0x10c   :  { %11987 = vst [vmem:[#allocation14_spill] sm:$0xff] %v10311_v34  ;;  %11988 = vst [vmem:[#allocation15_spill] sm:$0xff] %v10319_v36 }
 0x10d   :  { %1383 = vrot.lane.b32.xlu1 %v10211_v51, %s10009_s0  ;;  %1639 = vrot.lane.b32.xlu0 %v8828_v53, %s10010_s2 }
 0x111   :  { %1637 = vrot.lane.b32.xlu1 %v10217_v54, %s10010_s2  ;;  %1802 = vrot.lane.b32.xlu0 %v10220_v55, %s10010_s2 }
 0x115   :  { %1721 = vrot.lane.b32.xlu1 %v10227_v57, %s10010_s2  ;;  %1883 = vrot.lane.b32.xlu0 %v10230_v58, %s10010_s2 }
 0x119   :  { %1723 = vrot.lane.b32.xlu1 %v8831_v59, %s10010_s2  ;;  %1964 = vrot.lane.b32.xlu0 %v10237_v60, %s10010_s2 }
 0x11d   :  { %1804 = vrot.lane.b32.xlu1 %v8834_v62, %s10010_s2  ;;  %2045 = vrot.lane.b32.xlu0 %v10243_v63, %s10010_s2 }
 0x121   :  { %1885 = vrot.lane.b32.xlu1 %v8837_v1, %s10010_s2  ;;  %2126 = vrot.lane.b32.xlu0 %v10249_v2, %s10010_s2 }
 0x125   :  { %1966 = vrot.lane.b32.xlu1 %v8840_v4, %s10010_s2  ;;  %2207 = vrot.lane.b32.xlu0 %v10255_v5, %s10010_s2 }
 0x129   :  { %2047 = vrot.lane.b32.xlu1 %v8843_v6, %s10010_s2  ;;  %2288 = vrot.lane.b32.xlu0 %v10261_v7, %s10010_s2 }
 0x12d   :  { %2128 = vrot.lane.b32.xlu1 %v8846_v9, %s10010_s2  ;;  %2369 = vrot.lane.b32.xlu0 %v10267_v10, %s10010_s2 }
 0x131   :  { %2209 = vrot.lane.b32.xlu1 %v8849_v11, %s10010_s2  ;;  %2450 = vrot.lane.b32.xlu0 %v10273_v14, %s10010_s2 }
 0x135   :  { %2290 = vrot.lane.b32.xlu1 %v8852_v16, %s10010_s2  ;;  %2531 = vrot.lane.b32.xlu0 %v10279_v18, %s10010_s2 }
 0x139   :  { %2371 = vrot.lane.b32.xlu1 %v8855_v19, %s10010_s2  ;;  %2612 = vrot.lane.b32.xlu0 %v10285_v21, %s10010_s2 }
 0x13d   :  { %2452 = vrot.lane.b32.xlu1 %v8858_v24, %s10010_s2  ;;  %2693 = vrot.lane.b32.xlu0 %v10291_v26, %s10010_s2 }
 0x141   :  { %2533 = vrot.lane.b32.xlu1 %v8861_v28, %s10010_s2  ;;  %2937 = vrot.lane.b32.xlu0 %v10130_v17, %s10011_s27 }
 0x145   :  { %2614 = vrot.lane.b32.xlu1 %v8864_v30, %s10010_s2  ;;  %2935 = vrot.lane.b32.xlu0 %v10130_v17, %s10012_s30 }
 0x149   :  { %2695 = vrot.lane.b32.xlu1 %v8867_v32, %s10010_s2  ;;  %3093 = vrot.lane.b32.xlu0 %v10134_v20, %s10011_s27 }
 0x14d   :  { %3015 = vrot.lane.b32.xlu1 %v10138_v22, %s10011_s27  ;;  %3091 = vrot.lane.b32.xlu0 %v10134_v20, %s10012_s30 }
 0x151   :  { %3013 = vrot.lane.b32.xlu1 %v10138_v22, %s10012_s30  ;;  %2774 = vrot.lane.b32.xlu0 %v10311_v34, %s10010_s2 }
 0x155   :  { %3171 = vrot.lane.b32.xlu1 %v10146_v23, %s10011_s27  ;;  %2855 = vrot.lane.b32.xlu0 %v10319_v36, %s10010_s2 }
 0x159   :  { %3169 = vrot.lane.b32.xlu1 %v10146_v23, %s10012_s30 }
 0x15d   :  { %2776 = vrot.lane.b32.xlu1 %v8870_v39, %s10010_s2 }
 0x15f   :  { %v243_v41 = vpop.permute.xlu0 %242 }
 0x160   :  { %9199 = vmatpush3.xpose.msk.msra.mxu1 %vm244_vm3, %v243_v41 }
 0x161   :  { %2857 = vrot.lane.b32.xlu1 %v8873_v42, %s10010_s2  ;;  %9203 = vmatprep.subr.mxu1 %v11966_v0 }
 0x163   :  { %v396_v44 = vpop.permute.xlu1 %395  ;;  %9201 = vmatmul.mubr.msk.f32.vlgmr.msra.gmra.mrb[16].mxu1 %vm244_vm3, %v10130_v17  ;;  %v320_v46 = vpop.permute.xlu0 %319 }
 0x164   :  { %9204 = vmatpush3.xpose.msk.msra.mxu1 %vm244_vm3, %v320_v46  ;;  %9205 = vmatprep.mubr.msk.f32.mxu1 %vm10008_vm2, %v11966_v0 }
 0x165   :  { %9208 = vmatprep.subr.mxu1 %v11966_v0 }
 0x167   :  { %v472_v47 = vpop.permute.xlu1 %471  ;;  %9206 = vmatmul.mubr.msk.f32.vlgmr.msra.gmra.mrb[18].mxu1 %vm244_vm3, %v10138_v22  ;;  %v548_v49 = vpop.permute.xlu0 %547 }
 0x168   :  { %9209 = vmatpush3.xpose.msk.msra.mxu1 %vm244_vm3, %v396_v44  ;;  %9210 = vmatprep.mubr.msk.f32.mxu1 %vm10008_vm2, %v11966_v0 }
 0x169   :  { %9213 = vmatprep.subr.mxu1 %v11966_v0 }
 0x16b   :  { %v624_v50 = vpop.permute.xlu1 %623  ;;  %9211 = vmatmul.mubr.msk.f32.vlgmr.msra.gmra.mrb[20].mxu1 %vm244_vm3, %v10134_v20  ;;  %v700_v52 = vpop.permute.xlu0 %699 }
 0x16c   :  { %9214 = vmatpush3.xpose.msk.msra.mxu1 %vm244_vm3, %v472_v47  ;;  %9215 = vmatprep.mubr.msk.f32.mxu1 %vm10008_vm2, %v11966_v0 }
 0x16d   :  { %9218 = vmatprep.subr.mxu1 %v11966_v0 }
 0x16f   :  { %v776_v53 = vpop.permute.xlu1 %775  ;;  %9216 = vmatmul.mubr.msk.f32.vlgmr.msra.gmra.mrb[22].mxu1 %vm244_vm3, %v10146_v23  ;;  %v852_v56 = vpop.permute.xlu0 %851 }
 0x170   :  { %9219 = vmatpush3.xpose.msk.msra.mxu1 %vm244_vm3, %v548_v49  ;;  %9239 = vmatpush3.xpose.msk.msra.mxu0 %vm244_vm3, %v852_v56 }
 0x171   :  { %9220 = vmatprep.mubr.msk.f32.mxu1 %vm10008_vm2, %v11966_v0  ;;  %9223 = vmatprep.subr.mxu1 %v11966_v0 }
 0x172   :  { %9248 = vmatprep.subr.mxu0 %v11966_v0 }
 0x173   :  { %v928_v59 = vpop.permute.xlu1 %927  ;;  %9221 = vmatmul.mubr.msk.f32.vlgmr.msra.gmra.mrb[24].mxu1 %vm244_vm3, %v10148_v25  ;;  %9241 = vmatmul.mubr.msk.f32.vlgmr.msra.gmra.mrb[0].mxu0 %vm244_vm3, %v10168_v33  ;;  %v1004_v61 = vpop.permute.xlu0 %1003 }
 0x174   :  { %9224 = vmatpush3.xpose.msk.msra.mxu1 %vm244_vm3, %v624_v50  ;;  %9249 = vmatpush3.xpose.msk.msra.mxu0 %vm244_vm3, %v1004_v61 }
 0x175   :  { %9225 = vmatprep.mubr.msk.f32.mxu1 %vm10008_vm2, %v11966_v0  ;;  %9250 = vmatprep.mubr.msk.f32.mxu0 %vm10008_vm2, %v11966_v0 }
 0x176   :  { %9228 = vmatprep.subr.mxu1 %v11966_v0  ;;  %9258 = vmatprep.subr.mxu0 %v11966_v0 }
 0x177   :  { %v1080_v62 = vpop.permute.xlu1 %1079  ;;  %9226 = vmatmul.mubr.msk.f32.vlgmr.msra.gmra.mrb[26].mxu1 %vm244_vm3, %v10156_v27  ;;  %9251 = vmatmul.mubr.msk.f32.vlgmr.msra.gmra.mrb[2].mxu0 %vm244_vm3, %v10179_v38  ;;  %v1156_v1 = vpop.permute.xlu0 %1155 }
 0x178   :  { %9229 = vmatpush3.xpose.msk.msra.mxu1 %vm244_vm3, %v700_v52  ;;  %9259 = vmatpush3.xpose.msk.msra.mxu0 %vm244_vm3, %v1156_v1 }
 0x179   :  { %9230 = vmatprep.mubr.msk.f32.mxu1 %vm10008_vm2, %v11966_v0  ;;  %9260 = vmatprep.mubr.msk.f32.mxu0 %vm10008_vm2, %v11966_v0 }
 0x17a   :  { %9233 = vmatprep.subr.mxu1 %v11966_v0  ;;  %9268 = vmatprep.subr.mxu0 %v11966_v0 }
 0x17b   :  { %v1232_v3 = vpop.permute.xlu1 %1231  ;;  %9231 = vmatmul.mubr.msk.f32.vlgmr.msra.gmra.mrb[28].mxu1 %vm244_vm3, %v10158_v29  ;;  %9261 = vmatmul.mubr.msk.f32.vlgmr.msra.gmra.mrb[4].mxu0 %vm244_vm3, %v10191_v43  ;;  %v1308_v4 = vpop.permute.xlu0 %1307 }
 0x17c   :  { %9234 = vmatpush3.xpose.msk.msra.mxu1 %vm244_vm3, %v776_v53  ;;  %9269 = vmatpush3.xpose.msk.msra.mxu0 %vm244_vm3, %v1308_v4 }
 0x17d   :  { %9235 = vmatprep.mubr.msk.f32.mxu1 %vm10008_vm2, %v11966_v0  ;;  %9270 = vmatprep.mubr.msk.f32.mxu0 %vm10008_vm2, %v11966_v0 }
 0x17e   :  { %9243 = vmatprep.subr.mxu1 %v11966_v0  ;;  %9278 = vmatprep.subr.mxu0 %v11966_v0 }
 0x17f   :  { %v1384_v6 = vpop.permute.xlu1 %1383  ;;  %9236 = vmatmul.mubr.msk.f32.vlgmr.msra.gmra.mrb[30].mxu1 %vm244_vm3, %v10166_v31  ;;  %9271 = vmatmul.mubr.msk.f32.vlgmr.msra.gmra.mrb[6].mxu0 %vm244_vm3, %v10201_v48  ;;  %v1640_v8 = vpop.permute.xlu0 %1639 }
 0x180   :  { %9244 = vmatpush3.xpose.msk.msra.mxu1 %vm244_vm3, %v928_v59  ;;  %9245 = vmatprep.mubr.msk.f32.mxu1 %vm10008_vm2, %v11966_v0 }
 0x181   :  { %9253 = vmatprep.subr.mxu1 %v11966_v0  ;;  %9280 = vmatprep.mubr.msk.f32.mxu0 %vm10008_vm2, %v11966_v0 }
 0x183   :  { %v1638_v9 = vpop.permute.xlu1 %1637  ;;  %9246 = vmatmul.mubr.msk.f32.vlgmr.msra.gmra.mrb[32].mxu1 %vm244_vm3, %v10176_v35 }
 0x184   :  { %v1642_v11 = vsel %vm1641_vm4, %v1638_v9, %v1640_v8  ;;  %9254 = vmatpush3.xpose.msk.msra.mxu1 %vm244_vm3, %v1080_v62  ;;  %9255 = vmatprep.mubr.msk.f32.mxu1 %vm10008_vm2, %v11966_v0 }
 0x185   :  { %9279 = vmatpush3.msk.msra.mxu0 %vm1647_vm5, %v1642_v11  ;;  %9263 = vmatprep.subr.mxu1 %v11966_v0 }
 0x186   :  { %9288 = vmatprep.subr.mxu0 %v11966_v0 }
 0x187   :  { %v1722_v15 = vpop.permute.xlu1 %1721  ;;  %9256 = vmatmul.mubr.msk.f32.vlgmr.msra.gmra.mrb[34].mxu1 %vm244_vm3, %v10187_v40 }
 0x188   :  { %9264 = vmatpush3.xpose.msk.msra.mxu1 %vm244_vm3, %v1232_v3  ;;  %9265 = vmatprep.mubr.msk.f32.mxu1 %vm10008_vm2, %v11966_v0 }
 0x189   :  { %9273 = vmatprep.subr.mxu1 %v11966_v0 }
 0x18b   :  { %9266 = vmatmul.mubr.msk.f32.vlgmr.msra.gmra.mrb[36].mxu1 %vm244_vm3, %v10199_v45  ;;  %v1724_v16 = vpop.permute.xlu1 %1723 }
 0x18c   :  { %9274 = vmatpush3.xpose.msk.msra.mxu1 %vm244_vm3, %v1384_v6  ;;  %9275 = vmatprep.mubr.msk.f32.mxu1 %vm10008_vm2, %v11966_v0  ;;  %v1725_v19 = vsel %vm1641_vm4, %v1722_v15, %v1724_v16 }
 0x18d   :  { %9283 = vmatprep.subr.mxu1 %v11966_v0 }
 0x18f   :  { %9276 = vmatmul.mubr.msk.f32.vlgmr.msra.gmra.mrb[38].mxu1 %vm244_vm3, %v10211_v51 }
 0x190   :  { %9284 = vmatpush3.msk.msra.mxu1 %vm1647_vm5, %v1725_v19  ;;  %9285 = vmatprep.mubr.msk.f32.mxu1 %vm10008_vm2, %v11966_v0 }
 0x191   :  { %9293 = vmatprep.subr.mxu1 %v11966_v0 }
 0x236   :  { %v10435_v24 = vpop.f32.mrb[16].mxu1 }
 0x237   :  { %v9202_v28 = vpop.f32.mrb[17].mxu1  ;;  %v1460_v30 = vsel %vm1459_vm6, %v10435_v24, -inf }
 0x238   :  { %1461 = vmax.xlane.f32.xlu0 %v1460_v30 }
 0x23a   :  { %v10439_v32 = vpop.f32.mrb[18].mxu1 }
 0x23b   :  { %v9207_v39 = vpop.f32.mrb[19].mxu1  ;;  %v1463_v41 = vsel %vm1459_vm6, %v10439_v32, -inf }
 0x23c   :  { %1464 = vmax.xlane.f32.xlu1 %v1463_v41 }
 0x23e   :  { %v10443_v42 = vpop.f32.mrb[20].mxu1 }
 0x23f   :  { %v9212_v44 = vpop.f32.mrb[21].mxu1  ;;  %v1466_v46 = vsel %vm1459_vm6, %v10443_v42, -inf }
 0x240   :  { %1467 = vmax.xlane.f32.xlu0 %v1466_v46 }
 0x242   :  { %v10447_v47 = vpop.f32.mrb[22].mxu1 }
 0x243   :  { %v9217_v49 = vpop.f32.mrb[23].mxu1  ;;  %v1469_v50 = vsel %vm1459_vm6, %v10447_v47, -inf }
 0x244   :  { %1470 = vmax.xlane.f32.xlu0 %v1469_v50 }
 0x246   :  { %v10451_v52 = vpop.f32.mrb[24].mxu1  ;;  %v10453_v53 = vpop.f32.mrb[0].mxu0 }
 0x247   :  { %v9222_v56 = vpop.f32.mrb[25].mxu1  ;;  %v9242_v59 = vpop.f32.mrb[1].mxu0  ;;  %v1472_v61 = vsel %vm1459_vm6, %v10451_v52, -inf  ;;  %v1484_v8 = vsel %vm1459_vm6, %v10453_v53, -inf }
 0x248   :  { %1473 = vmax.xlane.f32.xlu1 %v1472_v61 }
 0x24a   :  { %v10457_v62 = vpop.f32.mrb[26].mxu1  ;;  %v10459_v1 = vpop.f32.mrb[2].mxu0 }
 0x24b   :  { %v9227_v3 = vpop.f32.mrb[27].mxu1  ;;  %v9252_v4 = vpop.f32.mrb[3].mxu0  ;;  %v1475_v6 = vsel %vm1459_vm6, %v10457_v62, -inf  ;;  %v1490_v19 = vsel %vm1459_vm6, %v10459_v1, -inf }
 0x24c   :  { %1476 = vmax.xlane.f32.xlu0 %v1475_v6  ;;  %1485 = vmax.xlane.f32.xlu1 %v1484_v8  ;;  %v10487_v3 = vpop.permute.xlu0 %1802 }
 0x24e   :  { %v10465_v9 = vpop.f32.mrb[28].mxu1  ;;  %v10467_v11 = vpop.f32.mrb[4].mxu0 }
 0x24f   :  { %v9232_v15 = vpop.f32.mrb[29].mxu1  ;;  %v9262_v16 = vpop.f32.mrb[5].mxu0  ;;  %v1478_v46 = vsel %vm1459_vm6, %v10465_v9, -inf  ;;  %v1496_v59 = vsel %vm1459_vm6, %v10467_v11, -inf }
 0x250   :  { %1491 = vmax.xlane.f32.xlu1 %v1490_v19  ;;  %v10495_v16 = vpop.permute.xlu1 %1804 }
 0x252   :  { %v10471_v28 = vpop.f32.mrb[30].mxu1  ;;  %v10473_v30 = vpop.f32.mrb[6].mxu0 }
 0x253   :  { %v9237_v39 = vpop.f32.mrb[31].mxu1  ;;  %v9272_v41 = vpop.f32.mrb[7].mxu0  ;;  %v1481_v44 = vsel %vm1459_vm6, %v10471_v28, -inf  ;;  %v1502_v8 = vsel %vm1459_vm6, %v10473_v30, -inf }
 0x254   :  { %1482 = vmax.xlane.f32.xlu0 %v1481_v44  ;;  %1479 = vmax.xlane.f32.xlu1 %v1478_v46  ;;  %v10499_v41 = vpop.permute.xlu0 %1883 }
 0x256   :  { %v10479_v49 = vpop.f32.mrb[32].mxu1 }
 0x257   :  { %v9247_v50 = vpop.f32.mrb[33].mxu1  ;;  %v1487_v56 = vsel %vm1459_vm6, %v10479_v49, -inf }
 0x258   :  { %1488 = vmax.xlane.f32.xlu0 %v1487_v56  ;;  %1497 = vmax.xlane.f32.xlu1 %v1496_v59  ;;  %v10505_v56 = vpop.permute.xlu1 %1885  ;;  %v10507_v59 = vpop.permute.xlu0 %1964 }
 0x25a   :  { %v10485_v61 = vpop.f32.mrb[34].mxu1 }
 0x25b   :  { %v9257_v4 = vpop.f32.mrb[35].mxu1  ;;  %v1493_v6 = vsel %vm1459_vm6, %v10485_v61, -inf }
 0x25c   :  { %1494 = vmax.xlane.f32.xlu0 %v1493_v6  ;;  %1503 = vmax.xlane.f32.xlu1 %v1502_v8  ;;  %v10509_v4 = vpop.permute.xlu1 %1966  ;;  %v10511_v6 = vpop.permute.xlu0 %2045 }
 0x25d   :  { %11989 = vst [vmem:[#allocation16_spill] sm:$0xff] %v10511_v6 }
 0x25e   :  { %v10493_v15 = vpop.f32.mrb[36].mxu1 }
 0x25f   :  { %v9267_v19 = vpop.f32.mrb[37].mxu1  ;;  %v1499_v39 = vsel %vm1459_vm6, %v10493_v15, -inf }
 0x260   :  { %1500 = vmax.xlane.f32.xlu0 %v1499_v39  ;;  %v10515_v8 = vpop.permute.xlu1 %2047  ;;  %v10519_v19 = vpop.permute.xlu0 %2126 }
 0x261   :  { %11990 = vst [vmem:[#allocation17_spill] sm:$0xff] %v10515_v8  ;;  %11991 = vst [vmem:[#allocation18_spill] sm:$0xff] %v10519_v19 }
 0x262   :  { %v10501_v44 = vpop.f32.mrb[38].mxu1 }
 0x263   :  { %v9277_v46 = vpop.f32.mrb[39].mxu1  ;;  %v1505_v50 = vsel %vm1459_vm6, %v10501_v44, -inf }
 0x264   :  { %1506 = vmax.xlane.f32.xlu0 %v1505_v50  ;;  %v10521_v39 = vpop.permute.xlu1 %2128  ;;  %v10523_v46 = vpop.permute.xlu0 %2207 }
 0x265   :  { %11992 = vst [vmem:[#allocation19_spill] sm:$0xff] %v10521_v39  ;;  %11993 = vst [vmem:[#allocation20_spill] sm:$0xff] %v10523_v46 }
 0x268   :  { %v10527_v50 = vpop.permute.xlu1 %2209  ;;  %v10531_v37 = vpop.permute.xlu0 %2288 }
 0x269   :  { %11994 = vst [vmem:[#allocation21_spill] sm:$0xff] %v10527_v50  ;;  %11995 = vst [vmem:[#allocation22_spill] sm:$0xff] %v10531_v37 }
 0x26c   :  { %v10533_v13 = vpop.permute.xlu1 %2290  ;;  %v10535_v0 = vpop.permute.xlu0 %2369 }
 0x26d   :  { %3327 = vrot.lane.b32.xlu1 %v10156_v27, %s10011_s27  ;;  %11996 = vst [vmem:[#allocation23_spill] sm:$0xff] %v10533_v13  ;;  %11997 = vst [vmem:[#allocation24_spill] sm:$0xff] %v10535_v0 }
 0x270   :  { %v10537_v12 = vpop.permute.xlu1 %2371 }
 0x271   :  { %3325 = vrot.lane.b32.xlu1 %v10156_v27, %s10012_s30  ;;  %11998 = vst [vmem:[#allocation25_spill] sm:$0xff] %v10537_v12  ;;  %v10539_v27 = vpop.permute.xlu0 %2450 }
 0x272   :  { %11999 = vst [vmem:[#allocation26_spill] sm:$0xff] %v10539_v27 }
 0x274   :  { %v10541_v23 = vpop.permute.xlu1 %2452 }
 0x275   :  { %12000 = vst [vmem:[#allocation27_spill] sm:$0xff] %v10541_v23  ;;  %v10543_v46 = vpop.permute.xlu0 %2531 }
 0x276   :  { %12001 = vst [vmem:[#allocation28_spill] sm:$0xff] %v10543_v46 }
 0x278   :  { %v10545_v22 = vpop.permute.xlu1 %2533 }
 0x279   :  { %12002 = vst [vmem:[#allocation29_spill] sm:$0xff] %v10545_v22  ;;  %v10547_v50 = vpop.permute.xlu0 %2612 }
 0x27a   :  { %3249 = vrot.lane.b32.xlu0 %v10148_v25, %s10011_s27  ;;  %12003 = vst [vmem:[#allocation30_spill] sm:$0xff] %v10547_v50 }
 0x27c   :  { %v10549_v19 = vpop.permute.xlu1 %2614 }
 0x27d   :  { %12004 = vst [vmem:[#allocation31_spill] sm:$0xff] %v10549_v19  ;;  %v10551_v39 = vpop.permute.xlu0 %2693 }
 0x27e   :  { %3247 = vrot.lane.b32.xlu0 %v10148_v25, %s10012_s30  ;;  %12005 = vst [vmem:[#allocation32_spill] sm:$0xff] %v10551_v39 }
 0x280   :  { %v10553_v37 = vpop.permute.xlu1 %2695 }
 0x281   :  { %12006 = vst [vmem:[#allocation33_spill] sm:$0xff] %v10553_v37  ;;  %v10555_v13 = vpop.permute.xlu0 %2937 }
 0x282   :  { %12007 = vst [vmem:[#allocation34_spill] sm:$0xff] %v10555_v13 }
 0x284   :  { %v10557_v0 = vpop.permute.xlu1 %3015 }
 0x285   :  { %12008 = vst [vmem:[#allocation35_spill] sm:$0xff] %v10557_v0  ;;  %v10559_v12 = vpop.permute.xlu0 %2935 }
 0x286   :  { %12009 = vst [vmem:[#allocation36_spill] sm:$0xff] %v10559_v12 }
 0x288   :  { %v10561_v27 = vpop.permute.xlu1 %3013 }
 0x289   :  { %12010 = vst [vmem:[#allocation37_spill] sm:$0xff] %v10561_v27  ;;  %v10563_v23 = vpop.permute.xlu0 %3093 }
 0x28a   :  { %12011 = vst [vmem:[#allocation38_spill] sm:$0xff] %v10563_v23 }
 0x28c   :  { %v10565_v46 = vpop.permute.xlu1 %3171 }
 0x28d   :  { %12012 = vst [vmem:[#allocation39_spill] sm:$0xff] %v10565_v46  ;;  %v10567_v22 = vpop.permute.xlu0 %3091 }
 0x28e   :  { %12013 = vst [vmem:[#allocation40_spill] sm:$0xff] %v10567_v22 }
 0x290   :  { %v10569_v50 = vpop.permute.xlu1 %3169 }
 0x291   :  { %12014 = vst [vmem:[#allocation41_spill] sm:$0xff] %v10569_v50  ;;  %v10571_v19 = vpop.permute.xlu0 %2774 }
 0x292   :  { %12015 = vst [vmem:[#allocation42_spill] sm:$0xff] %v10571_v19 }
 0x294   :  { %v10573_v39 = vpop.permute.xlu1 %2776 }
 0x295   :  { %12016 = vst [vmem:[#allocation43_spill] sm:$0xff] %v10573_v39  ;;  %v10575_v37 = vpop.permute.xlu0 %2855 }
 0x296   :  { %12017 = vst [vmem:[#allocation44_spill] sm:$0xff] %v10575_v37 }
 0x298   :  { %v10577_v13 = vpop.permute.xlu1 %2857 }
 0x299   :  { %12018 = vst [vmem:[#allocation45_spill] sm:$0xff] %v10577_v13 }
 0x2c5   :  { %v1462_v0 = vpop.xlane.xlu0 %1461 }
 0x2c6   :  { %v1508_v12 = vsub.f32 %v10435_v24, %v1462_v0 }
 0x2c8   :  { %v1524_v27 = vmul.f32 1.442695, %v1508_v12 }
 0x2c9   :  { %v1465_v36 = vpop.xlane.xlu1 %1464 }
 0x2ca   :  { %9764 = vpow2.f32 %v1524_v27  ;;  %v1509_v46 = vsub.f32 %v10439_v32, %v1465_v36 }
 0x2cc   :  { %v1526_v23 = vmul.f32 1.442695, %v1509_v46 }
 0x2cd   :  { %v1468_v22 = vpop.xlane.xlu0 %1467 }
 0x2ce   :  { %9766 = vpow2.f32 %v1526_v23  ;;  %v1510_v50 = vsub.f32 %v10443_v42, %v1468_v22 }
 0x2d0   :  { %v1528_v19 = vmul.f32 1.442695, %v1510_v50 }
 0x2d1   :  { %v1471_v6 = vpop.xlane.xlu0 %1470 }
 0x2d2   :  { %9768 = vpow2.f32 %v1528_v19  ;;  %v1511_v37 = vsub.f32 %v10447_v47, %v1471_v6 }
 0x2d4   :  { %v10583_v39 = vpop.eup %9764  ;;  %v1530_v13 = vmul.f32 1.442695, %v1511_v37 }
 0x2d5   :  { %v1474_v8 = vpop.xlane.xlu1 %1473  ;;  %v1556_v0 = vsel %vm1459_vm6, %v10583_v39, 0.0 }
 0x2d6   :  { %9770 = vpow2.f32 %v1530_v13  ;;  %v1512_v12 = vsub.f32 %v10451_v52, %v1474_v8  ;;  %1557 = vadd.xlane.f32.xlu1 %v1556_v0 }
 0x2d8   :  { %v10588_v27 = vpop.eup %9766  ;;  %v1532_v23 = vmul.f32 1.442695, %v1512_v12 }
 0x2d9   :  { %v1486_v22 = vpop.xlane.xlu1 %1485  ;;  %v1477_v36 = vpop.xlane.xlu0 %1476  ;;  %v1559_v24 = vsel %vm1459_vm6, %v10588_v27, 0.0 }
 0x2da   :  { %9772 = vpow2.f32 %v1532_v23  ;;  %v1516_v32 = vsub.f32 %v10453_v53, %v1486_v22  ;;  %v1513_v37 = vsub.f32 %v10457_v62, %v1477_v36  ;;  %1560 = vadd.xlane.f32.xlu0 %v1559_v24 }
 0x2dc   :  { %v10594_v42 = vpop.eup %9768  ;;  %v1540_v13 = vmul.f32 1.442695, %v1516_v32  ;;  %v1534_v47 = vmul.f32 1.442695, %v1513_v37 }
 0x2dd   :  { %v1492_v52 = vpop.xlane.xlu1 %1491  ;;  %v1562_v6 = vsel %vm1459_vm6, %v10594_v42, 0.0 }
 0x2de   :  { %9774 = vpow2.f32 %v1540_v13  ;;  %v1518_v8 = vsub.f32 %v10459_v1, %v1492_v52  ;;  %1563 = vadd.xlane.f32.xlu1 %v1562_v6 }
 0x2df   :  { %9776 = vpow2.f32 %v1534_v47 }
 0x2e0   :  { %v10599_v19 = vpop.eup %9770  ;;  %v1544_v46 = vmul.f32 1.442695, %v1518_v8 }
 0x2e1   :  { %v1480_v53 = vpop.xlane.xlu1 %1479  ;;  %v1483_v50 = vpop.xlane.xlu0 %1482  ;;  %v1565_v62 = vsel %vm1459_vm6, %v10599_v19, 0.0 }
 0x2e2   :  { %9778 = vpow2.f32 %v1544_v46  ;;  %v1514_v0 = vsub.f32 %v10465_v9, %v1480_v53  ;;  %v1515_v12 = vsub.f32 %v10471_v28, %v1483_v50  ;;  %1566 = vadd.xlane.f32.xlu0 %v1565_v62 }
 0x2e4   :  { %v10605_v23 = vpop.eup %9772  ;;  %v1536_v22 = vmul.f32 1.442695, %v1514_v0  ;;  %v1538_v1 = vmul.f32 1.442695, %v1515_v12 }
 0x2e5   :  { %v1498_v36 = vpop.xlane.xlu1 %1497  ;;  %v1489_v24 = vpop.xlane.xlu0 %1488  ;;  %v1568_v32 = vsel %vm1459_vm6, %v10605_v23, 0.0 }
 0x2e6   :  { %9780 = vpow2.f32 %v1536_v22  ;;  %v1520_v37 = vsub.f32 %v10467_v11, %v1498_v36  ;;  %1569 = vadd.xlane.f32.xlu1 %v1568_v32  ;;  %v1517_v28 = vsub.f32 %v10479_v49, %v1489_v24 }
 0x2e7   :  { %9782 = vpow2.f32 %v1538_v1 }
 0x2e8   :  { %v10610_v13 = vpop.eup %9774  ;;  %v1548_v9 = vmul.f32 1.442695, %v1520_v37  ;;  %v1542_v50 = vmul.f32 1.442695, %v1517_v28 }
 0x2e9   :  { %v10613_v47 = vpop.eup %9776  ;;  %v1504_v52 = vpop.xlane.xlu1 %1503  ;;  %v1580_v8 = vsel %vm1459_vm6, %v10610_v13, 0.0 }
 0x2ea   :  { %v1495_v6 = vpop.xlane.xlu0 %1494  ;;  %9784 = vpow2.f32 %v1548_v9  ;;  %v1522_v46 = vsub.f32 %v10473_v30, %v1504_v52  ;;  %1581 = vadd.xlane.f32.xlu1 %v1580_v8  ;;  %v1571_v11 = vsel %vm1459_vm6, %v10613_v47, 0.0 }
 0x2eb   :  { %1572 = vadd.xlane.f32.xlu0 %v1571_v11  ;;  %v1519_v49 = vsub.f32 %v10485_v61, %v1495_v6 }
 0x2ec   :  { %v10620_v53 = vpop.eup %9778  ;;  %v1552_v62 = vmul.f32 1.442695, %v1522_v46 }
 0x2ed   :  { %v1586_v12 = vsel %vm1459_vm6, %v10620_v53, 0.0  ;;  %v1546_v30 = vmul.f32 1.442695, %v1519_v49 }
 0x2ee   :  { %v1501_v0 = vpop.xlane.xlu0 %1500  ;;  %9786 = vpow2.f32 %v1552_v62  ;;  %1587 = vadd.xlane.f32.xlu1 %v1586_v12 }
 0x2ef   :  { %9788 = vpow2.f32 %v1542_v50  ;;  %v1521_v1 = vsub.f32 %v10493_v15, %v1501_v0 }
 0x2f0   :  { %v10625_v22 = vpop.eup %9780  ;;  %9790 = vpow2.f32 %v1546_v30  ;;  %v10709_v30 = vpop.permute.xlu1 %3327 }
 0x2f1   :  { %v10628_v36 = vpop.eup %9782  ;;  %v1574_v24 = vsel %vm1459_vm6, %v10625_v22, 0.0  ;;  %v1550_v37 = vmul.f32 1.442695, %v1521_v1 }
 0x2f2   :  { %1575 = vadd.xlane.f32.xlu1 %v1574_v24  ;;  %v1577_v61 = vsel %vm1459_vm6, %v10628_v36, 0.0  ;;  %v1507_v62 = vpop.xlane.xlu0 %1506 }
 0x2f3   :  { %1578 = vadd.xlane.f32.xlu0 %v1577_v61  ;;  %9792 = vpow2.f32 %v1550_v37  ;;  %v1523_v49 = vsub.f32 %v10501_v44, %v1507_v62  ;;  %v12019_v62 = vmov 0.0  }
 0x2f4   :  { %v10634_v32 = vpop.eup %9784  ;;  %v10717_v24 = vpop.permute.xlu1 %3325 }
 0x2f5   :  { %v1592_v9 = vsel %vm1459_vm6, %v10634_v32, 0.0  ;;  %v1554_v0 = vmul.f32 1.442695, %v1523_v49 }
 0x2f6   :  { %1593 = vadd.xlane.f32.xlu1 %v1592_v9  ;;  %v10715_v1 = vpop.permute.xlu0 %3249 }
 0x2f7   :  { %9794 = vpow2.f32 %v1554_v0 }
 0x2f8   :  { %v10638_v28 = vpop.eup %9786 }
 0x2f9   :  { %v1598_v15 = vsel %vm1459_vm6, %v10638_v28, 0.0  ;;  %v10642_v52 = vpop.eup %9788 }
 0x2fa   :  { %1599 = vadd.xlane.f32.xlu0 %v1598_v15  ;;  %v1583_v6 = vsel %vm1459_vm6, %v10642_v52, 0.0  ;;  %v10646_v8 = vpop.eup %9790  ;;  %v10723_v61 = vpop.permute.xlu0 %3247 }
 0x2fb   :  { %v1589_v46 = vsel %vm1459_vm6, %v10646_v8, 0.0 }
 0x2fd   :  { %v10650_v11 = vpop.eup %9792 }
 0x2fe   :  { %1584 = vadd.xlane.f32.xlu0 %v1583_v6  ;;  %v1595_v50 = vsel %vm1459_vm6, %v10650_v11, 0.0 }
 0x301   :  { %v10667_v12 = vpop.eup %9794 }
 0x302   :  { %1590 = vadd.xlane.f32.xlu0 %v1589_v46  ;;  %v1601_v44 = vsel %vm1459_vm6, %v10667_v12, 0.0 }
 0x306   :  { %1596 = vadd.xlane.f32.xlu0 %v1595_v50  ;;  %v1806_v50 = vsel %vm1641_vm4, %v10487_v3, %v10495_v16  ;;  %v1887_v3 = vsel %vm1641_vm4, %v10499_v41, %v10505_v56  ;;  %v1968_v41 = vsel %vm1641_vm4, %v10507_v59, %v10509_v4 }
 0x307   :  { %3483 = vrot.lane.b32.xlu1 %v10166_v31, %s10011_s27 }
 0x30b   :  { %3481 = vrot.lane.b32.xlu1 %v10166_v31, %s10012_s30 }
 0x31c   :  { %3405 = vrot.lane.b32.xlu0 %v10158_v29, %s10011_s27 }
 0x320   :  { %3403 = vrot.lane.b32.xlu0 %v10158_v29, %s10012_s30 }
 0x324   :  { %3561 = vrot.lane.b32.xlu0 %v10168_v33, %s10011_s27 }
 0x328   :  { %3559 = vrot.lane.b32.xlu0 %v10168_v33, %s10012_s30 }
 0x32c   :  { %3717 = vrot.lane.b32.xlu0 %v10179_v38, %s10011_s27 }
 0x32f   :  { %1602 = vadd.xlane.f32.xlu1 %v1601_v44 }
 0x330   :  { %3715 = vrot.lane.b32.xlu0 %v10179_v38, %s10012_s30 }
 0x334   :  { %3873 = vrot.lane.b32.xlu0 %v10191_v43, %s10011_s27 }
 0x338   :  { %3871 = vrot.lane.b32.xlu0 %v10191_v43, %s10012_s30 }
 0x33c   :  { %4029 = vrot.lane.b32.xlu0 %v10201_v48, %s10011_s27 }
 0x340   :  { %4027 = vrot.lane.b32.xlu0 %v10201_v48, %s10012_s30  ;;  %3639 = vrot.lane.b32.xlu1 %v10176_v35, %s10011_s27 }
 0x344   :  { %4437 = vrot.lane.b32.xlu0 %v10227_v57, %s10013_s6  ;;  %3637 = vrot.lane.b32.xlu1 %v10176_v35, %s10012_s30 }
 0x348   :  { %4671 = vrot.lane.b32.xlu0 %v10237_v60, %s10013_s6  ;;  %3795 = vrot.lane.b32.xlu1 %v10187_v40, %s10011_s27 }
 0x34c   :  { %4827 = vrot.lane.b32.xlu0 %v10249_v2, %s10013_s6  ;;  %3793 = vrot.lane.b32.xlu1 %v10187_v40, %s10012_s30 }
 0x350   :  { %4983 = vrot.lane.b32.xlu0 %v10261_v7, %s10013_s6  ;;  %3951 = vrot.lane.b32.xlu1 %v10199_v45, %s10011_s27 }
 0x354   :  { %5139 = vrot.lane.b32.xlu0 %v10273_v14, %s10013_s6  ;;  %3949 = vrot.lane.b32.xlu1 %v10199_v45, %s10012_s30 }
 0x358   :  { %5295 = vrot.lane.b32.xlu0 %v10285_v21, %s10013_s6  ;;  %4107 = vrot.lane.b32.xlu1 %v10211_v51, %s10011_s27 }
 0x35c   :  { %5451 = vrot.lane.b32.xlu0 %v10311_v34, %s10013_s6  ;;  %4105 = vrot.lane.b32.xlu1 %v10211_v51, %s10012_s30 }
 0x360   :  { %5609 = vrot.lane.b32.xlu0 %v10130_v17, %s10014_s7  ;;  %4359 = vrot.lane.b32.xlu1 %v10217_v54, %s10013_s6 }
 0x363   :  { %v1558_v37 = vpop.xlane.xlu1 %1557 }
 0x364   :  { %9796 = vrcp.f32 %v1558_v37  ;;  %5607 = vrot.lane.b32.xlu0 %v10130_v17, %s10015_s8  ;;  %4515 = vrot.lane.b32.xlu1 %v10220_v55, %s10013_s6  ;;  %v12020_v37 = vld [vmem:[#allocation17_spill] sm:$0xff] }
 0x367   :  { %v1561_v9 = vpop.xlane.xlu0 %1560 }
 0x368   :  { %9798 = vrcp.f32 %v1561_v9  ;;  %5765 = vrot.lane.b32.xlu0 %v10134_v20, %s10014_s7  ;;  %4593 = vrot.lane.b32.xlu1 %v10230_v58, %s10013_s6  ;;  %v12021_v9 = vld [vmem:[#allocation16_spill] sm:$0xff] }
 0x369   :  { %v2049_v59 = vsel %vm1641_vm4, %v12021_v9, %v12020_v37  ;;  %v12028_v37 = vld [vmem:[#allocation10_spill] sm:$0xff] }
 0x36b   :  { %v1564_v15 = vpop.xlane.xlu1 %1563 }
 0x36c   :  { %9800 = vrcp.f32 %v1564_v15  ;;  %5763 = vrot.lane.b32.xlu0 %v10134_v20, %s10015_s8  ;;  %4749 = vrot.lane.b32.xlu1 %v10243_v63, %s10013_s6 }
 0x36e   :  { %v9797_v17 = vpop.eup %9796 }
 0x36f   :  { %v1567_v6 = vpop.xlane.xlu0 %1566  ;;  %v1620_v46 = vmul.f32 %v9797_v17, %v10583_v39 }
 0x370   :  { %9802 = vrcp.f32 %v1567_v6  ;;  %5921 = vrot.lane.b32.xlu0 %v10148_v25, %s10014_s7  ;;  %4905 = vrot.lane.b32.xlu1 %v10255_v5, %s10013_s6  ;;  %v12022_v6 = vld [vmem:[#allocation15_spill] sm:$0xff] }
 0x371   :  { %9281 = vmatmul.mubr.msk.f32.vlgmr.msra.gmra.mrb[8].mxu0 %vm1643_vm7, %v1620_v46  ;;  %v12023_v46 = vld [vmem:[#allocation19_spill] sm:$0xff] }
 0x372   :  { %v9799_v20 = vpop.eup %9798  ;;  %9289 = vmatpush3.msk.msra.mxu0 %vm1647_vm5, %v1806_v50  ;;  %9290 = vmatprep.mubr.msk.f32.mxu0 %vm10008_vm2, %v12019_v62  ;;  %v12024_v50 = vld [vmem:[#allocation18_spill] sm:$0xff] }
 0x373   :  { %v1570_v39 = vpop.xlane.xlu1 %1569  ;;  %v1621_v49 = vmul.f32 %v9799_v20, %v10588_v27  ;;  %9298 = vmatprep.subr.mxu0 %v12019_v62  ;;  %v2130_v20 = vsel %vm1641_vm4, %v12024_v50, %v12023_v46 }
 0x374   :  { %9804 = vrcp.f32 %v1570_v39  ;;  %5919 = vrot.lane.b32.xlu0 %v10148_v25, %s10015_s8  ;;  %5061 = vrot.lane.b32.xlu1 %v10267_v10, %s10013_s6  ;;  %v12025_v39 = vld [vmem:[#allocation9_spill] sm:$0xff] }
 0x375   :  { %9286 = vmatmul.mubr.msk.f32.vlgmr.msra.gmra.mrb[40].mxu1 %vm1643_vm7, %v1621_v49 }
 0x376   :  { %v9801_v16 = vpop.eup %9800  ;;  %9294 = vmatpush3.msk.msra.mxu1 %vm1647_vm5, %v1887_v3  ;;  %9295 = vmatprep.mubr.msk.f32.mxu1 %vm10008_vm2, %v12019_v62  ;;  %v12026_v3 = vld [vmem:[#allocation21_spill] sm:$0xff] }
 0x377   :  { %v1582_v27 = vpop.xlane.xlu1 %1581  ;;  %v1622_v0 = vmul.f32 %v9801_v16, %v10594_v42  ;;  %9303 = vmatprep.subr.mxu1 %v12019_v62  ;;  %v12027_v16 = vld [vmem:[#allocation20_spill] sm:$0xff] }
 0x378   :  { %v1573_v25 = vpop.xlane.xlu0 %1572  ;;  %5217 = vrot.lane.b32.xlu1 %v10279_v18, %s10013_s6 }
 0x379   :  { %9806 = vrcp.f32 %v1573_v25  ;;  %9291 = vmatmul.mubr.msk.f32.vlgmr.msra.gmra.mrb[10].mxu0 %vm1643_vm7, %v1622_v0  ;;  %v2211_v0 = vsel %vm1641_vm4, %v12027_v16, %v12026_v3  ;;  %v12035_v16 = vld [vmem:[#allocation11_spill] sm:$0xff] }
 0x37a   :  { %v9803_v56 = vpop.eup %9802  ;;  %9299 = vmatpush3.msk.msra.mxu0 %vm1647_vm5, %v1968_v41  ;;  %9300 = vmatprep.mubr.msk.f32.mxu0 %vm10008_vm2, %v12019_v62 }
 0x37b   :  { %v1588_v42 = vpop.xlane.xlu1 %1587  ;;  %v1623_v44 = vmul.f32 %v9803_v56, %v10599_v19  ;;  %9308 = vmatprep.subr.mxu0 %v12019_v62 }
 0x37c   :  { %5373 = vrot.lane.b32.xlu1 %v10291_v26, %s10013_s6 }
 0x37d   :  { %9296 = vmatmul.mubr.msk.f32.vlgmr.msra.gmra.mrb[42].mxu1 %vm1643_vm7, %v1623_v44 }
 0x37e   :  { %v9805_v4 = vpop.eup %9804  ;;  %9304 = vmatpush3.msk.msra.mxu1 %vm1647_vm5, %v2049_v59  ;;  %9305 = vmatprep.mubr.msk.f32.mxu1 %vm10008_vm2, %v12019_v62  ;;  %v12029_v59 = vld [vmem:[#allocation23_spill] sm:$0xff] }
 0x37f   :  { %v1576_v15 = vpop.xlane.xlu1 %1575  ;;  %v1624_v19 = vmul.f32 %v9805_v4, %v10605_v23  ;;  %9313 = vmatprep.subr.mxu1 %v12019_v62  ;;  %v12030_v4 = vld [vmem:[#allocation22_spill] sm:$0xff] }
 0x380   :  { %9808 = vrcp.f32 %v1576_v15  ;;  %v1579_v17 = vpop.xlane.xlu0 %1578  ;;  %5529 = vrot.lane.b32.xlu1 %v12022_v6, %s10013_s6  ;;  %v2292_v15 = vsel %vm1641_vm4, %v12030_v4, %v12029_v59  ;;  %v12040_v59 = vld [vmem:[#allocation43_spill] sm:$0xff]  ;;  %v12041_v4 = vld [vmem:[#allocation42_spill] sm:$0xff] }
 0x381   :  { %9810 = vrcp.f32 %v1579_v17  ;;  %9301 = vmatmul.mubr.msk.f32.vlgmr.msra.gmra.mrb[12].mxu0 %vm1643_vm7, %v1624_v19  ;;  %v12031_v19 = vld [vmem:[#allocation25_spill] sm:$0xff]  ;;  %v12032_v17 = vld [vmem:[#allocation24_spill] sm:$0xff] }
 0x382   :  { %9812 = vrcp.f32 %v1582_v27  ;;  %9309 = vmatpush3.msk.msra.mxu0 %vm1647_vm5, %v2130_v20  ;;  %9310 = vmatprep.mubr.msk.f32.mxu0 %vm10008_vm2, %v12019_v62  ;;  %v2373_v46 = vsel %vm1641_vm4, %v12032_v17, %v12031_v19  ;;  %v12033_v20 = vld [vmem:[#allocation27_spill] sm:$0xff] }
 0x383   :  { %v9807_v23 = vpop.eup %9806  ;;  %9318 = vmatprep.subr.mxu0 %v12019_v62  ;;  %9814 = vrcp.f32 %v1588_v42  ;;  %v1594_v27 = vpop.xlane.xlu1 %1593 }
 0x384   :  { %5687 = vrot.lane.b32.xlu1 %v12025_v39, %s10014_s7  ;;  %v1625_v49 = vmul.f32 %v9807_v23, %v10613_v47  ;;  %9816 = vrcp.f32 %v1594_v27  ;;  %v12034_v23 = vld [vmem:[#allocation26_spill] sm:$0xff] }
 0x385   :  { %v12037_v27 = vld [vmem:[#allocation30_spill] sm:$0xff] }
 0x386   :  { %9306 = vmatmul.mubr.msk.f32.vlgmr.msra.gmra.mrb[44].mxu1 %vm1643_vm7, %v1625_v49 }
 0x387   :  { %9314 = vmatpush3.msk.msra.mxu1 %vm1647_vm5, %v2211_v0  ;;  %v1600_v25 = vpop.xlane.xlu0 %1599  ;;  %9315 = vmatprep.mubr.msk.f32.mxu1 %vm10008_vm2, %v12019_v62  ;;  %v12036_v0 = vld [vmem:[#allocation31_spill] sm:$0xff] }
 0x388   :  { %5685 = vrot.lane.b32.xlu1 %v12025_v39, %s10015_s8  ;;  %9323 = vmatprep.subr.mxu1 %v12019_v62  ;;  %v2454_v39 = vsel %vm1641_vm4, %v12034_v23, %v12033_v20  ;;  %v12044_v20 = vld [vmem:[#allocation45_spill] sm:$0xff]  ;;  %v12045_v23 = vld [vmem:[#allocation44_spill] sm:$0xff] }
 0x38a   :  { %v9809_v47 = vpop.eup %9808 }
 0x38b   :  { %v9811_v41 = vpop.eup %9810  ;;  %v1585_v56 = vpop.xlane.xlu0 %1584  ;;  %v1626_v42 = vmul.f32 %v9809_v47, %v10625_v22 }
 0x38c   :  { %v9813_v44 = vpop.eup %9812  ;;  %9818 = vrcp.f32 %v1585_v56  ;;  %5843 = vrot.lane.b32.xlu1 %v12028_v37, %s10014_s7  ;;  %v1627_v9 = vmul.f32 %v9811_v41, %v10628_v36 }
 0x38d   :  { %9311 = vmatmul.mubr.msk.f32.vlgmr.msra.gmra.mrb[14].mxu0 %vm1643_vm7, %v1626_v42  ;;  %9820 = vrcp.f32 %v1600_v25  ;;  %v1628_v36 = vmul.f32 %v9813_v44, %v10610_v13  ;;  %v9815_v50 = vpop.eup %9814  ;;  %v2616_v25 = vsel %vm1641_vm4, %v12037_v27, %v12036_v0  ;;  %v12038_v44 = vld [vmem:[#allocation29_spill] sm:$0xff]  ;;  %v12049_v0 = vld [vmem:[#allocation40_spill] sm:$0xff] }
 0x38e   :  { %9316 = vmatmul.mubr.msk.f32.vlgmr.msra.gmra.mrb[46].mxu1 %vm1643_vm7, %v1627_v9  ;;  %9319 = vmatpush3.msk.msra.mxu0 %vm1647_vm5, %v2292_v15  ;;  %v1630_v49 = vmul.f32 %v9815_v50, %v10620_v53  ;;  %v9817_v3 = vpop.eup %9816  ;;  %v2778_v15 = vsel %vm1641_vm4, %v12041_v4, %v12040_v59  ;;  %v12050_v4 = vld [vmem:[#allocation35_spill] sm:$0xff] }
 0x38f   :  { %9324 = vmatpush3.msk.msra.mxu1 %vm1647_vm5, %v2373_v46  ;;  %v1591_v22 = vpop.xlane.xlu0 %1590  ;;  %9320 = vmatprep.mubr.msk.f32.mxu0 %vm10008_vm2, %v12019_v62  ;;  %v1632_v56 = vmul.f32 %v9817_v3, %v10634_v32  ;;  %v12042_v46 = vld [vmem:[#allocation33_spill] sm:$0xff]  ;;  %v12048_v3 = vld [vmem:[#allocation38_spill] sm:$0xff] }
 0x390   :  { %9822 = vrcp.f32 %v1591_v22  ;;  %9328 = vmatprep.subr.mxu0 %v12019_v62  ;;  %5841 = vrot.lane.b32.xlu1 %v12028_v37, %s10015_s8  ;;  %v12039_v37 = vld [vmem:[#allocation28_spill] sm:$0xff] }
 0x391   :  { %9321 = vmatmul.mubr.msk.f32.vlgmr.msra.gmra.mrb[16].mxu0 %vm1643_vm7, %v1628_v36  ;;  %9325 = vmatprep.mubr.msk.f32.mxu1 %vm10008_vm2, %v12019_v62  ;;  %v2535_v9 = vsel %vm1641_vm4, %v12039_v37, %v12038_v44  ;;  %v12043_v22 = vld [vmem:[#allocation32_spill] sm:$0xff] }
 0x392   :  { %9329 = vmatpush3.msk.msra.mxu0 %vm1647_vm5, %v2454_v39  ;;  %9330 = vmatprep.mubr.msk.f32.mxu0 %vm10008_vm2, %v12019_v62  ;;  %v2697_v36 = vsel %vm1641_vm4, %v12043_v22, %v12042_v46  ;;  %v2859_v39 = vsel %vm1641_vm4, %v12045_v23, %v12044_v20 }
 0x393   :  { %v1597_v13 = vpop.xlane.xlu0 %1596  ;;  %9338 = vmatprep.subr.mxu0 %v12019_v62  ;;  %9333 = vmatprep.subr.mxu1 %v12019_v62 }
 0x394   :  { %9824 = vrcp.f32 %v1597_v13  ;;  %5999 = vrot.lane.b32.xlu1 %v12035_v16, %s10014_s7  ;;  %v12046_v13 = vld [vmem:[#allocation34_spill] sm:$0xff] }
 0x395   :  { %9331 = vmatmul.mubr.msk.f32.vlgmr.msra.gmra.mrb[18].mxu0 %vm1643_vm7, %v1630_v49 }
 0x396   :  { %v9819_v47 = vpop.eup %9818  ;;  %9339 = vmatpush3.msk.msra.mxu0 %vm1647_vm5, %v2616_v25  ;;  %9340 = vmatprep.mubr.msk.f32.mxu0 %vm10008_vm2, %v12019_v62 }
 0x397   :  { %v3406_v53 = vpop.permute.xlu0 %3405  ;;  %9348 = vmatprep.subr.mxu0 %v12019_v62  ;;  %v1629_v41 = vmul.f32 %v9819_v47, %v10642_v52  ;;  %v9821_v42 = vpop.eup %9820 }
 0x398   :  { %5997 = vrot.lane.b32.xlu1 %v12035_v16, %s10015_s8  ;;  %v1634_v17 = vmul.f32 %v9821_v42, %v10638_v28 }
 0x399   :  { %9326 = vmatmul.mubr.msk.f32.vlgmr.msra.gmra.mrb[48].mxu1 %vm1643_vm7, %v1629_v41  ;;  %9341 = vmatmul.mubr.msk.f32.vlgmr.msra.gmra.mrb[20].mxu0 %vm1643_vm7, %v1632_v56 }
 0x39a   :  { %v9823_v19 = vpop.eup %9822  ;;  %9334 = vmatpush3.msk.msra.mxu1 %vm1647_vm5, %v2535_v9  ;;  %9349 = vmatpush3.msk.msra.mxu0 %vm1647_vm5, %v2778_v15 }
 0x39b   :  { %v3404_v32 = vpop.permute.xlu0 %3403  ;;  %9335 = vmatprep.mubr.msk.f32.mxu1 %vm10008_vm2, %v12019_v62  ;;  %9343 = vmatprep.subr.mxu1 %v12019_v62  ;;  %v1631_v52 = vmul.f32 %v9823_v19, %v10646_v8  ;;  %v12051_v19 = vld [vmem:[#allocation37_spill] sm:$0xff] }
 0x39c   :  { %9350 = vmatprep.mubr.msk.f32.mxu0 %vm10008_vm2, %v12019_v62  ;;  %9358 = vmatprep.subr.mxu0 %v12019_v62 }
 0x39d   :  { %9336 = vmatmul.mubr.msk.f32.vlgmr.msra.gmra.mrb[50].mxu1 %vm1643_vm7, %v1631_v52  ;;  %9351 = vmatmul.mubr.msk.f32.vlgmr.msra.gmra.mrb[22].mxu0 %vm1643_vm7, %v1634_v17  ;;  %v12053_v52 = vld [vmem:[#allocation41_spill] sm:$0xff] }
 0x39e   :  { %v9825_v50 = vpop.eup %9824  ;;  %9344 = vmatpush3.msk.msra.mxu1 %vm1647_vm5, %v2697_v36  ;;  %9345 = vmatprep.mubr.msk.f32.mxu1 %vm10008_vm2, %v12019_v62 }
 0x39f   :  { %v3562_v28 = vpop.permute.xlu0 %3561  ;;  %9353 = vmatprep.subr.mxu1 %v12019_v62  ;;  %v1633_v8 = vmul.f32 %v9825_v50, %v10650_v11  ;;  %9360 = vmatprep.mubr.msk.f32.mxu0 %vm10008_vm2, %v12019_v62  ;;  %v12047_v11 = vld [vmem:[#allocation36_spill] sm:$0xff] }
 0x3a1   :  { %9359 = vmatpush3.xpose.msk.msra.mxu0 %vm244_vm3, %v12046_v13  ;;  %9346 = vmatmul.mubr.msk.f32.vlgmr.msra.gmra.mrb[52].mxu1 %vm1643_vm7, %v1633_v8 }
 0x3a2   :  { %9354 = vmatpush3.msk.msra.mxu1 %vm1647_vm5, %v2859_v39  ;;  %9368 = vmatprep.subr.mxu0 %v12019_v62 }
 0x3a3   :  { %v3560_v49 = vpop.permute.xlu0 %3559  ;;  %9355 = vmatprep.mubr.msk.f32.mxu1 %vm10008_vm2, %v12019_v62  ;;  %9363 = vmatprep.subr.mxu1 %v12019_v62 }
 0x3a4   :  { %9361 = vmatmul.mubr.msk.f32.vlgmr.msra.gmra.mrb[24].mxu0 %vm244_vm3, %v12047_v11 }
 0x3a5   :  { %9369 = vmatpush3.xpose.msk.msra.mxu0 %vm244_vm3, %v12048_v3  ;;  %9370 = vmatprep.mubr.msk.f32.mxu0 %vm10008_vm2, %v12019_v62 }
 0x3a6   :  { %9378 = vmatprep.subr.mxu0 %v12019_v62 }
 0x3a7   :  { %v3718_v16 = vpop.permute.xlu0 %3717 }
 0x3a8   :  { %9371 = vmatmul.mubr.msk.f32.vlgmr.msra.gmra.mrb[26].mxu0 %vm244_vm3, %v12049_v0 }
 0x3a9   :  { %9379 = vmatpush3.xpose.msk.msra.mxu0 %vm244_vm3, %v10715_v1  ;;  %9380 = vmatprep.mubr.msk.f32.mxu0 %vm10008_vm2, %v12019_v62  ;;  %v3484_v1 = vpop.permute.xlu1 %3483 }
 0x3aa   :  { %9388 = vmatprep.subr.mxu0 %v12019_v62 }
 0x3ab   :  { %v3716_v27 = vpop.permute.xlu0 %3715 }
 0x3ac   :  { %9381 = vmatmul.mubr.msk.f32.vlgmr.msra.gmra.mrb[28].mxu0 %vm244_vm3, %v10723_v61 }
 0x3ad   :  { %9389 = vmatpush3.xpose.msk.msra.mxu0 %vm244_vm3, %v3406_v53  ;;  %9390 = vmatprep.mubr.msk.f32.mxu0 %vm10008_vm2, %v12019_v62  ;;  %v3482_v61 = vpop.permute.xlu1 %3481 }
 0x3ae   :  { %9398 = vmatprep.subr.mxu0 %v12019_v62 }
 0x3af   :  { %v3874_v25 = vpop.permute.xlu0 %3873 }
 0x3b0   :  { %9391 = vmatmul.mubr.msk.f32.vlgmr.msra.gmra.mrb[30].mxu0 %vm244_vm3, %v3404_v32  ;;  %v12052_v32 = vld [vmem:[#allocation39_spill] sm:$0xff] }
 0x3b1   :  { %9399 = vmatpush3.xpose.msk.msra.mxu0 %vm244_vm3, %v3562_v28  ;;  %9400 = vmatprep.mubr.msk.f32.mxu0 %vm10008_vm2, %v12019_v62 }
 0x3b2   :  { %9408 = vmatprep.subr.mxu0 %v12019_v62 }
 0x3b3   :  { %v3872_v47 = vpop.permute.xlu0 %3871 }
 0x3b4   :  { %9401 = vmatmul.mubr.msk.f32.vlgmr.msra.gmra.mrb[32].mxu0 %vm244_vm3, %v3560_v49 }
 0x3b5   :  { %9409 = vmatpush3.xpose.msk.msra.mxu0 %vm244_vm3, %v3718_v16  ;;  %9410 = vmatprep.mubr.msk.f32.mxu0 %vm10008_vm2, %v12019_v62 }
 0x3b6   :  { %9418 = vmatprep.subr.mxu0 %v12019_v62 }
 0x3b7   :  { %v4030_v53 = vpop.permute.xlu0 %4029 }
 0x3b8   :  { %9411 = vmatmul.mubr.msk.f32.vlgmr.msra.gmra.mrb[34].mxu0 %vm244_vm3, %v3716_v27 }
 0x3b9   :  { %9419 = vmatpush3.xpose.msk.msra.mxu0 %vm244_vm3, %v3874_v25  ;;  %9420 = vmatprep.mubr.msk.f32.mxu0 %vm10008_vm2, %v12019_v62 }
 0x3ba   :  { %9428 = vmatprep.subr.mxu0 %v12019_v62 }
 0x3bb   :  { %v4028_v56 = vpop.permute.xlu0 %4027 }
 0x3bc   :  { %9421 = vmatmul.mubr.msk.f32.vlgmr.msra.gmra.mrb[36].mxu0 %vm244_vm3, %v3872_v47  ;;  %v1603_v41 = vpop.xlane.xlu1 %1602 }
 0x3bd   :  { %9826 = vrcp.f32 %v1603_v41  ;;  %9429 = vmatpush3.xpose.msk.msra.mxu0 %vm244_vm3, %v4030_v53  ;;  %9430 = vmatprep.mubr.msk.f32.mxu0 %vm10008_vm2, %v12019_v62 }
 0x3be   :  { %9438 = vmatprep.subr.mxu0 %v12019_v62 }
 0x3bf   :  { %v4438_v36 = vpop.permute.xlu0 %4437 }
 0x3c0   :  { %9431 = vmatmul.mubr.msk.f32.vlgmr.msra.gmra.mrb[38].mxu0 %vm244_vm3, %v4028_v56  ;;  %v3640_v42 = vpop.permute.xlu1 %3639  ;;  %v4439_v50 = vrot.slane %v4438_v36, 4 }
 0x3c1   :  { %9440 = vmatprep.mubr.msk.f32.mxu0 %vm10008_vm2, %v12019_v62 }
 0x3c4   :  { %v3638_v44 = vpop.permute.xlu1 %3637 }
 0x3c7   :  { %v9827_v37 = vpop.eup %9826 }
 0x3c8   :  { %v3796_v9 = vpop.permute.xlu1 %3795  ;;  %v1635_v59 = vmul.f32 %v9827_v37, %v10667_v12 }
 0x3ca   :  { %9356 = vmatmul.mubr.msk.f32.vlgmr.msra.gmra.mrb[54].mxu1 %vm1643_vm7, %v1635_v59 }
 0x3cb   :  { %9364 = vmatpush3.xpose.msk.msra.mxu1 %vm244_vm3, %v12050_v4  ;;  %9365 = vmatprep.mubr.msk.f32.mxu1 %vm10008_vm2, %v12019_v62 }
 0x3cc   :  { %v3794_v15 = vpop.permute.xlu1 %3793  ;;  %9373 = vmatprep.subr.mxu1 %v12019_v62 }
 0x3ce   :  { %9366 = vmatmul.mubr.msk.f32.vlgmr.msra.gmra.mrb[56].mxu1 %vm244_vm3, %v12051_v19 }
 0x3cf   :  { %9374 = vmatpush3.xpose.msk.msra.mxu1 %vm244_vm3, %v12052_v32  ;;  %9375 = vmatprep.mubr.msk.f32.mxu1 %vm10008_vm2, %v12019_v62 }
 0x3d0   :  { %v3952_v12 = vpop.permute.xlu1 %3951  ;;  %9383 = vmatprep.subr.mxu1 %v12019_v62 }
 0x3d2   :  { %9376 = vmatmul.mubr.msk.f32.vlgmr.msra.gmra.mrb[58].mxu1 %vm244_vm3, %v12053_v52 }
 0x3d3   :  { %9384 = vmatpush3.xpose.msk.msra.mxu1 %vm244_vm3, %v10709_v30  ;;  %9385 = vmatprep.mubr.msk.f32.mxu1 %vm10008_vm2, %v12019_v62 }
 0x3d4   :  { %v3950_v17 = vpop.permute.xlu1 %3949  ;;  %9393 = vmatprep.subr.mxu1 %v12019_v62 }
 0x3d6   :  { %9386 = vmatmul.mubr.msk.f32.vlgmr.msra.gmra.mrb[60].mxu1 %vm244_vm3, %v10717_v24 }
 0x3d7   :  { %9394 = vmatpush3.xpose.msk.msra.mxu1 %vm244_vm3, %v3484_v1  ;;  %9395 = vmatprep.mubr.msk.f32.mxu1 %vm10008_vm2, %v12019_v62 }
 0x3d8   :  { %v4108_v46 = vpop.permute.xlu1 %4107  ;;  %9403 = vmatprep.subr.mxu1 %v12019_v62 }
 0x3da   :  { %9396 = vmatmul.mubr.msk.f32.vlgmr.msra.gmra.mrb[62].mxu1 %vm244_vm3, %v3482_v61 }
 0x3db   :  { %9404 = vmatpush3.xpose.msk.msra.mxu1 %vm244_vm3, %v3640_v42  ;;  %9405 = vmatprep.mubr.msk.f32.mxu1 %vm10008_vm2, %v12019_v62 }
 0x3dc   :  { %v4106_v30 = vpop.permute.xlu1 %4105  ;;  %9413 = vmatprep.subr.mxu1 %v12019_v62 }
 0x3de   :  { %9406 = vmatmul.mubr.msk.f32.vlgmr.msra.gmra.mrb[64].mxu1 %vm244_vm3, %v3638_v44 }
 0x3df   :  { %9414 = vmatpush3.xpose.msk.msra.mxu1 %vm244_vm3, %v3796_v9  ;;  %9415 = vmatprep.mubr.msk.f32.mxu1 %vm10008_vm2, %v12019_v62 }
 0x3e0   :  { %v4360_v24 = vpop.permute.xlu1 %4359  ;;  %9423 = vmatprep.subr.mxu1 %v12019_v62 }
 0x3e1   :  { %v4361_v22 = vrot.slane %v4360_v24, 4 }
 0x3e2   :  { %9416 = vmatmul.mubr.msk.f32.vlgmr.msra.gmra.mrb[66].mxu1 %vm244_vm3, %v3794_v15 }
 0x3e3   :  { %9424 = vmatpush3.xpose.msk.msra.mxu1 %vm244_vm3, %v3952_v12  ;;  %9439 = vmatpush3.msk.msra.mxu0 %vm1647_vm5, %v4361_v22 }
 0x3e4   :  { %9425 = vmatprep.mubr.msk.f32.mxu1 %vm10008_vm2, %v12019_v62  ;;  %9433 = vmatprep.subr.mxu1 %v12019_v62 }
 0x3e5   :  { %9448 = vmatprep.subr.mxu0 %v12019_v62 }
 0x3e6   :  { %9426 = vmatmul.mubr.msk.f32.vlgmr.msra.gmra.mrb[68].mxu1 %vm244_vm3, %v3950_v17 }
 0x3e7   :  { %9434 = vmatpush3.xpose.msk.msra.mxu1 %vm244_vm3, %v4108_v46  ;;  %9435 = vmatprep.mubr.msk.f32.mxu1 %vm10008_vm2, %v12019_v62 }
 0x3e8   :  { %9443 = vmatprep.subr.mxu1 %v12019_v62 }
 0x3ea   :  { %9436 = vmatmul.mubr.msk.f32.vlgmr.msra.gmra.mrb[70].mxu1 %vm244_vm3, %v4106_v30 }
 0x3eb   :  { %9444 = vmatpush3.msk.msra.mxu1 %vm1647_vm5, %v4439_v50  ;;  %9445 = vmatprep.mubr.msk.f32.mxu1 %vm10008_vm2, %v12019_v62 }
 0x3ec   :  { %9453 = vmatprep.subr.mxu1 %v12019_v62 }
 0x444   :  { %v10993_v28 = vpop.f32.mrb[8].mxu0 }
 0x445   :  { %12054 = vst [vmem:[#allocation17_spill] sm:$0xff] %v10993_v28  ;;  %v9282_v8 = vpop.f32.mrb[9].mxu0 }
 0x448   :  { %v10995_v20 = vpop.f32.mrb[40].mxu1 }
 0x449   :  { %12055 = vst [vmem:[#allocation16_spill] sm:$0xff] %v10995_v20  ;;  %v9287_v23 = vpop.f32.mrb[41].mxu1 }
 0x44c   :  { %v10997_v39 = vpop.f32.mrb[10].mxu0 }
 0x44d   :  { %12056 = vst [vmem:[#allocation19_spill] sm:$0xff] %v10997_v39  ;;  %v9292_v13 = vpop.f32.mrb[11].mxu0 }
 0x450   :  { %v10999_v49 = vpop.f32.mrb[42].mxu1 }
 0x451   :  { %12057 = vst [vmem:[#allocation18_spill] sm:$0xff] %v10999_v49  ;;  %v9297_v11 = vpop.f32.mrb[43].mxu1 }
 0x454   :  { %v11001_v3 = vpop.f32.mrb[12].mxu0 }
 0x455   :  { %12058 = vst [vmem:[#allocation9_spill] sm:$0xff] %v11001_v3  ;;  %v9302_v16 = vpop.f32.mrb[13].mxu0 }
 0x459   :  { %v11003_v0 = vpop.f32.mrb[44].mxu1 }
 0x45a   :  { %12059 = vst [vmem:[#allocation21_spill] sm:$0xff] %v11003_v0  ;;  %v9307_v27 = vpop.f32.mrb[45].mxu1 }
 0x460   :  { %v11005_v25 = vpop.f32.mrb[14].mxu0 }
 0x461   :  { %12060 = vst [vmem:[#allocation20_spill] sm:$0xff] %v11005_v25  ;;  %v11007_v1 = vpop.f32.mrb[46].mxu1  ;;  %v9312_v47 = vpop.f32.mrb[15].mxu0 }
 0x462   :  { %12061 = vst [vmem:[#allocation10_spill] sm:$0xff] %v11007_v1  ;;  %v9317_v61 = vpop.f32.mrb[47].mxu1 }
 0x464   :  { %v11009_v53 = vpop.f32.mrb[16].mxu0 }
 0x465   :  { %12062 = vst [vmem:[#allocation23_spill] sm:$0xff] %v11009_v53  ;;  %v9322_v41 = vpop.f32.mrb[17].mxu0 }
 0x468   :  { %v11011_v56 = vpop.f32.mrb[18].mxu0 }
 0x469   :  { %12063 = vst [vmem:[#allocation22_spill] sm:$0xff] %v11011_v56  ;;  %v9332_v42 = vpop.f32.mrb[19].mxu0 }
 0x46c   :  { %v11013_v44 = vpop.f32.mrb[48].mxu1  ;;  %v11015_v37 = vpop.f32.mrb[20].mxu0 }
 0x46d   :  { %12064 = vst [vmem:[#allocation25_spill] sm:$0xff] %v11013_v44  ;;  %12065 = vst [vmem:[#allocation24_spill] sm:$0xff] %v11015_v37  ;;  %v9327_v9 = vpop.f32.mrb[49].mxu1  ;;  %v9342_v59 = vpop.f32.mrb[21].mxu0 }
 0x470   :  { %v11017_v4 = vpop.f32.mrb[50].mxu1  ;;  %v11019_v15 = vpop.f32.mrb[22].mxu0 }
 0x471   :  { %12066 = vst [vmem:[#allocation27_spill] sm:$0xff] %v11017_v4  ;;  %12067 = vst [vmem:[#allocation26_spill] sm:$0xff] %v11019_v15  ;;  %v9337_v19 = vpop.f32.mrb[51].mxu1  ;;  %v9352_v32 = vpop.f32.mrb[23].mxu0 }
 0x474   :  { %v11021_v12 = vpop.f32.mrb[52].mxu1 }
 0x475   :  { %12068 = vst [vmem:[#allocation11_spill] sm:$0xff] %v11021_v12  ;;  %v9347_v52 = vpop.f32.mrb[53].mxu1 }
 0x477   :  { %v11023_v17 = vpop.f32.mrb[24].mxu0 }
 0x478   :  { %v9362_v46 = vpop.f32.mrb[25].mxu0  ;;  %v4183_v30 = vsel %vm1459_vm6, %v11023_v17, -inf }
 0x479   :  { %4184 = vmax.xlane.f32.xlu0 %v4183_v30 }
 0x47b   :  { %v11027_v24 = vpop.f32.mrb[26].mxu0 }
 0x47c   :  { %v9372_v22 = vpop.f32.mrb[27].mxu0  ;;  %v4189_v36 = vsel %vm1459_vm6, %v11027_v24, -inf }
 0x47d   :  { %4190 = vmax.xlane.f32.xlu0 %v4189_v36 }
 0x47f   :  { %v11031_v50 = vpop.f32.mrb[28].mxu0 }
 0x480   :  { %v9382_v8 = vpop.f32.mrb[29].mxu0  ;;  %v4195_v36 = vsel %vm1459_vm6, %v11031_v50, -inf }
 0x483   :  { %v11033_v23 = vpop.f32.mrb[30].mxu0 }
 0x484   :  { %v9392_v13 = vpop.f32.mrb[31].mxu0 }
 0x487   :  { %v11035_v11 = vpop.f32.mrb[32].mxu0 }
 0x488   :  { %v9402_v16 = vpop.f32.mrb[33].mxu0 }
 0x48b   :  { %v11037_v27 = vpop.f32.mrb[34].mxu0 }
 0x48c   :  { %v9412_v47 = vpop.f32.mrb[35].mxu0 }
 0x48f   :  { %v11039_v61 = vpop.f32.mrb[36].mxu0 }
 0x490   :  { %v9422_v41 = vpop.f32.mrb[37].mxu0 }
 0x491   :  { %v4201_v41 = vsel %vm1459_vm6, %v11033_v23, -inf }
 0x493   :  { %v11041_v42 = vpop.f32.mrb[38].mxu0 }
 0x494   :  { %v9432_v9 = vpop.f32.mrb[39].mxu0 }
 0x49d   :  { %v11043_v59 = vpop.f32.mrb[54].mxu1 }
 0x49e   :  { %12069 = vst [vmem:[#allocation31_spill] sm:$0xff] %v11043_v59  ;;  %v9357_v19 = vpop.f32.mrb[55].mxu1 }
 0x4a1   :  { %v11045_v32 = vpop.f32.mrb[56].mxu1 }
 0x4a2   :  { %v9367_v52 = vpop.f32.mrb[57].mxu1  ;;  %v4186_v46 = vsel %vm1459_vm6, %v11045_v32, -inf }
 0x4a3   :  { %4187 = vmax.xlane.f32.xlu1 %v4186_v46  ;;  %v4207_v46 = vsel %vm1459_vm6, %v11035_v11, -inf }
 0x4a5   :  { %v11049_v30 = vpop.f32.mrb[58].mxu1 }
 0x4a6   :  { %v9377_v22 = vpop.f32.mrb[59].mxu1  ;;  %v4192_v8 = vsel %vm1459_vm6, %v11049_v30, -inf }
 0x4a7   :  { %4196 = vmax.xlane.f32.xlu1 %v4195_v36  ;;  %4193 = vmax.xlane.f32.xlu0 %v4192_v8 }
 0x4a9   :  { %v11055_v13 = vpop.f32.mrb[60].mxu1 }
 0x4aa   :  { %v9387_v16 = vpop.f32.mrb[61].mxu1  ;;  %v4198_v47 = vsel %vm1459_vm6, %v11055_v13, -inf }
 0x4ab   :  { %4199 = vmax.xlane.f32.xlu0 %v4198_v47  ;;  %4202 = vmax.xlane.f32.xlu1 %v4201_v41  ;;  %v4213_v16 = vsel %vm1459_vm6, %v11037_v27, -inf }
 0x4ad   :  { %v11061_v9 = vpop.f32.mrb[62].mxu1 }
 0x4ae   :  { %v9397_v19 = vpop.f32.mrb[63].mxu1  ;;  %v4204_v52 = vsel %vm1459_vm6, %v11061_v9, -inf }
 0x4af   :  { %4205 = vmax.xlane.f32.xlu0 %v4204_v52  ;;  %4208 = vmax.xlane.f32.xlu1 %v4207_v46  ;;  %v4219_v52 = vsel %vm1459_vm6, %v11039_v61, -inf }
 0x4b1   :  { %v11067_v22 = vpop.f32.mrb[64].mxu1 }
 0x4b2   :  { %v9407_v36 = vpop.f32.mrb[65].mxu1  ;;  %v4210_v8 = vsel %vm1459_vm6, %v11067_v22, -inf }
 0x4b3   :  { %4211 = vmax.xlane.f32.xlu0 %v4210_v8  ;;  %4214 = vmax.xlane.f32.xlu1 %v4213_v16  ;;  %v4225_v8 = vsel %vm1459_vm6, %v11041_v42, -inf }
 0x4b5   :  { %v11073_v47 = vpop.f32.mrb[66].mxu1 }
 0x4b6   :  { %v9417_v41 = vpop.f32.mrb[67].mxu1  ;;  %v4216_v19 = vsel %vm1459_vm6, %v11073_v47, -inf }
 0x4b7   :  { %4217 = vmax.xlane.f32.xlu0 %v4216_v19  ;;  %4220 = vmax.xlane.f32.xlu1 %v4219_v52  ;;  %v11089_v19 = vpop.permute.xlu0 %4671 }
 0x4b9   :  { %v11079_v46 = vpop.f32.mrb[68].mxu1 }
 0x4ba   :  { %v9427_v36 = vpop.f32.mrb[69].mxu1  ;;  %v4222_v59 = vsel %vm1459_vm6, %v11079_v46, -inf }
 0x4bb   :  { %4223 = vmax.xlane.f32.xlu0 %v4222_v59  ;;  %4226 = vmax.xlane.f32.xlu1 %v4225_v8  ;;  %v11091_v52 = vpop.permute.xlu0 %4827 }
 0x4bd   :  { %v11085_v16 = vpop.f32.mrb[70].mxu1 }
 0x4be   :  { %v9437_v41 = vpop.f32.mrb[71].mxu1  ;;  %v4228_v12 = vsel %vm1459_vm6, %v11085_v16, -inf }
 0x4bf   :  { %4229 = vmax.xlane.f32.xlu0 %v4228_v12  ;;  %v11093_v36 = vpop.permute.xlu0 %4983  ;;  %v11105_v41 = vpop.permute.xlu1 %4515 }
 0x4c3   :  { %v11097_v15 = vpop.permute.xlu0 %5139  ;;  %v11109_v37 = vpop.permute.xlu1 %4593 }
 0x4c7   :  { %v11101_v59 = vpop.permute.xlu0 %5295  ;;  %v11113_v44 = vpop.permute.xlu1 %4749 }
 0x4cb   :  { %v11103_v8 = vpop.permute.xlu0 %5451  ;;  %v11117_v53 = vpop.permute.xlu1 %4905 }
 0x4cc   :  { %6155 = vrot.lane.b32.xlu1 %v10166_v31, %s10014_s7  ;;  %12070 = vst [vmem:[#allocation30_spill] sm:$0xff] %v11103_v8 }
 0x4cf   :  { %v11107_v12 = vpop.permute.xlu0 %5609  ;;  %v11121_v0 = vpop.permute.xlu1 %5061 }
 0x4d0   :  { %12071 = vst [vmem:[#allocation29_spill] sm:$0xff] %v11107_v12 }
 0x4d3   :  { %v11111_v4 = vpop.permute.xlu0 %5607  ;;  %v11125_v3 = vpop.permute.xlu1 %5217 }
 0x4d4   :  { %12072 = vst [vmem:[#allocation28_spill] sm:$0xff] %v11111_v4 }
 0x4d5   :  { %6077 = vrot.lane.b32.xlu0 %v10158_v29, %s10014_s7 }
 0x4d7   :  { %v11115_v56 = vpop.permute.xlu0 %5765  ;;  %v11129_v20 = vpop.permute.xlu1 %5373 }
 0x4d8   :  { %12073 = vst [vmem:[#allocation43_spill] sm:$0xff] %v11115_v56  ;;  %12077 = vst [vmem:[#allocation45_spill] sm:$0xff] %v11129_v20 }
 0x4db   :  { %v11119_v1 = vpop.permute.xlu0 %5763  ;;  %v11132_v34 = vpop.permute.xlu1 %5529 }
 0x4dc   :  { %12074 = vst [vmem:[#allocation42_spill] sm:$0xff] %v11119_v1  ;;  %12078 = vst [vmem:[#allocation44_spill] sm:$0xff] %v11132_v34 }
 0x4df   :  { %v11123_v25 = vpop.permute.xlu0 %5921  ;;  %v11135_v56 = vpop.permute.xlu1 %5687 }
 0x4e0   :  { %12075 = vst [vmem:[#allocation33_spill] sm:$0xff] %v11123_v25  ;;  %12079 = vst [vmem:[#allocation34_spill] sm:$0xff] %v11135_v56 }
 0x4e3   :  { %v11127_v49 = vpop.permute.xlu0 %5919  ;;  %v11137_v25 = vpop.permute.xlu1 %5685 }
 0x4e4   :  { %12076 = vst [vmem:[#allocation32_spill] sm:$0xff] %v11127_v49  ;;  %12080 = vst [vmem:[#allocation36_spill] sm:$0xff] %v11137_v25 }
 0x506   :  { %v4185_v39 = vpop.xlane.xlu0 %4184 }
 0x507   :  { %v4231_v28 = vsub.f32 %v11023_v17, %v4185_v39  ;;  %v11145_v17 = vpop.permute.xlu1 %5843 }
 0x508   :  { %12081 = vst [vmem:[#allocation38_spill] sm:$0xff] %v11145_v17 }
 0x509   :  { %v4247_v6 = vmul.f32 1.442695, %v4231_v28 }
 0x50a   :  { %v4191_v21 = vpop.xlane.xlu0 %4190 }
 0x50b   :  { %9828 = vpow2.f32 %v4247_v6  ;;  %v4233_v26 = vsub.f32 %v11027_v24, %v4191_v21  ;;  %v11149_v21 = vpop.permute.xlu1 %5841 }
 0x50c   :  { %12082 = vst [vmem:[#allocation40_spill] sm:$0xff] %v11149_v21 }
 0x50d   :  { %v4251_v1 = vmul.f32 1.442695, %v4233_v26 }
 0x50f   :  { %9830 = vpow2.f32 %v4251_v1  ;;  %v11151_v26 = vpop.permute.xlu1 %5999 }
 0x510   :  { %12083 = vst [vmem:[#allocation35_spill] sm:$0xff] %v11151_v26 }
 0x513   :  { %v11153_v28 = vpop.permute.xlu1 %5997 }
 0x514   :  { %12084 = vst [vmem:[#allocation37_spill] sm:$0xff] %v11153_v28 }
 0x515   :  { %v11139_v4 = vpop.eup %9828 }
 0x516   :  { %v4279_v49 = vsel %vm1459_vm6, %v11139_v4, 0.0 }
 0x517   :  { %4280 = vadd.xlane.f32.xlu1 %v4279_v49 }
 0x519   :  { %v11143_v39 = vpop.eup %9830 }
 0x51a   :  { %v4285_v6 = vsel %vm1459_vm6, %v11143_v39, 0.0 }
 0x51b   :  { %4286 = vadd.xlane.f32.xlu1 %v4285_v6 }
 0x530   :  { %v4188_v1 = vpop.xlane.xlu1 %4187 }
 0x531   :  { %v4232_v24 = vsub.f32 %v11045_v32, %v4188_v1 }
 0x533   :  { %v4249_v25 = vmul.f32 1.442695, %v4232_v24 }
 0x534   :  { %v4197_v12 = vpop.xlane.xlu1 %4196  ;;  %v4194_v49 = vpop.xlane.xlu0 %4193 }
 0x535   :  { %9832 = vpow2.f32 %v4249_v25  ;;  %v4235_v56 = vsub.f32 %v11031_v50, %v4197_v12  ;;  %v4234_v17 = vsub.f32 %v11049_v30, %v4194_v49 }
 0x537   :  { %v4255_v34 = vmul.f32 1.442695, %v4235_v56  ;;  %v4253_v20 = vmul.f32 1.442695, %v4234_v17 }
 0x538   :  { %v4203_v6 = vpop.xlane.xlu1 %4202  ;;  %v4200_v8 = vpop.xlane.xlu0 %4199 }
 0x539   :  { %9834 = vpow2.f32 %v4255_v34  ;;  %v4237_v26 = vsub.f32 %v11033_v23, %v4203_v6  ;;  %v4236_v28 = vsub.f32 %v11055_v13, %v4200_v8 }
 0x53a   :  { %9836 = vpow2.f32 %v4253_v20 }
 0x53b   :  { %v4259_v21 = vmul.f32 1.442695, %v4237_v26  ;;  %v4257_v32 = vmul.f32 1.442695, %v4236_v28 }
 0x53c   :  { %v4209_v1 = vpop.xlane.xlu1 %4208  ;;  %v4206_v24 = vpop.xlane.xlu0 %4205 }
 0x53d   :  { %9838 = vpow2.f32 %v4259_v21  ;;  %v4239_v25 = vsub.f32 %v11035_v11, %v4209_v1  ;;  %v4238_v50 = vsub.f32 %v11061_v9, %v4206_v24 }
 0x53e   :  { %9840 = vpow2.f32 %v4257_v32 }
 0x53f   :  { %v11162_v56 = vpop.eup %9832  ;;  %v4263_v30 = vmul.f32 1.442695, %v4239_v25  ;;  %v4261_v12 = vmul.f32 1.442695, %v4238_v50 }
 0x540   :  { %v4215_v34 = vpop.xlane.xlu1 %4214  ;;  %v4212_v17 = vpop.xlane.xlu0 %4211  ;;  %v4282_v23 = vsel %vm1459_vm6, %v11162_v56, 0.0 }
 0x541   :  { %9842 = vpow2.f32 %v4263_v30  ;;  %v4241_v20 = vsub.f32 %v11037_v27, %v4215_v34  ;;  %v4240_v13 = vsub.f32 %v11067_v22, %v4212_v17  ;;  %4283 = vadd.xlane.f32.xlu0 %v4282_v23 }
 0x542   :  { %9844 = vpow2.f32 %v4261_v12 }
 0x543   :  { %v11168_v11 = vpop.eup %9834  ;;  %v4267_v9 = vmul.f32 1.442695, %v4241_v20  ;;  %v4265_v8 = vmul.f32 1.442695, %v4240_v13 }
 0x544   :  { %v11170_v21 = vpop.eup %9836  ;;  %v4221_v26 = vpop.xlane.xlu1 %4220  ;;  %v4291_v49 = vsel %vm1459_vm6, %v11168_v11, 0.0 }
 0x545   :  { %v4218_v28 = vpop.xlane.xlu0 %4217  ;;  %9846 = vpow2.f32 %v4267_v9  ;;  %v4243_v6 = vsub.f32 %v11039_v61, %v4221_v26  ;;  %4292 = vadd.xlane.f32.xlu1 %v4291_v49  ;;  %v4288_v22 = vsel %vm1459_vm6, %v11170_v21, 0.0 }
 0x546   :  { %v4242_v27 = vsub.f32 %v11073_v47, %v4218_v28  ;;  %9848 = vpow2.f32 %v4265_v8  ;;  %4289 = vadd.xlane.f32.xlu0 %v4288_v22 }
 0x547   :  { %v11178_v32 = vpop.eup %9838  ;;  %v4271_v1 = vmul.f32 1.442695, %v4243_v6 }
 0x548   :  { %v4269_v24 = vmul.f32 1.442695, %v4242_v27  ;;  %v11180_v25 = vpop.eup %9840  ;;  %v4297_v30 = vsel %vm1459_vm6, %v11178_v32, 0.0 }
 0x549   :  { %v4224_v50 = vpop.xlane.xlu0 %4223  ;;  %9850 = vpow2.f32 %v4271_v1  ;;  %4298 = vadd.xlane.f32.xlu1 %v4297_v30  ;;  %v4294_v47 = vsel %vm1459_vm6, %v11180_v25, 0.0 }
 0x54a   :  { %v4244_v61 = vsub.f32 %v11079_v46, %v4224_v50  ;;  %9852 = vpow2.f32 %v4269_v24  ;;  %4295 = vadd.xlane.f32.xlu0 %v4294_v47  ;;  %v4227_v24 = vpop.xlane.xlu1 %4226 }
 0x54b   :  { %v11187_v12 = vpop.eup %9842  ;;  %v4245_v30 = vsub.f32 %v11041_v42, %v4227_v24 }
 0x54c   :  { %v4273_v34 = vmul.f32 1.442695, %v4244_v61  ;;  %v11189_v17 = vpop.eup %9844  ;;  %v4303_v23 = vsel %vm1459_vm6, %v11187_v12, 0.0 }
 0x54d   :  { %4304 = vadd.xlane.f32.xlu1 %v4303_v23  ;;  %v4300_v20 = vsel %vm1459_vm6, %v11189_v17, 0.0  ;;  %v4230_v1 = vpop.xlane.xlu0 %4229  ;;  %v4275_v47 = vmul.f32 1.442695, %v4245_v30 }
 0x54e   :  { %9854 = vpow2.f32 %v4273_v34  ;;  %4301 = vadd.xlane.f32.xlu0 %v4300_v20  ;;  %v4246_v50 = vsub.f32 %v11085_v16, %v4230_v1  ;;  %v11233_v42 = vpop.permute.xlu1 %6155  ;;  %v5063_v1 = vrot.slane %v11121_v0, 4  ;;  %v5297_v0 = vrot.slane %v11101_v59, 4 }
 0x54f   :  { %v11195_v46 = vpop.eup %9846 }
 0x550   :  { %v11197_v13 = vpop.eup %9848  ;;  %v4309_v9 = vsel %vm1459_vm6, %v11195_v46, 0.0  ;;  %v4277_v61 = vmul.f32 1.442695, %v4246_v50  ;;  %v5219_v50 = vrot.slane %v11125_v3, 4 }
 0x551   :  { %4310 = vadd.xlane.f32.xlu1 %v4309_v9  ;;  %v4306_v8 = vsel %vm1459_vm6, %v11197_v13, 0.0 }
 0x552   :  { %4307 = vadd.xlane.f32.xlu0 %v4306_v8  ;;  %9856 = vpow2.f32 %v4277_v61  ;;  %v4517_v8 = vrot.slane %v11105_v41, 4 }
 0x553   :  { %v11203_v26 = vpop.eup %9850  ;;  %9858 = vpow2.f32 %v4275_v47  ;;  %v12086_v47 = vld [vmem:[#allocation45_spill] sm:$0xff] }
 0x554   :  { %v11205_v28 = vpop.eup %9852  ;;  %v4315_v49 = vsel %vm1459_vm6, %v11203_v26, 0.0 }
 0x555   :  { %4316 = vadd.xlane.f32.xlu1 %v4315_v49  ;;  %v4312_v6 = vsel %vm1459_vm6, %v11205_v28, 0.0  ;;  %v4907_v49 = vrot.slane %v11117_v53, 4  ;;  %v5141_v53 = vrot.slane %v11097_v15, 4 }
 0x556   :  { %4313 = vadd.xlane.f32.xlu0 %v4312_v6 }
 0x558   :  { %v11211_v27 = vpop.eup %9854 }
 0x559   :  { %v4318_v22 = vsel %vm1459_vm6, %v11211_v27, 0.0 }
 0x55a   :  { %4319 = vadd.xlane.f32.xlu0 %v4318_v22 }
 0x55c   :  { %v11223_v34 = vpop.eup %9856 }
 0x55d   :  { %v11225_v23 = vpop.eup %9858 }
 0x566   :  { %6153 = vrot.lane.b32.xlu1 %v10166_v31, %s10015_s8  ;;  %v4324_v31 = vsel %vm1459_vm6, %v11223_v34, 0.0 }
 0x56a   :  { %6311 = vrot.lane.b32.xlu1 %v10176_v35, %s10014_s7 }
 0x570   :  { %6075 = vrot.lane.b32.xlu0 %v10158_v29, %s10015_s8  ;;  %v4321_v29 = vsel %vm1459_vm6, %v11225_v23, 0.0 }
 0x58e   :  { %4325 = vadd.xlane.f32.xlu1 %v4324_v31  ;;  %v5375_v31 = vrot.slane %v12086_v47, 4 }
 0x58f   :  { %4322 = vadd.xlane.f32.xlu0 %v4321_v29  ;;  %v12087_v29 = vld [vmem:[#allocation44_spill] sm:$0xff] }
 0x59f   :  { %6309 = vrot.lane.b32.xlu1 %v10176_v35, %s10015_s8 }
 0x5a3   :  { %6467 = vrot.lane.b32.xlu1 %v10187_v40, %s10014_s7 }
 0x5a4   :  { %v4281_v16 = vpop.xlane.xlu1 %4280 }
 0x5a5   :  { %9860 = vrcp.f32 %v4281_v16  ;;  %6233 = vrot.lane.b32.xlu0 %v10168_v33, %s10014_s7  ;;  %v5531_v16 = vrot.slane %v12087_v29, 4 }
 0x5a7   :  { %6465 = vrot.lane.b32.xlu1 %v10187_v40, %s10015_s8 }
 0x5a8   :  { %v4287_v20 = vpop.xlane.xlu1 %4286 }
 0x5a9   :  { %9862 = vrcp.f32 %v4287_v20  ;;  %6231 = vrot.lane.b32.xlu0 %v10168_v33, %s10015_s8 }
 0x5ab   :  { %6623 = vrot.lane.b32.xlu1 %v10199_v45, %s10014_s7 }
 0x5ad   :  { %6389 = vrot.lane.b32.xlu0 %v10179_v38, %s10014_s7 }
 0x5af   :  { %v9861_v35 = vpop.eup %9860  ;;  %6621 = vrot.lane.b32.xlu1 %v10199_v45, %s10015_s8  ;;  %v4673_v45 = vrot.slane %v11089_v19, 4  ;;  %v4751_v19 = vrot.slane %v11113_v44, 4 }
 0x5b0   :  { %v4343_v9 = vmul.f32 %v9861_v35, %v11139_v4 }
 0x5b1   :  { %6387 = vrot.lane.b32.xlu0 %v10179_v38, %s10015_s8  ;;  %v11289_v38 = vpop.permute.xlu0 %6077 }
 0x5b2   :  { %9441 = vmatmul.mubr.msk.f32.vlgmr.msra.gmra.mrb[40].mxu0 %vm1643_vm7, %v4343_v9 }
 0x5b3   :  { %v9863_v33 = vpop.eup %9862  ;;  %9449 = vmatpush3.msk.msra.mxu0 %vm1647_vm5, %v4517_v8  ;;  %6779 = vrot.lane.b32.xlu1 %v10211_v51, %s10014_s7 }
 0x5b4   :  { %9450 = vmatprep.mubr.msk.f32.mxu0 %vm10008_vm2, %v12019_v62  ;;  %9458 = vmatprep.subr.mxu0 %v12019_v62  ;;  %v4345_v40 = vmul.f32 %v9863_v33, %v11143_v39 }
 0x5b5   :  { %6545 = vrot.lane.b32.xlu0 %v10191_v43, %s10014_s7 }
 0x5b6   :  { %9451 = vmatmul.mubr.msk.f32.vlgmr.msra.gmra.mrb[42].mxu0 %vm1643_vm7, %v4345_v40 }
 0x5b7   :  { %9459 = vmatpush3.msk.msra.mxu0 %vm1647_vm5, %v4673_v45  ;;  %6777 = vrot.lane.b32.xlu1 %v10211_v51, %s10015_s8 }
 0x5b8   :  { %9460 = vmatprep.mubr.msk.f32.mxu0 %vm10008_vm2, %v12019_v62  ;;  %9468 = vmatprep.subr.mxu0 %v12019_v62 }
 0x5b9   :  { %6543 = vrot.lane.b32.xlu0 %v10191_v43, %s10015_s8 }
 0x5bb   :  { %7031 = vrot.lane.b32.xlu1 %v10217_v54, %s10016_s9 }
 0x5bd   :  { %6701 = vrot.lane.b32.xlu0 %v10201_v48, %s10014_s7 }
 0x5bf   :  { %7187 = vrot.lane.b32.xlu1 %v10220_v55, %s10016_s9 }
 0x5c1   :  { %6699 = vrot.lane.b32.xlu0 %v10201_v48, %s10015_s8 }
 0x5c3   :  { %7343 = vrot.lane.b32.xlu1 %v10237_v60, %s10016_s9 }
 0x5c5   :  { %7109 = vrot.lane.b32.xlu0 %v10227_v57, %s10016_s9 }
 0x5c7   :  { %7421 = vrot.lane.b32.xlu1 %v10243_v63, %s10016_s9  ;;  %v4595_v63 = vrot.slane %v11109_v37, 4 }
 0x5c9   :  { %7265 = vrot.lane.b32.xlu0 %v10230_v58, %s10016_s9 }
 0x5cb   :  { %7577 = vrot.lane.b32.xlu1 %v10255_v5, %s10016_s9 }
 0x5cd   :  { %7499 = vrot.lane.b32.xlu0 %v10249_v2, %s10016_s9 }
 0x5ce   :  { %v4284_v43 = vpop.xlane.xlu0 %4283 }
 0x5cf   :  { %9864 = vrcp.f32 %v4284_v43  ;;  %7733 = vrot.lane.b32.xlu1 %v10267_v10, %s10016_s9 }
 0x5d1   :  { %7655 = vrot.lane.b32.xlu0 %v10261_v7, %s10016_s9 }
 0x5d2   :  { %v4293_v48 = vpop.xlane.xlu1 %4292 }
 0x5d3   :  { %9866 = vrcp.f32 %v4293_v48  ;;  %v4290_v51 = vpop.xlane.xlu0 %4289  ;;  %7889 = vrot.lane.b32.xlu1 %v10279_v18, %s10016_s9  ;;  %v4829_v18 = vrot.slane %v11091_v52, 4 }
 0x5d4   :  { %9868 = vrcp.f32 %v4290_v51 }
 0x5d5   :  { %7811 = vrot.lane.b32.xlu0 %v10273_v14, %s10016_s9 }
 0x5d6   :  { %v4299_v54 = vpop.xlane.xlu1 %4298 }
 0x5d7   :  { %9870 = vrcp.f32 %v4299_v54  ;;  %v4296_v55 = vpop.xlane.xlu0 %4295 }
 0x5d8   :  { %9872 = vrcp.f32 %v4296_v55 }
 0x5d9   :  { %v9865_v57 = vpop.eup %9864 }
 0x5da   :  { %v4305_v58 = vpop.xlane.xlu1 %4304  ;;  %v4344_v60 = vmul.f32 %v9865_v57, %v11162_v56 }
 0x5db   :  { %9874 = vrcp.f32 %v4305_v58  ;;  %v4302_v2 = vpop.xlane.xlu0 %4301 }
 0x5dc   :  { %9876 = vrcp.f32 %v4302_v2  ;;  %9446 = vmatmul.mubr.msk.f32.vlgmr.msra.gmra.mrb[72].mxu1 %vm1643_vm7, %v4344_v60  ;;  %v12088_v60 = vld [vmem:[#allocation34_spill] sm:$0xff] }
 0x5dd   :  { %v9867_v5 = vpop.eup %9866  ;;  %9454 = vmatpush3.msk.msra.mxu1 %vm1647_vm5, %v4595_v63  ;;  %9455 = vmatprep.mubr.msk.f32.mxu1 %vm10008_vm2, %v12019_v62  ;;  %v12089_v63 = vld [vmem:[#allocation29_spill] sm:$0xff] }
 0x5de   :  { %v9869_v7 = vpop.eup %9868  ;;  %v4311_v10 = vpop.xlane.xlu1 %4310  ;;  %9463 = vmatprep.subr.mxu1 %v12019_v62  ;;  %v4347_v14 = vmul.f32 %v9867_v5, %v11168_v11  ;;  %v4985_v11 = vrot.slane %v11093_v36, 4  ;;  %v12091_v5 = vld [vmem:[#allocation28_spill] sm:$0xff] }
 0x5df   :  { %9878 = vrcp.f32 %v4311_v10  ;;  %v4308_v37 = vpop.xlane.xlu0 %4307  ;;  %v4346_v4 = vmul.f32 %v9869_v7, %v11170_v21  ;;  %v12092_v7 = vld [vmem:[#allocation38_spill] sm:$0xff]  ;;  %v12093_v10 = vld [vmem:[#allocation43_spill] sm:$0xff] }
 0x5e0   :  { %9880 = vrcp.f32 %v4308_v37  ;;  %9461 = vmatmul.mubr.msk.f32.vlgmr.msra.gmra.mrb[44].mxu0 %vm1643_vm7, %v4347_v14  ;;  %v12095_v37 = vld [vmem:[#allocation42_spill] sm:$0xff] }
 0x5e1   :  { %v9871_v41 = vpop.eup %9870  ;;  %9456 = vmatmul.mubr.msk.f32.vlgmr.msra.gmra.mrb[74].mxu1 %vm1643_vm7, %v4346_v4  ;;  %9469 = vmatpush3.msk.msra.mxu0 %vm1647_vm5, %v4829_v18  ;;  %v12094_v18 = vld [vmem:[#allocation40_spill] sm:$0xff]  ;;  %v12096_v4 = vld [vmem:[#allocation35_spill] sm:$0xff] }
 0x5e2   :  { %v9873_v39 = vpop.eup %9872  ;;  %9464 = vmatpush3.msk.msra.mxu1 %vm1647_vm5, %v4751_v19  ;;  %v4317_v56 = vpop.xlane.xlu1 %4316  ;;  %9465 = vmatprep.mubr.msk.f32.mxu1 %vm10008_vm2, %v12019_v62  ;;  %v4349_v52 = vmul.f32 %v9871_v41, %v11178_v32  ;;  %v12097_v19 = vld [vmem:[#allocation33_spill] sm:$0xff] }
 0x5e3   :  { %9882 = vrcp.f32 %v4317_v56  ;;  %v4314_v44 = vpop.xlane.xlu0 %4313  ;;  %9470 = vmatprep.mubr.msk.f32.mxu0 %vm10008_vm2, %v12019_v62  ;;  %9473 = vmatprep.subr.mxu1 %v12019_v62  ;;  %v4348_v21 = vmul.f32 %v9873_v39, %v11180_v25  ;;  %v12098_v56 = vld [vmem:[#allocation37_spill] sm:$0xff] }
 0x5e4   :  { %9884 = vrcp.f32 %v4314_v44  ;;  %9478 = vmatprep.subr.mxu0 %v12019_v62  ;;  %9471 = vmatmul.mubr.msk.f32.vlgmr.msra.gmra.mrb[46].mxu0 %vm1643_vm7, %v4349_v52  ;;  %v12099_v52 = vld [vmem:[#allocation32_spill] sm:$0xff] }
 0x5e5   :  { %v9875_v6 = vpop.eup %9874  ;;  %9466 = vmatmul.mubr.msk.f32.vlgmr.msra.gmra.mrb[76].mxu1 %vm1643_vm7, %v4348_v21  ;;  %9479 = vmatpush3.msk.msra.mxu0 %vm1647_vm5, %v4985_v11 }
 0x5e6   :  { %v9877_v36 = vpop.eup %9876  ;;  %9474 = vmatpush3.msk.msra.mxu1 %vm1647_vm5, %v4907_v49  ;;  %9475 = vmatprep.mubr.msk.f32.mxu1 %vm10008_vm2, %v12019_v62  ;;  %v4351_v32 = vmul.f32 %v9875_v6, %v11187_v12  ;;  %v6154_v20 = vpop.permute.xlu1 %6153 }
 0x5e7   :  { %v4320_v25 = vpop.xlane.xlu0 %4319  ;;  %9480 = vmatprep.mubr.msk.f32.mxu0 %vm10008_vm2, %v12019_v62  ;;  %9483 = vmatprep.subr.mxu1 %v12019_v62  ;;  %v4350_v22 = vmul.f32 %v9877_v36, %v11189_v17 }
 0x5e8   :  { %9886 = vrcp.f32 %v4320_v25  ;;  %9488 = vmatprep.subr.mxu0 %v12019_v62  ;;  %9481 = vmatmul.mubr.msk.f32.vlgmr.msra.gmra.mrb[48].mxu0 %vm1643_vm7, %v4351_v32 }
 0x5e9   :  { %v9879_v24 = vpop.eup %9878  ;;  %9476 = vmatmul.mubr.msk.f32.vlgmr.msra.gmra.mrb[78].mxu1 %vm1643_vm7, %v4350_v22  ;;  %9489 = vmatpush3.msk.msra.mxu0 %vm1647_vm5, %v5141_v53 }
 0x5ea   :  { %v9881_v15 = vpop.eup %9880  ;;  %9484 = vmatpush3.msk.msra.mxu1 %vm1647_vm5, %v5063_v1  ;;  %9485 = vmatprep.mubr.msk.f32.mxu1 %vm10008_vm2, %v12019_v62  ;;  %v4353_v12 = vmul.f32 %v9879_v24, %v11195_v46  ;;  %v6312_v35 = vpop.permute.xlu1 %6311 }
 0x5eb   :  { %9490 = vmatprep.mubr.msk.f32.mxu0 %vm10008_vm2, %v12019_v62  ;;  %9493 = vmatprep.subr.mxu1 %v12019_v62  ;;  %v4352_v17 = vmul.f32 %v9881_v15, %v11197_v13  ;;  %v12085_v13 = vld [vmem:[#allocation30_spill] sm:$0xff]  ;;  %v6076_v9 = vpop.permute.xlu0 %6075 }
 0x5ec   :  { %9498 = vmatprep.subr.mxu0 %v12019_v62  ;;  %9491 = vmatmul.mubr.msk.f32.vlgmr.msra.gmra.mrb[50].mxu0 %vm1643_vm7, %v4353_v12  ;;  %v5453_v61 = vrot.slane %v12085_v13, 4 }
 0x5ed   :  { %v9883_v30 = vpop.eup %9882  ;;  %9486 = vmatmul.mubr.msk.f32.vlgmr.msra.gmra.mrb[80].mxu1 %vm1643_vm7, %v4352_v17  ;;  %9499 = vmatpush3.msk.msra.mxu0 %vm1647_vm5, %v5297_v0 }
 0x5ee   :  { %v9885_v46 = vpop.eup %9884  ;;  %9494 = vmatpush3.msk.msra.mxu1 %vm1647_vm5, %v5219_v50  ;;  %9495 = vmatprep.mubr.msk.f32.mxu1 %vm10008_vm2, %v12019_v62  ;;  %v4355_v59 = vmul.f32 %v9883_v30, %v11203_v26 }
 0x5ef   :  { %9500 = vmatprep.mubr.msk.f32.mxu0 %vm10008_vm2, %v12019_v62  ;;  %9503 = vmatprep.subr.mxu1 %v12019_v62  ;;  %v4354_v3 = vmul.f32 %v9885_v46, %v11205_v28 }
 0x5f0   :  { %9508 = vmatprep.subr.mxu0 %v12019_v62  ;;  %9501 = vmatmul.mubr.msk.f32.vlgmr.msra.gmra.mrb[52].mxu0 %vm1643_vm7, %v4355_v59 }
 0x5f1   :  { %9496 = vmatmul.mubr.msk.f32.vlgmr.msra.gmra.mrb[82].mxu1 %vm1643_vm7, %v4354_v3  ;;  %9509 = vmatpush3.msk.msra.mxu0 %vm1647_vm5, %v5453_v61 }
 0x5f2   :  { %v9887_v26 = vpop.eup %9886  ;;  %9504 = vmatpush3.msk.msra.mxu1 %vm1647_vm5, %v5375_v31  ;;  %9505 = vmatprep.mubr.msk.f32.mxu1 %vm10008_vm2, %v12019_v62 }
 0x5f3   :  { %9513 = vmatprep.subr.mxu1 %v12019_v62  ;;  %v4356_v28 = vmul.f32 %v9887_v26, %v11211_v27  ;;  %9510 = vmatprep.mubr.msk.f32.mxu0 %vm10008_vm2, %v12019_v62 }
 0x5f4   :  { %9518 = vmatprep.subr.mxu0 %v12019_v62 }
 0x5f5   :  { %9506 = vmatmul.mubr.msk.f32.vlgmr.msra.gmra.mrb[84].mxu1 %vm1643_vm7, %v4356_v28 }
 0x5f6   :  { %9514 = vmatpush3.msk.msra.mxu1 %vm1647_vm5, %v5531_v16  ;;  %9515 = vmatprep.mubr.msk.f32.mxu1 %vm10008_vm2, %v12019_v62 }
 0x5f7   :  { %9523 = vmatprep.subr.mxu1 %v12019_v62 }
 0x61b   :  { %v4326_v27 = vpop.xlane.xlu1 %4325 }
 0x61c   :  { %9888 = vrcp.f32 %v4326_v27  ;;  %v4323_v8 = vpop.xlane.xlu0 %4322 }
 0x61d   :  { %9890 = vrcp.f32 %v4323_v8 }
 0x61f   :  { %v6310_v33 = vpop.permute.xlu1 %6309 }
 0x620   :  { %v6234_v40 = vpop.permute.xlu0 %6233 }
 0x623   :  { %v6468_v45 = vpop.permute.xlu1 %6467 }
 0x624   :  { %v6232_v43 = vpop.permute.xlu0 %6231 }
 0x626   :  { %v9889_v48 = vpop.eup %9888 }
 0x627   :  { %v9891_v51 = vpop.eup %9890  ;;  %v4358_v54 = vmul.f32 %v9889_v48, %v11223_v34  ;;  %v6466_v55 = vpop.permute.xlu1 %6465  ;;  %v12090_v34 = vld [vmem:[#allocation36_spill] sm:$0xff] }
 0x628   :  { %v6390_v57 = vpop.permute.xlu0 %6389  ;;  %v4357_v58 = vmul.f32 %v9891_v51, %v11225_v23 }
 0x629   :  { %9516 = vmatmul.mubr.msk.f32.vlgmr.msra.gmra.mrb[86].mxu1 %vm1643_vm7, %v4358_v54 }
 0x62a   :  { %9511 = vmatmul.mubr.msk.f32.vlgmr.msra.gmra.mrb[54].mxu0 %vm1643_vm7, %v4357_v58  ;;  %9524 = vmatpush3.xpose.msk.msra.mxu1 %vm244_vm3, %v12088_v60 }
 0x62b   :  { %9519 = vmatpush3.xpose.msk.msra.mxu0 %vm244_vm3, %v12089_v63  ;;  %9520 = vmatprep.mubr.msk.f32.mxu0 %vm10008_vm2, %v12019_v62  ;;  %v6624_v23 = vpop.permute.xlu1 %6623 }
 0x62c   :  { %v6388_v2 = vpop.permute.xlu0 %6387  ;;  %9525 = vmatprep.mubr.msk.f32.mxu1 %vm10008_vm2, %v12019_v62  ;;  %9528 = vmatprep.subr.mxu0 %v12019_v62 }
 0x62d   :  { %9533 = vmatprep.subr.mxu1 %v12019_v62  ;;  %9526 = vmatmul.mubr.msk.f32.vlgmr.msra.gmra.mrb[88].mxu1 %vm244_vm3, %v12090_v34 }
 0x62e   :  { %9521 = vmatmul.mubr.msk.f32.vlgmr.msra.gmra.mrb[56].mxu0 %vm244_vm3, %v12091_v5  ;;  %9534 = vmatpush3.xpose.msk.msra.mxu1 %vm244_vm3, %v12092_v7 }
 0x62f   :  { %9529 = vmatpush3.xpose.msk.msra.mxu0 %vm244_vm3, %v12093_v10  ;;  %9530 = vmatprep.mubr.msk.f32.mxu0 %vm10008_vm2, %v12019_v62  ;;  %v6622_v41 = vpop.permute.xlu1 %6621 }
 0x630   :  { %v6546_v14 = vpop.permute.xlu0 %6545  ;;  %9535 = vmatprep.mubr.msk.f32.mxu1 %vm10008_vm2, %v12019_v62  ;;  %9538 = vmatprep.subr.mxu0 %v12019_v62 }
 0x631   :  { %9543 = vmatprep.subr.mxu1 %v12019_v62  ;;  %9536 = vmatmul.mubr.msk.f32.vlgmr.msra.gmra.mrb[90].mxu1 %vm244_vm3, %v12094_v18 }
 0x632   :  { %9531 = vmatmul.mubr.msk.f32.vlgmr.msra.gmra.mrb[58].mxu0 %vm244_vm3, %v12095_v37  ;;  %9544 = vmatpush3.xpose.msk.msra.mxu1 %vm244_vm3, %v12096_v4 }
 0x633   :  { %9539 = vmatpush3.xpose.msk.msra.mxu0 %vm244_vm3, %v12097_v19  ;;  %9540 = vmatprep.mubr.msk.f32.mxu0 %vm10008_vm2, %v12019_v62  ;;  %v6780_v44 = vpop.permute.xlu1 %6779 }
 0x634   :  { %v6544_v39 = vpop.permute.xlu0 %6543  ;;  %9545 = vmatprep.mubr.msk.f32.mxu1 %vm10008_vm2, %v12019_v62  ;;  %9548 = vmatprep.subr.mxu0 %v12019_v62 }
 0x635   :  { %9553 = vmatprep.subr.mxu1 %v12019_v62  ;;  %9546 = vmatmul.mubr.msk.f32.vlgmr.msra.gmra.mrb[92].mxu1 %vm244_vm3, %v12098_v56 }
 0x636   :  { %9541 = vmatmul.mubr.msk.f32.vlgmr.msra.gmra.mrb[60].mxu0 %vm244_vm3, %v12099_v52  ;;  %9554 = vmatpush3.xpose.msk.msra.mxu1 %vm244_vm3, %v11233_v42 }
 0x637   :  { %9549 = vmatpush3.xpose.msk.msra.mxu0 %vm244_vm3, %v11289_v38  ;;  %9550 = vmatprep.mubr.msk.f32.mxu0 %vm10008_vm2, %v12019_v62  ;;  %v6778_v38 = vpop.permute.xlu1 %6777 }
 0x638   :  { %9555 = vmatprep.mubr.msk.f32.mxu1 %vm10008_vm2, %v12019_v62  ;;  %9558 = vmatprep.subr.mxu0 %v12019_v62  ;;  %v6702_v11 = vpop.permute.xlu0 %6701 }
 0x639   :  { %9563 = vmatprep.subr.mxu1 %v12019_v62  ;;  %9556 = vmatmul.mubr.msk.f32.vlgmr.msra.gmra.mrb[94].mxu1 %vm244_vm3, %v6154_v20 }
 0x63a   :  { %9551 = vmatmul.mubr.msk.f32.vlgmr.msra.gmra.mrb[62].mxu0 %vm244_vm3, %v6076_v9  ;;  %9564 = vmatpush3.xpose.msk.msra.mxu1 %vm244_vm3, %v6312_v35 }
 0x63b   :  { %9559 = vmatpush3.xpose.msk.msra.mxu0 %vm244_vm3, %v6234_v40  ;;  %9560 = vmatprep.mubr.msk.f32.mxu0 %vm10008_vm2, %v12019_v62  ;;  %v7032_v49 = vpop.permute.xlu1 %7031 }
 0x63c   :  { %9565 = vmatprep.mubr.msk.f32.mxu1 %vm10008_vm2, %v12019_v62  ;;  %9568 = vmatprep.subr.mxu0 %v12019_v62  ;;  %v6700_v42 = vpop.permute.xlu0 %6699  ;;  %v7033_v36 = vrot.slane %v7032_v49, 4 }
 0x63d   :  { %9573 = vmatprep.subr.mxu1 %v12019_v62  ;;  %9566 = vmatmul.mubr.msk.f32.vlgmr.msra.gmra.mrb[96].mxu1 %vm244_vm3, %v6310_v33 }
 0x63e   :  { %9561 = vmatmul.mubr.msk.f32.vlgmr.msra.gmra.mrb[64].mxu0 %vm244_vm3, %v6232_v43  ;;  %9574 = vmatpush3.xpose.msk.msra.mxu1 %vm244_vm3, %v6468_v45 }
 0x63f   :  { %9569 = vmatpush3.xpose.msk.msra.mxu0 %vm244_vm3, %v6390_v57  ;;  %9570 = vmatprep.mubr.msk.f32.mxu0 %vm10008_vm2, %v12019_v62 }
 0x640   :  { %9575 = vmatprep.mubr.msk.f32.mxu1 %vm10008_vm2, %v12019_v62  ;;  %9578 = vmatprep.subr.mxu0 %v12019_v62  ;;  %v7110_v21 = vpop.permute.xlu0 %7109 }
 0x641   :  { %9583 = vmatprep.subr.mxu1 %v12019_v62  ;;  %9576 = vmatmul.mubr.msk.f32.vlgmr.msra.gmra.mrb[98].mxu1 %vm244_vm3, %v6466_v55  ;;  %v7111_v6 = vrot.slane %v7110_v21, 4 }
 0x642   :  { %9571 = vmatmul.mubr.msk.f32.vlgmr.msra.gmra.mrb[66].mxu0 %vm244_vm3, %v6388_v2  ;;  %9584 = vmatpush3.xpose.msk.msra.mxu1 %vm244_vm3, %v6624_v23 }
 0x643   :  { %9579 = vmatpush3.xpose.msk.msra.mxu0 %vm244_vm3, %v6546_v14  ;;  %9580 = vmatprep.mubr.msk.f32.mxu0 %vm10008_vm2, %v12019_v62 }
 0x644   :  { %9585 = vmatprep.mubr.msk.f32.mxu1 %vm10008_vm2, %v12019_v62  ;;  %9588 = vmatprep.subr.mxu0 %v12019_v62 }
 0x645   :  { %9593 = vmatprep.subr.mxu1 %v12019_v62  ;;  %9586 = vmatmul.mubr.msk.f32.vlgmr.msra.gmra.mrb[100].mxu1 %vm244_vm3, %v6622_v41 }
 0x646   :  { %9581 = vmatmul.mubr.msk.f32.vlgmr.msra.gmra.mrb[68].mxu0 %vm244_vm3, %v6544_v39  ;;  %9594 = vmatpush3.xpose.msk.msra.mxu1 %vm244_vm3, %v6780_v44 }
 0x647   :  { %9589 = vmatpush3.xpose.msk.msra.mxu0 %vm244_vm3, %v6702_v11  ;;  %9590 = vmatprep.mubr.msk.f32.mxu0 %vm10008_vm2, %v12019_v62 }
 0x648   :  { %9595 = vmatprep.mubr.msk.f32.mxu1 %vm10008_vm2, %v12019_v62  ;;  %9598 = vmatprep.subr.mxu0 %v12019_v62 }
 0x649   :  { %9603 = vmatprep.subr.mxu1 %v12019_v62  ;;  %9596 = vmatmul.mubr.msk.f32.vlgmr.msra.gmra.mrb[102].mxu1 %vm244_vm3, %v6778_v38 }
 0x64a   :  { %9591 = vmatmul.mubr.msk.f32.vlgmr.msra.gmra.mrb[70].mxu0 %vm244_vm3, %v6700_v42  ;;  %9604 = vmatpush3.msk.msra.mxu1 %vm1647_vm5, %v7111_v6 }
 0x64b   :  { %9599 = vmatpush3.msk.msra.mxu0 %vm1647_vm5, %v7033_v36  ;;  %9600 = vmatprep.mubr.msk.f32.mxu0 %vm10008_vm2, %v12019_v62 }
 0x64c   :  { %9605 = vmatprep.mubr.msk.f32.mxu1 %vm10008_vm2, %v12019_v62  ;;  %9608 = vmatprep.subr.mxu0 %v12019_v62 }
 0x64d   :  { %9613 = vmatprep.subr.mxu1 %v12019_v62 }
 0x685   :  { %v11493_v32 = vpop.f32.mrb[40].mxu0 }
 0x686   :  { %v9442_v53 = vpop.f32.mrb[41].mxu0 }
 0x689   :  { %v11495_v25 = vpop.f32.mrb[42].mxu0 }
 0x68a   :  { %v9452_v22 = vpop.f32.mrb[43].mxu0 }
 0x6af   :  { %v11497_v1 = vpop.f32.mrb[72].mxu1 }
 0x6b0   :  { %v9447_v24 = vpop.f32.mrb[73].mxu1 }
 0x6b3   :  { %v11499_v15 = vpop.f32.mrb[44].mxu0 }
 0x6b4   :  { %v11501_v12 = vpop.f32.mrb[74].mxu1  ;;  %v9462_v0 = vpop.f32.mrb[45].mxu0 }
 0x6b5   :  { %v9457_v17 = vpop.f32.mrb[75].mxu1 }
 0x6b7   :  { %v11503_v50 = vpop.f32.mrb[46].mxu0 }
 0x6b8   :  { %v11505_v30 = vpop.f32.mrb[76].mxu1  ;;  %v9472_v46 = vpop.f32.mrb[47].mxu0 }
 0x6b9   :  { %v9467_v59 = vpop.f32.mrb[77].mxu1 }
 0x6bb   :  { %v11507_v13 = vpop.f32.mrb[48].mxu0 }
 0x6bc   :  { %v11509_v61 = vpop.f32.mrb[78].mxu1  ;;  %v9482_v3 = vpop.f32.mrb[49].mxu0 }
 0x6bd   :  { %v9477_v47 = vpop.f32.mrb[79].mxu1 }
 0x6bf   :  { %v11511_v31 = vpop.f32.mrb[50].mxu0 }
 0x6c0   :  { %v11513_v26 = vpop.f32.mrb[80].mxu1  ;;  %v9492_v28 = vpop.f32.mrb[51].mxu0 }
 0x6c1   :  { %v9487_v29 = vpop.f32.mrb[81].mxu1 }
 0x6c3   :  { %v11515_v16 = vpop.f32.mrb[52].mxu0 }
 0x6c4   :  { %v11517_v20 = vpop.f32.mrb[82].mxu1  ;;  %v9502_v35 = vpop.f32.mrb[53].mxu0 }
 0x6c5   :  { %v9497_v9 = vpop.f32.mrb[83].mxu1 }
 0x6c8   :  { %v11519_v27 = vpop.f32.mrb[84].mxu1 }
 0x6c9   :  { %v9507_v8 = vpop.f32.mrb[85].mxu1 }
 0x6fc   :  { %v11521_v33 = vpop.f32.mrb[86].mxu1 }
 0x6fd   :  { %v11523_v40 = vpop.f32.mrb[54].mxu0  ;;  %v9517_v45 = vpop.f32.mrb[87].mxu1 }
 0x6fe   :  { %v9512_v43 = vpop.f32.mrb[55].mxu0 }
 0x700   :  { %v11525_v48 = vpop.f32.mrb[88].mxu1 }
 0x701   :  { %v11527_v51 = vpop.f32.mrb[56].mxu0  ;;  %v9527_v54 = vpop.f32.mrb[89].mxu1  ;;  %v6858_v55 = vsel %vm1459_vm6, %v11525_v48, -inf }
 0x702   :  { %v9522_v57 = vpop.f32.mrb[57].mxu0  ;;  %6859 = vmax.xlane.f32.xlu1 %v6858_v55  ;;  %v6855_v58 = vsel %vm1459_vm6, %v11527_v51, -inf  ;;  %v12100_v55 = vld [vmem:[#allocation13_spill] sm:$0xff] }
 0x703   :  { %6856 = vmax.xlane.f32.xlu0 %v6855_v58  ;;  %v12101_v57 = vld [vmem:[#allocation12_spill] sm:$0xff]  ;;  %v11593_v58 = vpop.permute.xlu1 %7187 }
 0x704   :  { %v11533_v60 = vpop.f32.mrb[90].mxu1 }
 0x705   :  { %v11535_v63 = vpop.f32.mrb[58].mxu0  ;;  %v9537_v2 = vpop.f32.mrb[91].mxu1  ;;  %v6864_v18 = vsel %vm1459_vm6, %v11533_v60, -inf }
 0x706   :  { %v9532_v34 = vpop.f32.mrb[59].mxu0  ;;  %v6861_v23 = vsel %vm1459_vm6, %v11535_v63, -inf }
 0x707   :  { %6862 = vmax.xlane.f32.xlu0 %v6861_v23  ;;  %v11595_v2 = vpop.permute.xlu1 %7343  ;;  %v11599_v23 = vpop.permute.xlu0 %7265 }
 0x708   :  { %v11539_v5 = vpop.f32.mrb[92].mxu1 }
 0x709   :  { %v11541_v7 = vpop.f32.mrb[60].mxu0  ;;  %v9547_v10 = vpop.f32.mrb[93].mxu1  ;;  %v6870_v56 = vsel %vm1459_vm6, %v11539_v5, -inf }
 0x70a   :  { %v9542_v14 = vpop.f32.mrb[61].mxu0  ;;  %v6867_v37 = vsel %vm1459_vm6, %v11541_v7, -inf }
 0x70b   :  { %6865 = vmax.xlane.f32.xlu0 %v6864_v18  ;;  %6868 = vmax.xlane.f32.xlu1 %v6867_v37  ;;  %v11597_v34 = vpop.permute.xlu1 %7421  ;;  %v11603_v14 = vpop.permute.xlu0 %7499 }
 0x70c   :  { %v11547_v4 = vpop.f32.mrb[94].mxu1 }
 0x70d   :  { %v11549_v19 = vpop.f32.mrb[62].mxu0  ;;  %v9557_v41 = vpop.f32.mrb[95].mxu1  ;;  %v6876_v21 = vsel %vm1459_vm6, %v11547_v4, -inf }
 0x70e   :  { %v9552_v39 = vpop.f32.mrb[63].mxu0  ;;  %v6873_v52 = vsel %vm1459_vm6, %v11549_v19, -inf }
 0x70f   :  { %6871 = vmax.xlane.f32.xlu0 %v6870_v56  ;;  %6874 = vmax.xlane.f32.xlu1 %v6873_v52  ;;  %v11601_v10 = vpop.permute.xlu1 %7577  ;;  %v11607_v37 = vpop.permute.xlu0 %7655 }
 0x710   :  { %v11555_v11 = vpop.f32.mrb[96].mxu1 }
 0x711   :  { %v11557_v44 = vpop.f32.mrb[64].mxu0  ;;  %v9567_v42 = vpop.f32.mrb[97].mxu1  ;;  %v6882_v24 = vsel %vm1459_vm6, %v11555_v11, -inf }
 0x712   :  { %v9562_v38 = vpop.f32.mrb[65].mxu0  ;;  %v6879_v49 = vsel %vm1459_vm6, %v11557_v44, -inf }
 0x713   :  { %6877 = vmax.xlane.f32.xlu0 %v6876_v21  ;;  %6880 = vmax.xlane.f32.xlu1 %v6879_v49  ;;  %v11605_v18 = vpop.permute.xlu1 %7733  ;;  %v11611_v39 = vpop.permute.xlu0 %7811 }
 0x714   :  { %v11563_v6 = vpop.f32.mrb[98].mxu1 }
 0x715   :  { %v11565_v36 = vpop.f32.mrb[66].mxu0  ;;  %v9577_v53 = vpop.f32.mrb[99].mxu1  ;;  %v6888_v47 = vsel %vm1459_vm6, %v11563_v6, -inf }
 0x716   :  { %v9572_v22 = vpop.f32.mrb[67].mxu0  ;;  %v6885_v0 = vsel %vm1459_vm6, %v11565_v36, -inf }
 0x717   :  { %6883 = vmax.xlane.f32.xlu0 %v6882_v24  ;;  %6886 = vmax.xlane.f32.xlu1 %v6885_v0  ;;  %v11609_v41 = vpop.permute.xlu1 %7889 }
 0x718   :  { %v11571_v17 = vpop.f32.mrb[100].mxu1 }
 0x719   :  { %v11573_v46 = vpop.f32.mrb[68].mxu0  ;;  %v9587_v59 = vpop.f32.mrb[101].mxu1  ;;  %v6894_v45 = vsel %vm1459_vm6, %v11571_v17, -inf }
 0x71a   :  { %v9582_v3 = vpop.f32.mrb[69].mxu0  ;;  %v6891_v28 = vsel %vm1459_vm6, %v11573_v46, -inf }
 0x71b   :  { %6889 = vmax.xlane.f32.xlu0 %v6888_v47  ;;  %6892 = vmax.xlane.f32.xlu1 %v6891_v28 }
 0x71c   :  { %v11579_v29 = vpop.f32.mrb[102].mxu1 }
 0x71d   :  { %v11581_v35 = vpop.f32.mrb[70].mxu0  ;;  %v9597_v9 = vpop.f32.mrb[103].mxu1  ;;  %v6900_v54 = vsel %vm1459_vm6, %v11579_v29, -inf }
 0x71e   :  { %v9592_v8 = vpop.f32.mrb[71].mxu0  ;;  %v6897_v43 = vsel %vm1459_vm6, %v11581_v35, -inf }
 0x71f   :  { %6895 = vmax.xlane.f32.xlu0 %v6894_v45  ;;  %6898 = vmax.xlane.f32.xlu1 %v6897_v43 }
 0x723   :  { %6901 = vmax.xlane.f32.xlu0 %v6900_v54 }
 0x730   :  { %8045 = vrot.lane.b32.xlu1 %v12100_v55, %s10016_s9 }
 0x739   :  { %7967 = vrot.lane.b32.xlu0 %v12101_v57, %s10016_s9 }
 0x78f   :  { %v6860_v56 = vpop.xlane.xlu1 %6859 }
 0x790   :  { %v6904_v52 = vsub.f32 %v11525_v48, %v6860_v56  ;;  %v6857_v42 = vpop.xlane.xlu0 %6856 }
 0x791   :  { %v6903_v38 = vsub.f32 %v11527_v51, %v6857_v42 }
 0x792   :  { %v6921_v21 = vmul.f32 1.442695, %v6904_v52 }
 0x793   :  { %v6919_v49 = vmul.f32 1.442695, %v6903_v38 }
 0x794   :  { %9892 = vpow2.f32 %v6921_v21  ;;  %v6863_v53 = vpop.xlane.xlu0 %6862 }
 0x795   :  { %9894 = vpow2.f32 %v6919_v49  ;;  %v6905_v22 = vsub.f32 %v11535_v63, %v6863_v53 }
 0x797   :  { %v6923_v24 = vmul.f32 1.442695, %v6905_v22 }
 0x798   :  { %v6869_v0 = vpop.xlane.xlu1 %6868  ;;  %v6866_v59 = vpop.xlane.xlu0 %6865 }
 0x799   :  { %9896 = vpow2.f32 %v6923_v24  ;;  %v6907_v3 = vsub.f32 %v11541_v7, %v6869_v0  ;;  %v6906_v47 = vsub.f32 %v11533_v60, %v6866_v59 }
 0x79b   :  { %v6927_v28 = vmul.f32 1.442695, %v6907_v3  ;;  %v6925_v48 = vmul.f32 1.442695, %v6906_v47 }
 0x79c   :  { %v6875_v9 = vpop.xlane.xlu1 %6874  ;;  %v6872_v8 = vpop.xlane.xlu0 %6871 }
 0x79d   :  { %9898 = vpow2.f32 %v6927_v28  ;;  %v6909_v51 = vsub.f32 %v11549_v19, %v6875_v9  ;;  %v6908_v45 = vsub.f32 %v11539_v5, %v6872_v8 }
 0x79e   :  { %v11620_v43 = vpop.eup %9892  ;;  %9900 = vpow2.f32 %v6925_v48 }
 0x79f   :  { %v11622_v63 = vpop.eup %9894  ;;  %v6931_v54 = vmul.f32 1.442695, %v6909_v51  ;;  %v6929_v55 = vmul.f32 1.442695, %v6908_v45  ;;  %v6954_v7 = vsel %vm1459_vm6, %v11620_v43, 0.0 }
 0x7a0   :  { %v6881_v60 = vpop.xlane.xlu1 %6880  ;;  %v6878_v57 = vpop.xlane.xlu0 %6877  ;;  %6955 = vadd.xlane.f32.xlu0 %v6954_v7  ;;  %v6951_v56 = vsel %vm1459_vm6, %v11622_v63, 0.0 }
 0x7a1   :  { %9902 = vpow2.f32 %v6931_v54  ;;  %v6911_v19 = vsub.f32 %v11557_v44, %v6881_v60  ;;  %v6910_v5 = vsub.f32 %v11547_v4, %v6878_v57  ;;  %6952 = vadd.xlane.f32.xlu1 %v6951_v56 }
 0x7a2   :  { %9904 = vpow2.f32 %v6929_v55 }
 0x7a3   :  { %v11630_v52 = vpop.eup %9896  ;;  %v6935_v42 = vmul.f32 1.442695, %v6911_v19  ;;  %v6933_v38 = vmul.f32 1.442695, %v6910_v5 }
 0x7a4   :  { %v6887_v21 = vpop.xlane.xlu1 %6886  ;;  %v6884_v49 = vpop.xlane.xlu0 %6883  ;;  %v6957_v53 = vsel %vm1459_vm6, %v11630_v52, 0.0 }
 0x7a5   :  { %9906 = vpow2.f32 %v6935_v42  ;;  %v6913_v22 = vsub.f32 %v11565_v36, %v6887_v21  ;;  %v6912_v24 = vsub.f32 %v11555_v11, %v6884_v49  ;;  %6958 = vadd.xlane.f32.xlu1 %v6957_v53 }
 0x7a6   :  { %9908 = vpow2.f32 %v6933_v38 }
 0x7a7   :  { %v11636_v44 = vpop.eup %9898  ;;  %v6939_v4 = vmul.f32 1.442695, %v6913_v22  ;;  %v6937_v0 = vmul.f32 1.442695, %v6912_v24 }
 0x7a8   :  { %v11638_v59 = vpop.eup %9900  ;;  %v6893_v3 = vpop.xlane.xlu1 %6892  ;;  %v6963_v28 = vsel %vm1459_vm6, %v11636_v44, 0.0 }
 0x7a9   :  { %v6890_v47 = vpop.xlane.xlu0 %6889  ;;  %9910 = vpow2.f32 %v6939_v4  ;;  %v6915_v48 = vsub.f32 %v11573_v46, %v6893_v3  ;;  %6964 = vadd.xlane.f32.xlu1 %v6963_v28  ;;  %v6960_v11 = vsel %vm1459_vm6, %v11638_v59, 0.0 }
 0x7aa   :  { %v6914_v36 = vsub.f32 %v11563_v6, %v6890_v47  ;;  %9912 = vpow2.f32 %v6937_v0  ;;  %6961 = vadd.xlane.f32.xlu0 %v6960_v11 }
 0x7ab   :  { %v11646_v9 = vpop.eup %9902  ;;  %v6943_v8 = vmul.f32 1.442695, %v6915_v48 }
 0x7ac   :  { %v6941_v51 = vmul.f32 1.442695, %v6914_v36  ;;  %v11648_v45 = vpop.eup %9904  ;;  %v6899_v54 = vpop.xlane.xlu1 %6898  ;;  %v6969_v7 = vsel %vm1459_vm6, %v11646_v9, 0.0 }
 0x7ad   :  { %v6896_v55 = vpop.xlane.xlu0 %6895  ;;  %9914 = vpow2.f32 %v6943_v8  ;;  %v6917_v6 = vsub.f32 %v11581_v35, %v6899_v54  ;;  %6970 = vadd.xlane.f32.xlu1 %v6969_v7  ;;  %v6966_v60 = vsel %vm1459_vm6, %v11648_v45, 0.0  ;;  %v12103_v54 = vld [vmem:[#allocation14_spill] sm:$0xff] }
 0x7ae   :  { %v6916_v46 = vsub.f32 %v11571_v17, %v6896_v55  ;;  %9916 = vpow2.f32 %v6941_v51  ;;  %6967 = vadd.xlane.f32.xlu0 %v6966_v60  ;;  %v12102_v51 = vld [vmem:[#allocation15_spill] sm:$0xff] }
 0x7af   :  { %v11656_v57 = vpop.eup %9906  ;;  %v6947_v56 = vmul.f32 1.442695, %v6917_v6 }
 0x7b0   :  { %v6945_v19 = vmul.f32 1.442695, %v6916_v46  ;;  %v11658_v5 = vpop.eup %9908  ;;  %v6975_v38 = vsel %vm1459_vm6, %v11656_v57, 0.0 }
 0x7b1   :  { %v6902_v42 = vpop.xlane.xlu0 %6901  ;;  %9918 = vpow2.f32 %v6947_v56  ;;  %6976 = vadd.xlane.f32.xlu1 %v6975_v38  ;;  %v6972_v17 = vsel %vm1459_vm6, %v11658_v5, 0.0  ;;  %v7423_v56 = vrot.slane %v11597_v34, 4 }
 0x7b2   :  { %v6918_v35 = vsub.f32 %v11579_v29, %v6902_v42  ;;  %9920 = vpow2.f32 %v6945_v19  ;;  %6973 = vadd.xlane.f32.xlu0 %v6972_v17 }
 0x7b3   :  { %v11665_v21 = vpop.eup %9910 }
 0x7b4   :  { %v6949_v49 = vmul.f32 1.442695, %v6918_v35  ;;  %v11667_v53 = vpop.eup %9912  ;;  %v6981_v22 = vsel %vm1459_vm6, %v11665_v21, 0.0  ;;  %v7579_v35 = vrot.slane %v11601_v10, 4  ;;  %v7813_v10 = vrot.slane %v11611_v39, 4 }
 0x7b5   :  { %6982 = vadd.xlane.f32.xlu1 %v6981_v22  ;;  %v6978_v24 = vsel %vm1459_vm6, %v11667_v53, 0.0 }
 0x7b6   :  { %9922 = vpow2.f32 %v6949_v49  ;;  %6979 = vadd.xlane.f32.xlu0 %v6978_v24  ;;  %v7735_v24 = vrot.slane %v11605_v18, 4 }
 0x7b7   :  { %v11673_v29 = vpop.eup %9914 }
 0x7b8   :  { %v11675_v4 = vpop.eup %9916  ;;  %v6987_v0 = vsel %vm1459_vm6, %v11673_v29, 0.0 }
 0x7b9   :  { %6988 = vadd.xlane.f32.xlu1 %v6987_v0  ;;  %v6984_v3 = vsel %vm1459_vm6, %v11675_v4, 0.0 }
 0x7ba   :  { %6985 = vadd.xlane.f32.xlu0 %v6984_v3 }
 0x7bb   :  { %v11681_v47 = vpop.eup %9918 }
 0x7bc   :  { %v11683_v28 = vpop.eup %9920  ;;  %v6993_v48 = vsel %vm1459_vm6, %v11681_v47, 0.0 }
 0x7bd   :  { %6994 = vadd.xlane.f32.xlu1 %v6993_v48  ;;  %v6990_v36 = vsel %vm1459_vm6, %v11683_v28, 0.0  ;;  %v7891_v48 = vrot.slane %v11609_v41, 4 }
 0x7be   :  { %6991 = vadd.xlane.f32.xlu0 %v6990_v36 }
 0x7c0   :  { %v11689_v11 = vpop.eup %9922 }
 0x7c1   :  { %v6996_v8 = vsel %vm1459_vm6, %v11689_v11, 0.0 }
 0x7c2   :  { %6997 = vadd.xlane.f32.xlu0 %v6996_v8 }
 0x7ce   :  { %8201 = vrot.lane.b32.xlu1 %v12102_v51, %s10016_s9 }
 0x7d2   :  { %8297 = vrot.lane.b32.xlu1 %v11497_v1, %s10017_s10 }
 0x7d6   :  { %8301 = vrot.lane.b32.xlu1 %v11501_v12, %s10017_s10 }
 0x7d8   :  { %8123 = vrot.lane.b32.xlu0 %v12103_v54, %s10016_s9 }
 0x7da   :  { %8305 = vrot.lane.b32.xlu1 %v11505_v30, %s10017_s10 }
 0x7dc   :  { %8295 = vrot.lane.b32.xlu0 %v11493_v32, %s10017_s10  ;;  %v11713_v32 = vpop.permute.xlu0 %7967 }
 0x7dd   :  { %v7969_v18 = vrot.slane %v11713_v32, 4 }
 0x7de   :  { %8309 = vrot.lane.b32.xlu1 %v11509_v61, %s10017_s10 }
 0x7e0   :  { %8299 = vrot.lane.b32.xlu0 %v11495_v25, %s10017_s10  ;;  %v11715_v25 = vpop.permute.xlu1 %8045 }
 0x7e1   :  { %v8047_v51 = vrot.slane %v11715_v25, 4 }
 0x7e2   :  { %8313 = vrot.lane.b32.xlu1 %v11513_v26, %s10017_s10  ;;  %v7267_v26 = vrot.slane %v11599_v23, 4 }
 0x7e4   :  { %8303 = vrot.lane.b32.xlu0 %v11499_v15, %s10017_s10 }
 0x7e6   :  { %8317 = vrot.lane.b32.xlu1 %v11517_v20, %s10017_s10 }
 0x7e8   :  { %8307 = vrot.lane.b32.xlu0 %v11503_v50, %s10017_s10 }
 0x7ea   :  { %8321 = vrot.lane.b32.xlu1 %v11519_v27, %s10017_s10  ;;  %v7189_v27 = vrot.slane %v11593_v58, 4  ;;  %v7345_v58 = vrot.slane %v11595_v2, 4  ;;  %v7501_v2 = vrot.slane %v11603_v14, 4 }
 0x7ec   :  { %8311 = vrot.lane.b32.xlu0 %v11507_v13, %s10017_s10 }
 0x7ee   :  { %8325 = vrot.lane.b32.xlu1 %v11521_v33, %s10017_s10 }
 0x7f0   :  { %8315 = vrot.lane.b32.xlu0 %v11511_v31, %s10017_s10 }
 0x7f4   :  { %8319 = vrot.lane.b32.xlu0 %v11515_v16, %s10017_s10 }
 0x7f8   :  { %8323 = vrot.lane.b32.xlu0 %v11523_v40, %s10017_s10 }
 0x82d   :  { %v6956_v1 = vpop.xlane.xlu0 %6955 }
 0x82e   :  { %v6953_v15 = vpop.xlane.xlu1 %6952  ;;  %9924 = vrcp.f32 %v6956_v1 }
 0x82f   :  { %9926 = vrcp.f32 %v6953_v15 }
 0x832   :  { %v6959_v12 = vpop.xlane.xlu1 %6958 }
 0x833   :  { %9928 = vrcp.f32 %v6959_v12 }
 0x836   :  { %v6965_v50 = vpop.xlane.xlu1 %6964 }
 0x837   :  { %9930 = vrcp.f32 %v6965_v50  ;;  %v6962_v30 = vpop.xlane.xlu0 %6961 }
 0x838   :  { %v9925_v13 = vpop.eup %9924  ;;  %9932 = vrcp.f32 %v6962_v30 }
 0x839   :  { %v9927_v61 = vpop.eup %9926  ;;  %v7016_v31 = vmul.f32 %v9925_v13, %v11620_v43 }
 0x83a   :  { %v7015_v16 = vmul.f32 %v9927_v61, %v11622_v63  ;;  %v6971_v20 = vpop.xlane.xlu1 %6970 }
 0x83b   :  { %9934 = vrcp.f32 %v6971_v20  ;;  %v6968_v33 = vpop.xlane.xlu0 %6967  ;;  %9606 = vmatmul.mubr.msk.f32.vlgmr.msra.gmra.mrb[104].mxu1 %vm1643_vm7, %v7016_v31 }
 0x83c   :  { %9936 = vrcp.f32 %v6968_v33  ;;  %9601 = vmatmul.mubr.msk.f32.vlgmr.msra.gmra.mrb[72].mxu0 %vm1643_vm7, %v7015_v16  ;;  %9614 = vmatpush3.msk.msra.mxu1 %vm1647_vm5, %v7267_v26 }
 0x83d   :  { %v9929_v40 = vpop.eup %9928  ;;  %9609 = vmatpush3.msk.msra.mxu0 %vm1647_vm5, %v7189_v27  ;;  %9610 = vmatprep.mubr.msk.f32.mxu0 %vm10008_vm2, %v12019_v62 }
 0x83e   :  { %v7017_v23 = vmul.f32 %v9929_v40, %v11630_v52  ;;  %v6977_v43 = vpop.xlane.xlu1 %6976  ;;  %9618 = vmatprep.subr.mxu0 %v12019_v62  ;;  %9615 = vmatprep.mubr.msk.f32.mxu1 %vm10008_vm2, %v12019_v62 }
 0x83f   :  { %9938 = vrcp.f32 %v6977_v43  ;;  %v6974_v63 = vpop.xlane.xlu0 %6973  ;;  %9623 = vmatprep.subr.mxu1 %v12019_v62 }
 0x840   :  { %9940 = vrcp.f32 %v6974_v63  ;;  %9611 = vmatmul.mubr.msk.f32.vlgmr.msra.gmra.mrb[74].mxu0 %vm1643_vm7, %v7017_v23 }
 0x841   :  { %v9931_v55 = vpop.eup %9930  ;;  %9619 = vmatpush3.msk.msra.mxu0 %vm1647_vm5, %v7345_v58  ;;  %9620 = vmatprep.mubr.msk.f32.mxu0 %vm10008_vm2, %v12019_v62 }
 0x842   :  { %v9933_v52 = vpop.eup %9932  ;;  %v7019_v7 = vmul.f32 %v9931_v55, %v11636_v44  ;;  %v6983_v6 = vpop.xlane.xlu1 %6982  ;;  %9628 = vmatprep.subr.mxu0 %v12019_v62 }
 0x843   :  { %v7018_v46 = vmul.f32 %v9933_v52, %v11638_v59  ;;  %9942 = vrcp.f32 %v6983_v6  ;;  %v6980_v60 = vpop.xlane.xlu0 %6979  ;;  %v7657_v59 = vrot.slane %v11607_v37, 4 }
 0x844   :  { %9944 = vrcp.f32 %v6980_v60  ;;  %9621 = vmatmul.mubr.msk.f32.vlgmr.msra.gmra.mrb[76].mxu0 %vm1643_vm7, %v7019_v7 }
 0x845   :  { %v9935_v19 = vpop.eup %9934  ;;  %9616 = vmatmul.mubr.msk.f32.vlgmr.msra.gmra.mrb[106].mxu1 %vm1643_vm7, %v7018_v46  ;;  %9629 = vmatpush3.msk.msra.mxu0 %vm1647_vm5, %v7501_v2 }
 0x846   :  { %v9937_v44 = vpop.eup %9936  ;;  %v7021_v42 = vmul.f32 %v9935_v19, %v11646_v9  ;;  %9624 = vmatpush3.msk.msra.mxu1 %vm1647_vm5, %v7423_v56  ;;  %v6989_v14 = vpop.xlane.xlu1 %6988  ;;  %9625 = vmatprep.mubr.msk.f32.mxu1 %vm10008_vm2, %v12019_v62 }
 0x847   :  { %v7020_v34 = vmul.f32 %v9937_v44, %v11648_v45  ;;  %9946 = vrcp.f32 %v6989_v14  ;;  %v6986_v38 = vpop.xlane.xlu0 %6985  ;;  %9630 = vmatprep.mubr.msk.f32.mxu0 %vm10008_vm2, %v12019_v62  ;;  %9633 = vmatprep.subr.mxu1 %v12019_v62 }
 0x848   :  { %9948 = vrcp.f32 %v6986_v38  ;;  %9638 = vmatprep.subr.mxu0 %v12019_v62  ;;  %9631 = vmatmul.mubr.msk.f32.vlgmr.msra.gmra.mrb[78].mxu0 %vm1643_vm7, %v7021_v42  ;;  %v8610_v38 = vld [vmem:[#allocation2 + $0x8] sm:$0xff] }
 0x849   :  { %v9939_v9 = vpop.eup %9938  ;;  %9626 = vmatmul.mubr.msk.f32.vlgmr.msra.gmra.mrb[108].mxu1 %vm1643_vm7, %v7020_v34  ;;  %9639 = vmatpush3.msk.msra.mxu0 %vm1647_vm5, %v7657_v59 }
 0x84a   :  { %v9941_v37 = vpop.eup %9940  ;;  %v7023_v45 = vmul.f32 %v9939_v9, %v11656_v57  ;;  %9634 = vmatpush3.msk.msra.mxu1 %vm1647_vm5, %v7579_v35  ;;  %v6995_v17 = vpop.xlane.xlu1 %6994  ;;  %9635 = vmatprep.mubr.msk.f32.mxu1 %vm10008_vm2, %v12019_v62  ;;  %v8612_v35 = vld [vmem:[#allocation2 + $0x18] sm:$0xff]  ;;  %v8609_v9 = vld [vmem:[#allocation2] sm:$0xff] }
 0x84b   :  { %v7022_v49 = vmul.f32 %v9941_v37, %v11658_v5  ;;  %9950 = vrcp.f32 %v6995_v17  ;;  %v6992_v22 = vpop.xlane.xlu0 %6991  ;;  %9640 = vmatprep.mubr.msk.f32.mxu0 %vm10008_vm2, %v12019_v62  ;;  %9643 = vmatprep.subr.mxu1 %v12019_v62  ;;  %v9678_v37 = vpack.c.bf16 %v8612_v35, %v8610_v38  ;;  %v8614_v17 = vld [vmem:[#allocation2 + $0x28] sm:$0xff] }
 0x84c   :  { %9952 = vrcp.f32 %v6992_v22  ;;  %9648 = vmatprep.subr.mxu0 %v12019_v62  ;;  %9641 = vmatmul.mubr.msk.f32.vlgmr.msra.gmra.mrb[80].mxu0 %vm1643_vm7, %v7023_v45  ;;  %v8611_v45 = vld [vmem:[#allocation2 + $0x10] sm:$0xff] }
 0x84d   :  { %v9943_v57 = vpop.eup %9942  ;;  %9636 = vmatmul.mubr.msk.f32.vlgmr.msra.gmra.mrb[110].mxu1 %vm1643_vm7, %v7022_v49  ;;  %9649 = vmatpush3.msk.msra.mxu0 %vm1647_vm5, %v7813_v10  ;;  %v8616_v10 = vld [vmem:[#allocation2 + $0x38] sm:$0xff]  ;;  %v9680_v49 = vpack.c.bf16 %v8611_v45, %v8609_v9 }
 0x84e   :  { %v9945_v39 = vpop.eup %9944  ;;  %v7025_v5 = vmul.f32 %v9943_v57, %v11665_v21  ;;  %9644 = vmatpush3.msk.msra.mxu1 %vm1647_vm5, %v7735_v24  ;;  %9645 = vmatprep.mubr.msk.f32.mxu1 %vm10008_vm2, %v12019_v62  ;;  %v8202_v32 = vpop.permute.xlu1 %8201  ;;  %v9682_v22 = vpack.c.bf16 %v8616_v10, %v8614_v17  ;;  %v8613_v24 = vld [vmem:[#allocation2 + $0x20] sm:$0xff]  ;;  %v8615_v57 = vld [vmem:[#allocation2 + $0x30] sm:$0xff] }
 0x84f   :  { %v7024_v0 = vmul.f32 %v9945_v39, %v11667_v53  ;;  %v6998_v3 = vpop.xlane.xlu0 %6997  ;;  %9650 = vmatprep.mubr.msk.f32.mxu0 %vm10008_vm2, %v12019_v62  ;;  %9653 = vmatprep.subr.mxu1 %v12019_v62  ;;  %v8203_v15 = vrot.slane %v8202_v32, 4  ;;  %v8618_v39 = vld [vmem:[#allocation2 + $0x48] sm:$0xff] }
 0x850   :  { %9954 = vrcp.f32 %v6998_v3  ;;  %9658 = vmatprep.subr.mxu0 %v12019_v62  ;;  %9651 = vmatmul.mubr.msk.f32.vlgmr.msra.gmra.mrb[82].mxu0 %vm1643_vm7, %v7025_v5  ;;  %v8620_v5 = vld [vmem:[#allocation2 + $0x58] sm:$0xff]  ;;  %v8617_v3 = vld [vmem:[#allocation2 + $0x40] sm:$0xff] }
 0x851   :  { %v9947_v21 = vpop.eup %9946  ;;  %9646 = vmatmul.mubr.msk.f32.vlgmr.msra.gmra.mrb[112].mxu1 %vm1643_vm7, %v7024_v0  ;;  %9659 = vmatpush3.msk.msra.mxu0 %vm1647_vm5, %v7969_v18  ;;  %v9684_v18 = vpack.c.bf16 %v8615_v57, %v8613_v24  ;;  %v9686_v0 = vpack.c.bf16 %v8620_v5, %v8618_v39 }
 0x852   :  { %v9949_v36 = vpop.eup %9948  ;;  %v7027_v53 = vmul.f32 %v9947_v21, %v11673_v29  ;;  %9654 = vmatpush3.msk.msra.mxu1 %vm1647_vm5, %v7891_v48  ;;  %9655 = vmatprep.mubr.msk.f32.mxu1 %vm10008_vm2, %v12019_v62  ;;  %v8619_v48 = vld [vmem:[#allocation2 + $0x50] sm:$0xff]  ;;  %v8622_v21 = vld [vmem:[#allocation2 + $0x68] sm:$0xff] }
 0x853   :  { %v7026_v41 = vmul.f32 %v9949_v36, %v11675_v4  ;;  %v8124_v8 = vpop.permute.xlu0 %8123  ;;  %9660 = vmatprep.mubr.msk.f32.mxu0 %vm10008_vm2, %v12019_v62  ;;  %9663 = vmatprep.subr.mxu1 %v12019_v62  ;;  %v8624_v36 = vld [vmem:[#allocation2 + $0x78] sm:$0xff] }
 0x854   :  { %v8125_v54 = vrot.slane %v8124_v8, 4  ;;  %9661 = vmatmul.mubr.msk.f32.vlgmr.msra.gmra.mrb[84].mxu0 %vm1643_vm7, %v7027_v53  ;;  %9668 = vmatprep.subr.mxu0 %v12019_v62  ;;  %v9688_v53 = vpack.c.bf16 %v8619_v48, %v8617_v3  ;;  %v8621_v8 = vld [vmem:[#allocation2 + $0x60] sm:$0xff]  ;;  %v12104_v3 = vld [vmem:[#allocation17_spill] sm:$0xff] }
 0x855   :  { %v9951_v29 = vpop.eup %9950  ;;  %9656 = vmatmul.mubr.msk.f32.vlgmr.msra.gmra.mrb[114].mxu1 %vm1643_vm7, %v7026_v41  ;;  %9670 = vmatprep.mubr.msk.f32.mxu0 %vm10008_vm2, %v12019_v62  ;;  %v9690_v41 = vpack.c.bf16 %v8624_v36, %v8622_v21  ;;  %v12105_v21 = vld [vmem:[#allocation19_spill] sm:$0xff] }
 0x856   :  { %v9953_v4 = vpop.eup %9952  ;;  %v7029_v1 = vmul.f32 %v9951_v29, %v11681_v47  ;;  %9664 = vmatpush3.msk.msra.mxu1 %vm1647_vm5, %v8047_v51  ;;  %9669 = vmatpush3.msk.msra.mxu0 %vm1647_vm5, %v8125_v54  ;;  %v8623_v51 = vld [vmem:[#allocation2 + $0x70] sm:$0xff]  ;;  %v8626_v54 = vld [vmem:[#allocation2 + $0x88] sm:$0xff]  ;;  %v8628_v29 = vld [vmem:[#allocation2 + $0x98] sm:$0xff] }
 0x857   :  { %v7028_v25 = vmul.f32 %v9953_v4, %v11683_v28  ;;  %9665 = vmatprep.mubr.msk.f32.mxu1 %vm10008_vm2, %v12019_v62  ;;  %9673 = vmatprep.subr.mxu1 %v12019_v62  ;;  %v9692_v32 = vpack.c.bf16 %v8623_v51, %v8621_v8  ;;  %v9694_v4 = vpack.c.bf16 %v8628_v29, %v8626_v54 }
 0x858   :  { %9671 = vmatmul.mubr.msk.f32.vlgmr.msra.gmra.mrb[86].mxu0 %vm1643_vm7, %v7029_v1  ;;  %9679 = vmatprep.subr.bf16.mxu0 %v9678_v37  ;;  %v8625_v1 = vld [vmem:[#allocation2 + $0x80] sm:$0xff] }
 0x859   :  { %9666 = vmatmul.mubr.msk.f32.vlgmr.msra.gmra.mrb[116].mxu1 %vm1643_vm7, %v7028_v25  ;;  %9681 = vmatpush1.bf16.msra.mxu0 %v9680_v49  ;;  %v8627_v25 = vld [vmem:[#allocation2 + $0x90] sm:$0xff] }
 0x85a   :  { %v9955_v12 = vpop.eup %9954  ;;  %9674 = vmatpush3.msk.msra.mxu1 %vm1647_vm5, %v8203_v15  ;;  %9675 = vmatprep.mubr.msk.f32.mxu1 %vm10008_vm2, %v12019_v62  ;;  %v8630_v15 = vld [vmem:[#allocation2 + $0xa8] sm:$0xff] }
 0x85b   :  { %v7030_v47 = vmul.f32 %v9955_v12, %v11689_v11  ;;  %9683 = vmatprep.subr.bf16.mxu0 %v9682_v22  ;;  %v8632_v12 = vld [vmem:[#allocation2 + $0xb8] sm:$0xff] }
 0x85d   :  { %9676 = vmatmul.mubr.msk.f32.vlgmr.msra.gmra.mrb[118].mxu1 %vm1643_vm7, %v7030_v47  ;;  %9685 = vmatpush1.bf16.msra.mxu0 %v9684_v18  ;;  %v9696_v47 = vpack.c.bf16 %v8627_v25, %v8625_v1  ;;  %v10019_v18 = vmov 1983009808   ;;  %v12107_v25 = vld [vmem:[#allocation18_spill] sm:$0xff] }
 0x85e   :  { %9687 = vmatprep.subr.bf16.mxu0 %v9686_v0  ;;  %v8442_v0 = vunpack.c.l.s4 %v10019_v18  ;;  %v8656_v18 = vld [vmem:[#allocation2 + $0x178] sm:$0xff] }
 0x860   :  { %v8443_v51 = vunpack.c.0.s8 %v8442_v0  ;;  %v8653_v0 = vld [vmem:[#allocation2 + $0x160] sm:$0xff] }
 0x861   :  { %9689 = vmatpush1.bf16.msra.mxu0 %v9688_v53 }
 0x862   :  { %9691 = vmatprep.subr.bf16.mxu0 %v9690_v41 }
 0x865   :  { %9693 = vmatpush1.bf16.msra.mxu0 %v9692_v32 }
 0x866   :  { %9695 = vmatprep.subr.bf16.mxu0 %v9694_v4  ;;  %v12106_v4 = vld [vmem:[#allocation16_spill] sm:$0xff] }
 0x869   :  { %9697 = vmatpush1.bf16.msra.mxu0 %v9696_v47 }
 0x90e   :  { %v7183_v28 = vpop.f32.mrb[104].mxu1 }
 0x90f   :  { %v7105_v50 = vpop.f32.mrb[72].mxu0  ;;  %8361 = vrot.lane.b32.xlu1 %v7183_v28, %s10018_s11  ;;  %v9607_v30 = vpop.f32.mrb[105].mxu1  ;;  %v9698_v28 = vpack.c.bf16 %v8632_v12, %v8630_v15  ;;  %v12108_v12 = vld [vmem:[#allocation8_spill] sm:$0xff] }
 0x910   :  { %v9602_v13 = vpop.f32.mrb[73].mxu0  ;;  %8359 = vrot.lane.b32.xlu0 %v7105_v50, %s10018_s11  ;;  %v8629_v50 = vld [vmem:[#allocation2 + $0xa0] sm:$0xff]  ;;  %v8631_v30 = vld [vmem:[#allocation2 + $0xb0] sm:$0xff]  ;;  %v11856_v47 = vsub.s32 %v8443_v51, %v12108_v12 }
 0x911   :  { %v8634_v13 = vld [vmem:[#allocation2 + $0xc8] sm:$0xff]  ;;  %9699 = vmatprep.subr.bf16.mxu0 %v9698_v28 }
 0x913   :  { %v7261_v61 = vpop.f32.mrb[74].mxu0 }
 0x914   :  { %v9612_v31 = vpop.f32.mrb[75].mxu0  ;;  %8363 = vrot.lane.b32.xlu0 %v7261_v61, %s10018_s11  ;;  %v8636_v61 = vld [vmem:[#allocation2 + $0xd8] sm:$0xff] }
 0x915   :  { %v9700_v31 = vpack.c.bf16 %v8631_v30, %v8629_v50 }
 0x917   :  { %v7417_v26 = vpop.f32.mrb[76].mxu0  ;;  %9701 = vmatpush1.bf16.msra.mxu0 %v9700_v31 }
 0x918   :  { %v7339_v16 = vpop.f32.mrb[106].mxu1  ;;  %v9622_v62 = vpop.f32.mrb[77].mxu0  ;;  %8367 = vrot.lane.b32.xlu0 %v7417_v26, %s10018_s11  ;;  %v9702_v26 = vpack.c.bf16 %v8636_v61, %v8634_v13  ;;  %v12109_v61 = vld [vmem:[#allocation9_spill] sm:$0xff] }
 0x919   :  { %8365 = vrot.lane.b32.xlu1 %v7339_v16, %s10018_s11  ;;  %v9617_v11 = vpop.f32.mrb[107].mxu1  ;;  %v8633_v16 = vld [vmem:[#allocation2 + $0xc0] sm:$0xff]  ;;  %v8635_v62 = vld [vmem:[#allocation2 + $0xd0] sm:$0xff] }
 0x91a   :  { %v8638_v11 = vld [vmem:[#allocation2 + $0xe8] sm:$0xff]  ;;  %9703 = vmatprep.subr.bf16.mxu0 %v9702_v26  ;;  %v12110_v26 = vld [vmem:[#allocation20_spill] sm:$0xff] }
 0x91b   :  { %v7573_v20 = vpop.f32.mrb[78].mxu0 }
 0x91c   :  { %v7495_v27 = vpop.f32.mrb[108].mxu1  ;;  %v9632_v33 = vpop.f32.mrb[79].mxu0  ;;  %8371 = vrot.lane.b32.xlu0 %v7573_v20, %s10018_s11  ;;  %v8640_v20 = vld [vmem:[#allocation2 + $0xf8] sm:$0xff] }
 0x91d   :  { %8369 = vrot.lane.b32.xlu1 %v7495_v27, %s10018_s11  ;;  %v9627_v40 = vpop.f32.mrb[109].mxu1  ;;  %v9704_v27 = vpack.c.bf16 %v8635_v62, %v8633_v16  ;;  %v9706_v33 = vpack.c.bf16 %v8640_v20, %v8638_v11  ;;  %v10020_v62 = vmov 1934713408  }
 0x91e   :  { %v8637_v40 = vld [vmem:[#allocation2 + $0xe0] sm:$0xff]  ;;  %v8475_v11 = vunpack.c.l.s4 %v10020_v62  ;;  %v12116_v62 = vld [vmem:[#allocation27_spill] sm:$0xff] }
 0x91f   :  { %v7729_v23 = vpop.f32.mrb[80].mxu0  ;;  %9705 = vmatpush1.bf16.msra.mxu0 %v9704_v27 }
 0x920   :  { %v7651_v43 = vpop.f32.mrb[110].mxu1  ;;  %v9642_v58 = vpop.f32.mrb[81].mxu0  ;;  %8375 = vrot.lane.b32.xlu0 %v7729_v23, %s10018_s11  ;;  %v8639_v23 = vld [vmem:[#allocation2 + $0xf0] sm:$0xff]  ;;  %9707 = vmatprep.subr.bf16.mxu0 %v9706_v33 }
 0x921   :  { %8373 = vrot.lane.b32.xlu1 %v7651_v43, %s10018_s11  ;;  %v9637_v63 = vpop.f32.mrb[111].mxu1  ;;  %v8642_v43 = vld [vmem:[#allocation2 + $0x108] sm:$0xff]  ;;  %v8644_v58 = vld [vmem:[#allocation2 + $0x118] sm:$0xff] }
 0x922   :  { %v9708_v63 = vpack.c.bf16 %v8639_v23, %v8637_v40 }
 0x923   :  { %v7885_v55 = vpop.f32.mrb[82].mxu0 }
 0x924   :  { %v7807_v52 = vpop.f32.mrb[112].mxu1  ;;  %v9652_v7 = vpop.f32.mrb[83].mxu0  ;;  %8379 = vrot.lane.b32.xlu0 %v7885_v55, %s10018_s11  ;;  %v9710_v55 = vpack.c.bf16 %v8644_v58, %v8642_v43  ;;  %9709 = vmatpush1.bf16.msra.mxu0 %v9708_v63 }
 0x925   :  { %8377 = vrot.lane.b32.xlu1 %v7807_v52, %s10018_s11  ;;  %v9647_v6 = vpop.f32.mrb[113].mxu1  ;;  %v8641_v52 = vld [vmem:[#allocation2 + $0x100] sm:$0xff]  ;;  %v8643_v7 = vld [vmem:[#allocation2 + $0x110] sm:$0xff] }
 0x926   :  { %v8646_v6 = vld [vmem:[#allocation2 + $0x128] sm:$0xff]  ;;  %9711 = vmatprep.subr.bf16.mxu0 %v9710_v55 }
 0x927   :  { %v8041_v2 = vpop.f32.mrb[84].mxu0 }
 0x928   :  { %v7963_v46 = vpop.f32.mrb[114].mxu1  ;;  %8383 = vrot.lane.b32.xlu0 %v8041_v2, %s10018_s11  ;;  %v9662_v60 = vpop.f32.mrb[85].mxu0  ;;  %v8648_v2 = vld [vmem:[#allocation2 + $0x138] sm:$0xff] }
 0x929   :  { %8381 = vrot.lane.b32.xlu1 %v7963_v46, %s10018_s11  ;;  %v9657_v56 = vpop.f32.mrb[115].mxu1  ;;  %v8296_v46 = vpop.permute.xlu0 %8295  ;;  %v9712_v60 = vpack.c.bf16 %v8643_v7, %v8641_v52  ;;  %v8476_v52 = vunpack.c.0.s8 %v8475_v11 }
 0x92a   :  { %v9714_v56 = vpack.c.bf16 %v8648_v2, %v8646_v6  ;;  %v8407_v48 = vsel %vm244_vm3, %v12104_v3, %v8296_v46  ;;  %v8650_v6 = vld [vmem:[#allocation2 + $0x148] sm:$0xff]  ;;  %v8652_v2 = vld [vmem:[#allocation2 + $0x158] sm:$0xff]  ;;  %v8655_v3 = vld [vmem:[#allocation2 + $0x170] sm:$0xff] }
 0x92b   :  { %v8197_v19 = vpop.f32.mrb[86].mxu0  ;;  %9713 = vmatpush1.bf16.msra.mxu0 %v9712_v60  ;;  %v12111_v46 = vld [vmem:[#allocation21_spill] sm:$0xff]  ;;  %v11880_v51 = vsub.s32 %v8476_v52, %v12108_v12  ;;  %v8663_v52 = vld [vmem:[#allocation2 + $0x1b0] sm:$0xff] }
 0x92c   :  { %v8119_v44 = vpop.f32.mrb[116].mxu1  ;;  %8387 = vrot.lane.b32.xlu0 %v8197_v19, %s10018_s11  ;;  %v9672_v42 = vpop.f32.mrb[87].mxu0  ;;  %v8645_v19 = vld [vmem:[#allocation2 + $0x120] sm:$0xff]  ;;  %9715 = vmatprep.subr.bf16.mxu0 %v9714_v56  ;;  %v12112_v56 = vld [vmem:[#allocation10_spill] sm:$0xff] }
 0x92d   :  { %8385 = vrot.lane.b32.xlu1 %v8119_v44, %s10018_s11  ;;  %v9667_v14 = vpop.f32.mrb[117].mxu1  ;;  %v8647_v44 = vld [vmem:[#allocation2 + $0x130] sm:$0xff]  ;;  %v8298_v42 = vpop.permute.xlu1 %8297 }
 0x92e   :  { %v9716_v14 = vpack.c.bf16 %v8647_v44, %v8645_v19  ;;  %v8408_v1 = vsel %vm244_vm3, %v12106_v4, %v8298_v42  ;;  %v9718_v42 = vpack.c.bf16 %v8652_v2, %v8650_v6 }
 0x930   :  { %v8275_v59 = vpop.f32.mrb[118].mxu1  ;;  %9717 = vmatpush1.bf16.msra.mxu0 %v9716_v14  ;;  %v8649_v14 = vld [vmem:[#allocation2 + $0x140] sm:$0xff] }
 0x931   :  { %8389 = vrot.lane.b32.xlu1 %v8275_v59, %s10018_s11  ;;  %v9677_v34 = vpop.f32.mrb[119].mxu1  ;;  %v8300_v59 = vpop.permute.xlu0 %8299  ;;  %9719 = vmatprep.subr.bf16.mxu0 %v9718_v42 }
 0x932   :  { %v8302_v34 = vpop.permute.xlu1 %8301  ;;  %v8409_v36 = vsel %vm244_vm3, %v12105_v21, %v8300_v59  ;;  %v8651_v59 = vld [vmem:[#allocation2 + $0x150] sm:$0xff] }
 0x933   :  { %v8410_v15 = vsel %vm244_vm3, %v12107_v25, %v8302_v34  ;;  %v8654_v34 = vld [vmem:[#allocation2 + $0x168] sm:$0xff] }
 0x935   :  { %v8304_v38 = vpop.permute.xlu0 %8303 }
 0x936   :  { %v8306_v35 = vpop.permute.xlu1 %8305  ;;  %v8411_v31 = vsel %vm244_vm3, %v12109_v61, %v8304_v38  ;;  %v8662_v61 = vld [vmem:[#allocation2 + $0x1a8] sm:$0xff] }
 0x937   :  { %v8412_v60 = vsel %vm244_vm3, %v12111_v46, %v8306_v35 }
 0x939   :  { %v8308_v9 = vpop.permute.xlu0 %8307 }
 0x93a   :  { %v8310_v37 = vpop.permute.xlu1 %8309  ;;  %v8413_v16 = vsel %vm244_vm3, %v12110_v26, %v8308_v9  ;;  %v12115_v26 = vld [vmem:[#allocation25_spill] sm:$0xff] }
 0x93b   :  { %v8414_v19 = vsel %vm244_vm3, %v12112_v56, %v8310_v37  ;;  %v8658_v37 = vld [vmem:[#allocation2 + $0x188] sm:$0xff] }
 0x93d   :  { %v8312_v45 = vpop.permute.xlu0 %8311 }
 0x93e   :  { %v11831_v17 = vpop.permute.xlu1 %8313 }
 0x941   :  { %v11833_v10 = vpop.permute.xlu0 %8315 }
 0x942   :  { %v11835_v49 = vpop.permute.xlu1 %8317 }
 0x943   :  { %v8418_v11 = vsel %vm244_vm3, %v12116_v62, %v11835_v49 }
 0x945   :  { %v11837_v22 = vpop.permute.xlu0 %8319 }
 0x946   :  { %v11839_v24 = vpop.permute.xlu1 %8321 }
 0x949   :  { %v11841_v57 = vpop.permute.xlu0 %8323 }
 0x94a   :  { %v11843_v5 = vpop.permute.xlu1 %8325 }
 0x981   :  { %v8362_v41 = vpop.permute.xlu1 %8361 }
 0x982   :  { %v8360_v39 = vpop.permute.xlu0 %8359  ;;  %v8425_v50 = vsel %vm8423_vm8, %v8408_v1, %v8362_v41  ;;  %v12114_v41 = vld [vmem:[#allocation22_spill] sm:$0xff] }
 0x983   :  { %v8424_v8 = vsel %vm8423_vm8, %v8407_v48, %v8360_v39  ;;  %v9720_v39 = vpack.c.bf16 %v8651_v59, %v8649_v14  ;;  %v12113_v48 = vld [vmem:[#allocation23_spill] sm:$0xff] }
 0x984   :  { %v8415_v21 = vsel %vm244_vm3, %v12113_v48, %v8312_v45  ;;  %v8668_v48 = vld [vmem:[#allocation2 + $0x1d8] sm:$0xff] }
 0x985   :  { %9721 = vmatpush1.bf16.msra.mxu0 %v9720_v39 }
 0x986   :  { %v8364_v53 = vpop.permute.xlu0 %8363 }
 0x987   :  { %v8426_v54 = vsel %vm8423_vm8, %v8409_v36, %v8364_v53  ;;  %v9722_v36 = vpack.c.bf16 %v8656_v18, %v8654_v34  ;;  %v8660_v53 = vld [vmem:[#allocation2 + $0x198] sm:$0xff] }
 0x988   :  { %v8440_v29 = vcombine.low %v8424_v8, %v8426_v54  ;;  %v8417_v8 = vsel %vm244_vm3, %v12114_v41, %v11833_v10 }
 0x989   :  { %9723 = vmatprep.subr.bf16.mxu0 %v9722_v36  ;;  %v12120_v36 = vld [vmem:[#allocation31_spill] sm:$0xff] }
 0x98a   :  { %v8368_v32 = vpop.permute.xlu0 %8367  ;;  %v8447_v27 = vrot.slane %v8440_v29, %v11856_v47 }
 0x98b   :  { %v8366_v28 = vpop.permute.xlu1 %8365  ;;  %v8428_v40 = vsel %vm8423_vm8, %v8411_v31, %v8368_v32  ;;  %v9724_v32 = vpack.c.bf16 %v8655_v3, %v8653_v0  ;;  %v8664_v31 = vld [vmem:[#allocation2 + $0x1b8] sm:$0xff]  ;;  %v8666_v3 = vld [vmem:[#allocation2 + $0x1c8] sm:$0xff] }
 0x98c   :  { %v8427_v30 = vsel %vm8423_vm8, %v8410_v15, %v8366_v28  ;;  %v9726_v15 = vpack.c.bf16 %v8660_v53, %v8658_v37  ;;  %v8657_v28 = vld [vmem:[#allocation2 + $0x180] sm:$0xff]  ;;  %v9730_v2 = vpack.c.bf16 %v8664_v31, %v8662_v61  ;;  %v8422_v37 = vsel %vm244_vm3, %v12120_v36, %v11843_v5 }
 0x98d   :  { %v8448_v13 = vcombine.low %v8425_v50, %v8427_v30  ;;  %v8659_v50 = vld [vmem:[#allocation2 + $0x190] sm:$0xff]  ;;  %9725 = vmatpush1.bf16.msra.mxu0 %v9724_v32  ;;  %v9734_v41 = vpack.c.bf16 %v8668_v48, %v8666_v3 }
 0x98e   :  { %v8372_v20 = vpop.permute.xlu0 %8371  ;;  %9727 = vmatprep.subr.bf16.mxu0 %v9726_v15 }
 0x98f   :  { %v8455_v33 = vrot.slane %v8448_v13, %v11856_v47  ;;  %v8370_v23 = vpop.permute.xlu1 %8369  ;;  %v8430_v43 = vsel %vm8423_vm8, %v8413_v16, %v8372_v20  ;;  %v8416_v16 = vsel %vm244_vm3, %v12115_v26, %v11831_v17  ;;  %v8661_v17 = vld [vmem:[#allocation2 + $0x1a0] sm:$0xff] }
 0x990   :  { %v8456_v58 = vcombine.low %v8428_v40, %v8430_v43  ;;  %v8429_v38 = vsel %vm8423_vm8, %v8412_v60, %v8370_v23 }
 0x991   :  { %v8472_v63 = vcombine.low %v8447_v27, %v8455_v33  ;;  %v8473_v55 = vcombine.high %v8447_v27, %v8455_v33  ;;  %v9728_v27 = vpack.c.bf16 %v8659_v50, %v8657_v28 }
 0x992   :  { %v8376_v7 = vpop.permute.xlu0 %8375  ;;  %v8463_v54 = vrot.slane %v8456_v58, %v11856_v47 }
 0x993   :  { %v8374_v44 = vpop.permute.xlu1 %8373  ;;  %v8432_v45 = vsel %vm8423_vm8, %v8415_v21, %v8376_v7  ;;  %v11893_v33 = vrot.slane %v8472_v63, %v11880_v51  ;;  %v8487_v40 = vrot.slane %v8473_v55, %v11880_v51  ;;  %v12117_v7 = vld [vmem:[#allocation24_spill] sm:$0xff]  ;;  %9729 = vmatpush1.bf16.msra.mxu0 %v9728_v27  ;;  %v12119_v21 = vld [vmem:[#allocation11_spill] sm:$0xff] }
 0x994   :  { %v8431_v9 = vsel %vm8423_vm8, %v8414_v19, %v8374_v44  ;;  %v8419_v49 = vsel %vm244_vm3, %v12117_v7, %v11837_v22  ;;  %v12118_v19 = vld [vmem:[#allocation26_spill] sm:$0xff]  ;;  %v9732_v22 = vpack.c.bf16 %v8663_v52, %v8661_v17  ;;  %9731 = vmatprep.subr.bf16.mxu0 %v9730_v2  ;;  %v8669_v52 = vld [vmem:[%s11962_s4] sm:$0x3]  ;;  %v12121_v7 = vsub.s32 0, %v12108_v12  ;;  %s9978_s4 = scalar_lea.vmem %s8775_s16, 512 }
 0x995   :  { %v8464_v35 = vcombine.low %v8429_v38, %v8431_v9  ;;  %v8421_v44 = vsel %vm244_vm3, %v12118_v19, %v11841_v57  ;;  %p9979_p8 = scmp.ne.s32.totalorder %s8775_s16, %s9978_s4  ;;  %p9984_p10 = scmp.lt.s32.totalorder %s9978_s4, %s9978_s4 }
 0x996   :  { %v8380_v29 = vpop.permute.xlu0 %8379 }
 0x997   :  { %v8471_v4 = vrot.slane %v8464_v35, %v11856_v47  ;;  %v8378_v1 = vpop.permute.xlu1 %8377  ;;  %v8434_v25 = vsel %vm8423_vm8, %v8417_v8, %v8380_v29  ;;  %9733 = vmatpush1.bf16.msra.mxu0 %v9732_v22  ;;  %v8420_v35 = vsel %vm244_vm3, %v12119_v21, %v11839_v24  ;;  %v8665_v8 = vld [vmem:[#allocation2 + $0x1c0] sm:$0xff]  ;;  %p9985_p11 = por %p9984_p10, %p9983_p9 }
 0x998   :  { %v8508_v10 = vcombine.low %v8432_v45, %v8434_v25  ;;  %v8433_v6 = vsel %vm8423_vm8, %v8416_v16, %v8378_v1  ;;  %9735 = vmatprep.subr.bf16.mxu0 %v9734_v41 }
 0x999   :  { %v8488_v30 = vcombine.low %v8463_v54, %v8471_v4  ;;  %v8489_v13 = vcombine.high %v8463_v54, %v8471_v4  ;;  %v8667_v54 = vld [vmem:[#allocation2 + $0x1d0] sm:$0xff]  ;;  %p9986_p12 = pnand %p9985_p11, %p9979_p8 }
 0x99a   :  { %v8384_v20 = vpop.permute.xlu0 %8383  ;;  %v8515_v42 = vrot.slane %v8508_v10, %v11856_v47  ;;  %v9736_v4 = vpack.c.bf16 %v8667_v54, %v8665_v8 }
 0x99b   :  { %v11897_v23 = vrot.slane %v8488_v30, %v11880_v51  ;;  %v8503_v43 = vrot.slane %v8489_v13, %v11880_v51  ;;  %v8382_v58 = vpop.permute.xlu1 %8381  ;;  %v8436_v38 = vsel %vm8423_vm8, %v8419_v49, %v8384_v20  ;;  %v8674_v49 = vrot.slane %v8669_v52, %v12121_v7 }
 0x99c   :  { %v8435_v63 = vsel %vm8423_vm8, %v8418_v11, %v8382_v58  ;;  %9737 = vmatpush1.bf16.msra.mxu0 %v9736_v4 }
 0x99d   :  { %v8516_v46 = vcombine.low %v8433_v6, %v8435_v63  ;;  %v8507_v55 = vcombine.high %v8487_v40, %v8503_v43  ;;  %v8506_v60 = vcombine.low %v8487_v40, %v8503_v43  ;;  %v8505_v56 = vcombine.high %v11893_v33, %v11897_v23 }
 0x99e   :  { %v8388_v14 = vpop.permute.xlu0 %8387  ;;  %v8504_v59 = vcombine.low %v11893_v33, %v11897_v23  ;;  %v12122_v6 = vsub.s32 1, %v12108_v12 }
 0x99f   :  { %v8523_v34 = vrot.slane %v8516_v46, %v11856_v47  ;;  %v8386_v9 = vpop.permute.xlu1 %8385  ;;  %8594 = vrot.lane.b32.xlu0 %v8507_v55, %s10021_s12  ;;  %8586 = vrot.lane.b32.xlu1 %v8506_v60, %s10022_s3  ;;  %v8438_v57 = vsel %vm8423_vm8, %v8421_v44, %v8388_v14 }
 0x9a0   :  { %v8524_v39 = vcombine.low %v8436_v38, %v8438_v57  ;;  %v8437_v29 = vsel %vm8423_vm8, %v8420_v35, %v8386_v9  ;;  %v8678_v63 = vrot.slane %v8669_v52, %v12122_v6 }
 0x9a1   :  { %v8540_v18 = vcombine.low %v8515_v42, %v8523_v34  ;;  %v8541_v0 = vcombine.high %v8515_v42, %v8523_v34 }
 0x9a2   :  { %v8531_v1 = vrot.slane %v8524_v39, %v11856_v47 }
 0x9a3   :  { %v8390_v53 = vpop.permute.xlu1 %8389  ;;  %v8548_v5 = vrot.slane %v8540_v18, %v11880_v51  ;;  %v8555_v28 = vrot.slane %v8541_v0, %v11880_v51 }
 0x9a4   :  { %v8439_v32 = vsel %vm8423_vm8, %v8422_v37, %v8390_v53 }
 0x9a5   :  { %v8532_v45 = vcombine.low %v8437_v29, %v8439_v32 }
 0x9a7   :  { %v8539_v24 = vrot.slane %v8532_v45, %v11856_v47 }
 0x9a9   :  { %v8556_v25 = vcombine.low %v8531_v1, %v8539_v24  ;;  %v8557_v15 = vcombine.high %v8531_v1, %v8539_v24 }
 0x9ab   :  { %v8564_v50 = vrot.slane %v8556_v25, %v11880_v51  ;;  %v8571_v10 = vrot.slane %v8557_v15, %v11880_v51 }
 0x9ad   :  { %v8574_v30 = vcombine.low %v8555_v28, %v8571_v10  ;;  %v8573_v13 = vcombine.high %v8548_v5, %v8564_v50  ;;  %v8575_v61 = vcombine.high %v8555_v28, %v8571_v10  ;;  %v8572_v31 = vcombine.low %v8548_v5, %v8564_v50 }
 0x9af   :  { %8588 = vrot.lane.b32.xlu1 %v8574_v30, %s10022_s3  ;;  %v9759_v26 = vpack.i.bf16 %v8573_v13, %v8505_v56 }
 0x9b1   :  { %9760 = vrot.lane.b32.xlu0 %v9759_v26, %s10023_s13 }
 0x9b5   :  { %8596 = vrot.lane.b32.xlu0 %v8575_v61, %s10021_s12 }
 0xa11   :  { %v8587_v47 = vpop.permute.xlu1 %8586  ;;  %v8595_v16 = vpop.permute.xlu0 %8594 }
 0xa12   :  { %v8607_v62 = vsel %vm8606_vm9, %v8587_v47, %v8595_v16 }
 0xa13   :  { %9004 = vmatprep.mubr.msk.f32.mxu0 %vm8681_vm10, %v8607_v62 }
 0xa21   :  { %v8589_v33 = vpop.permute.xlu1 %8588 }
 0xa23   :  { %v9761_v11 = vpop.permute.xlu0 %9760 }
 0xa24   :  { %v9763_v51 = vunpack.i.h.bf16 %v9761_v11  ;;  %v9762_v20 = vunpack.i.l.bf16 %v9761_v11 }
 0xa26   :  { %v8601_v27 = vsel %vm8600_vm11, %v8504_v59, %v9762_v20  ;;  %v8602_v58 = vsel %vm8600_vm11, %v8572_v31, %v9763_v51 }
 0xa27   :  { %v8597_v40 = vpop.permute.xlu0 %8596  ;;  %v8604_v23 = vsel %vm8603_vm12, %v8601_v27, %v8587_v47  ;;  %v8605_v17 = vsel %vm8603_vm12, %v8602_v58, %v8589_v33 }
 0xa28   :  { %v8608_v43 = vsel %vm8606_vm9, %v8589_v33, %v8597_v40  ;;  %8753 = vmatmul.mubr.f32.vlgmr.msra.gmra.mrb[88].mxu0 %v8604_v23 }
 0xa29   :  { %9005 = vmatprep.mubr.msk.f32.mxu0 %vm8681_vm10, %v8608_v43 }
 0xa2c   :  { %8759 = vmatmul.mubr.f32.gmra.mrb[90].mxu0 %v8605_v17 }
 0xafb   :  { %v8754_v2 = vpop.f32.mrb[88].mxu0 }
 0xafc   :  { %v8755_v46 = vadd.f32 %v8754_v2, %v8674_v49  ;;  %v8756_v55 = vpop.f32.mrb[89].mxu0 }
 0xafd   :  { %v8757_v60 = vadd.f32 %v8756_v55, %v8678_v63 }
 0xafe   :  { %8765 = vst [vmem:[#allocation5] sm:$0xff] %v8755_v46 }
 0xaff   :  { %8766 = vst [vmem:[#allocation5 + $0x8] sm:$0xff] %v8757_v60  ;;  %v8760_v56 = vpop.f32.mrb[90].mxu0 }
 0xb00   :  { %v8761_v19 = vadd.f32 %v8760_v56, %v8674_v49  ;;  %v8762_v44 = vpop.f32.mrb[91].mxu0 }
 0xb01   :  { %v8763_v42 = vadd.f32 %v8762_v44, %v8678_v63 }
 0xb02   :  { %8767 = vst [vmem:[#allocation5 + $0x10] sm:$0xff] %v8761_v19 }
 0xb03   :  { %8768 = vst [vmem:[#allocation5 + $0x18] sm:$0xff] %v8763_v42 }
 0xb04   :  { %9989 = shalt.err (!%p9986_p12)
}
 0xb05   :  { %s9990_s19 = scalar_lea.hbm %s11963_s5, 512 }
 0xb06   :  { %p9991_p13 = scmp.ne.s32.totalorder %s11963_s5, %s9990_s19  ;;  %p9994_p0 = scmp.lt.u32.totalorder %s9990_s19, %s11963_s5 }
 0xb08   :  { %p9996_p1 = pnand %p9994_p0, %p9991_p13 }
 0xb0a   :  { %9999 = shalt.err (!%p9996_p1)
}
 0xb0b   :  { %8780 = dma.vmem_to_hbm [thread:$0]  %s8775_s16, 512, %s11963_s5, [#allocation4], %s10005_s28, %s10005_s28, %s10006_s29  }
 0xb0c   :  { %10002 = dma.done.wait [#allocation4], 512  }
 0xb0d   :  { %10003 = vsyncadd [#allocation4], 4294966784 }
 0xb0e   :  { %8784 = vsyncpa [#allocation3], 1 }
 0xb0f   :  { %8785 = vsyncpa [#allocation4], 1 }

</bundles_post_ra>
